<compile_context>
chip_gen: v7x
topology: tpu7x:2x2x1
jax: 0.10.0
libtpu: 0.0.40
codegen_flags: <defaults>
</compile_context>

<pallas_src>
import functools

import jax
import jax.numpy as jnp
import numpy as np
from jax.experimental import pallas as pl
from jax.experimental.pallas import tpu as pltpu


def _round_up(x, m):
    return (x + m - 1) // m * m


def _resident_spec(block_shape, index_map):
    """Loop-invariant operand: constant index map (fetched once, stays VMEM-resident).
    Single-buffered so it does not double its VMEM footprint; falls back cleanly if the
    pipeline_mode kwarg is not available in this JAX version."""
    try:
        return pl.BlockSpec(block_shape, index_map, pipeline_mode=pl.Buffered(1))
    except TypeError:
        return pl.BlockSpec(block_shape, index_map)


# ----------------------------- Tiled linear (bf16 matmul + f32 bias) -----------------------------

def _linear_kernel(x_ref, w_ref, b_ref, o_ref):
    acc = jnp.dot(x_ref[...], w_ref[...], preferred_element_type=jnp.float32)
    o_ref[...] = (acc + b_ref[...]).astype(o_ref.dtype)


def linear_pallas(x, w_t, b2, *, out_dtype=jnp.float32, tile_n=256, tile_v=1024):
    """x: (N, K), w_t: (K, V) pre-transposed, b2: (1, V) f32 -> (N, V) out_dtype.

    MXU operands are bf16 (f32 accumulation). Tiled over (row-tiles, lane-dense output
    column tiles); K stays whole per block (K is small in this model). Both grid axes are
    'parallel' so the kernel megacore-shards on v7x's two TensorCores.
    """
    N, K = x.shape
    V = w_t.shape[1]

    Np = _round_up(N, 8)
    Vp = _round_up(V, 128)
    tn = min(tile_n, Np)
    tv = min(tile_v, Vp)
    Np = _round_up(Np, tn)
    Vp = _round_up(Vp, tv)

    xp = x.astype(jnp.bfloat16)
    if Np != N:
        xp = jnp.zeros((Np, K), jnp.bfloat16).at[:N].set(xp)
    wp = w_t.astype(jnp.bfloat16)
    if Vp != V:
        wp = jnp.zeros((K, Vp), jnp.bfloat16).at[:, :V].set(wp)
    bp = b2.astype(jnp.float32)
    if Vp != V:
        bp = jnp.zeros((1, Vp), jnp.float32).at[:, :V].set(bp)

    out = pl.pallas_call(
        _linear_kernel,
        out_shape=jax.ShapeDtypeStruct((Np, Vp), out_dtype),
        grid_spec=pltpu.PrefetchScalarGridSpec(
            num_scalar_prefetch=0,
            grid=(Np // tn, Vp // tv),
            in_specs=[
                pl.BlockSpec((tn, K), lambda i, j: (i, 0)),
                pl.BlockSpec((K, tv), lambda i, j: (0, j)),
                pl.BlockSpec((1, tv), lambda i, j: (0, j)),
            ],
            out_specs=pl.BlockSpec((tn, tv), lambda i, j: (i, j)),
        ),
        compiler_params=pltpu.CompilerParams(
            dimension_semantics=("parallel", "parallel")),
    )(xp, wp, bp)
    return out[:N, :V]


# ----------------------------- Fused multi-layer LSTM recurrence -----------------------------

def _fused_lstm_kernel(n_layers, tb, gx_ref, whh0_ref, *rest):
    """One grid step = `tb` timesteps for ALL LSTM layers. Grid axis 0 = blocked time."""
    if n_layers > 1:
        wihL_ref, whhL_ref, bL_ref, out_ref, h_sc, c_sc = rest
    else:
        wihL_ref = whhL_ref = bL_ref = None
        out_ref, h_sc, c_sc = rest

    @pl.when(pl.program_id(0) == 0)
    def _():
        h_sc[...] = jnp.zeros_like(h_sc)
        c_sc[...] = jnp.zeros_like(c_sc)

    Hp = h_sc.shape[-1]  # lane-padded hidden size (multiple of 128)

    def cell(gates, c_prev):
        # PyTorch gate order [i, f, g, o]; each gate block is 128-lane aligned.
        # Gate elementwise math stays f32 (no bf16 VPU/EUP on v5e).
        i_g = jax.nn.sigmoid(gates[:, 0 * Hp:1 * Hp])
        f_g = jax.nn.sigmoid(gates[:, 1 * Hp:2 * Hp])
        g_g = jnp.tanh(gates[:, 2 * Hp:3 * Hp])
        o_g = jax.nn.sigmoid(gates[:, 3 * Hp:4 * Hp])
        c_new = f_g * c_prev + i_g * g_g
        h_new = o_g * jnp.tanh(c_new)
        return h_new, c_new

    def step(i, carry):
        # Layer 0: x-projection (+ combined bias) was hoisted out of the recurrence (gx),
        # so only h_{t-1} @ W_hh^T remains on the critical sequential path.
        gates = (gx_ref[i].astype(jnp.float32)
                 + jnp.dot(h_sc[0].astype(jnp.bfloat16), whh0_ref[...],
                           preferred_element_type=jnp.float32))
        h_new, c_new = cell(gates, c_sc[0])
        h_sc[0] = h_new
        c_sc[0] = c_new
        x_t = h_new

        # Layers 1..L-1: two dots on pre-split weights (no concat copy on the critical path).
        for l in range(1, n_layers):
            gates = (jnp.dot(x_t.astype(jnp.bfloat16), wihL_ref[l - 1],
                             preferred_element_type=jnp.float32)
                     + jnp.dot(h_sc[l].astype(jnp.bfloat16), whhL_ref[l - 1],
                               preferred_element_type=jnp.float32)
                     + bL_ref[l - 1])
            h_new, c_new = cell(gates, c_sc[l])
            h_sc[l] = h_new
            c_sc[l] = c_new
            x_t = h_new

        out_ref[i] = x_t.astype(out_ref.dtype)
        return carry

    jax.lax.fori_loop(0, tb, step, 0, unroll=True)


def _lstm_vmem_budget(n_layers, Bp, Hp, tb):
    """Explicit scoped-VMEM budget: resident weights (x2, safe even without Buffered(1)),
    double-buffered streamed blocks and scratch, plus headroom; capped at v7x's 64 MiB."""
    G = 4 * Hp
    lx = max(n_layers - 1, 0)
    weights = Hp * G * 2 + lx * (2 * Hp * G * 2 + G * 4)        # bf16 weights + f32 bias
    streamed = 2 * tb * Bp * G * 2 + 2 * tb * Bp * Hp * 2       # gx in + h out (bf16, x2 bufs)
    scratch = 2 * n_layers * Bp * Hp * 4                        # f32 h/c state
    need = 2 * weights + streamed + scratch
    return int(min(64 << 20, max(32 << 20, need + (8 << 20))))


def lstm_fused_pallas(gx, whh0_t, wihL, whhL, bL, *, n_layers, time_block=4):
    """gx: (T, Bp, 4*Hp) bf16 precomputed layer-0 gate inputs; returns top-layer h (T, Bp, Hp) bf16."""
    T, Bp, G = gx.shape
    Hp = G // 4

    tb = max(1, min(time_block, T))
    Tp = _round_up(T, tb)
    if Tp != T:
        # Padded (zero-input) timesteps only touch state after the real sequence; their
        # outputs are sliced off below.
        gx = jnp.pad(gx, ((0, Tp - T), (0, 0), (0, 0)))

    in_specs = [
        pl.BlockSpec((tb, Bp, G), lambda t: (t, 0, 0)),          # streamed per time block
        _resident_spec((Hp, G), lambda t: (0, 0)),               # whh0: VMEM-resident
    ]
    operands = [gx, whh0_t]
    if n_layers > 1:
        Lx = wihL.shape[0]
        in_specs += [
            _resident_spec((Lx, Hp, G), lambda t: (0, 0, 0)),    # deep-layer w_ih^T
            _resident_spec((Lx, Hp, G), lambda t: (0, 0, 0)),    # deep-layer w_hh^T
            _resident_spec((Lx, 1, G), lambda t: (0, 0, 0)),     # deep-layer bias
        ]
        operands += [wihL, whhL, bL]

    out = pl.pallas_call(
        functools.partial(_fused_lstm_kernel, n_layers, tb),
        out_shape=jax.ShapeDtypeStruct((Tp, Bp, Hp), jnp.bfloat16),
        grid_spec=pltpu.PrefetchScalarGridSpec(
            num_scalar_prefetch=0,
            grid=(Tp // tb,),
            in_specs=in_specs,
            out_specs=pl.BlockSpec((tb, Bp, Hp), lambda t: (t, 0, 0)),
            scratch_shapes=[
                pltpu.VMEM((n_layers, Bp, Hp), jnp.float32),     # h state, all layers
                pltpu.VMEM((n_layers, Bp, Hp), jnp.float32),     # c state, all layers
            ],
        ),
        compiler_params=pltpu.CompilerParams(
            dimension_semantics=("arbitrary",),                  # time is a true recurrence
            vmem_limit_bytes=_lstm_vmem_budget(n_layers, Bp, Hp, tb)),
    )(*operands)
    return out[:T]


# ----------------------------- One-time parameter preparation -----------------------------

def prepare_params(params):
    """Transpose + pad weights ONCE into lane-aligned bf16 layouts (gate blocks at 128-lane
    boundaries). Zero padding is inert: padded hidden lanes of h/c stay exactly zero."""
    emb = params["embedding"].astype(jnp.float32)
    n_layers = len(params["lstm"])
    H = params["lstm"][0]["w_hh"].shape[1]
    Hp = _round_up(H, 128)
    G = 4 * Hp

    def scatter_gates(m_t):
        # m_t: (D, 4H) -> (D, 4*Hp), gate g occupies columns [g*Hp, g*Hp + H)
        D = m_t.shape[0]
        out = jnp.zeros((D, G), jnp.float32)
        for g in range(4):
            out = out.at[:, g * Hp:g * Hp + H].set(m_t[:, g * H:(g + 1) * H])
        return out

    l0 = params["lstm"][0]
    wih0_t = scatter_gates(l0["w_ih"].T.astype(jnp.float32)).astype(jnp.bfloat16)   # (E, G)
    b0 = scatter_gates((l0["b_ih"] + l0["b_hh"]).reshape(1, -1))                    # (1, G) f32
    whh0_t = jnp.zeros((Hp, G), jnp.float32).at[:H].set(
        scatter_gates(l0["w_hh"].T.astype(jnp.float32))).astype(jnp.bfloat16)       # (Hp, G)

    if n_layers > 1:
        wih_list, whh_list, b_list = [], [], []
        for l in range(1, n_layers):
            ly = params["lstm"][l]
            wih_list.append(jnp.zeros((Hp, G), jnp.float32).at[:H].set(
                scatter_gates(ly["w_ih"].T.astype(jnp.float32))))
            whh_list.append(jnp.zeros((Hp, G), jnp.float32).at[:H].set(
                scatter_gates(ly["w_hh"].T.astype(jnp.float32))))
            b_list.append(scatter_gates((ly["b_ih"] + ly["b_hh"]).reshape(1, -1)))
        wihL = jnp.stack(wih_list).astype(jnp.bfloat16)     # (L-1, Hp, G)
        whhL = jnp.stack(whh_list).astype(jnp.bfloat16)     # (L-1, Hp, G)
        bL = jnp.stack(b_list)                              # (L-1, 1, G) f32
    else:
        wihL = whhL = bL = None                             # nothing dummy is DMA'd

    V = params["out_w"].shape[0]
    Vp = _round_up(V, 128)
    out_w_t = jnp.zeros((Hp, Vp), jnp.float32).at[:H, :V].set(
        params["out_w"].T.astype(jnp.float32)).astype(jnp.bfloat16)                 # (Hp, Vp)
    out_b = jnp.zeros((1, Vp), jnp.float32).at[0, :V].set(
        params["out_b"].astype(jnp.float32))                                        # (1, Vp)

    return {
        "emb": emb, "wih0_t": wih0_t, "b0": b0, "whh0_t": whh0_t,
        "wihL": wihL, "whhL": whhL, "bL": bL,
        "out_w_t": out_w_t, "out_b": out_b,
    }


# ----------------------------- Decoder forward -----------------------------

@functools.partial(jax.jit, static_argnames=("n_layers",))
def decoder_forward(prep, encoder_out, text, *, n_layers):
    """encoder_out: (B, E) f32, text: (T, B) int32 -> logits (T+1, B, V) f32."""
    V = prep["emb"].shape[0]
    G = prep["whh0_t"].shape[1]
    Hp = G // 4

    # Embedding lookup + concat encoder_out as timestep 0 (glue: gather, outside Pallas).
    x = jnp.take(prep["emb"], text, axis=0)                      # (T, B, E)
    x = jnp.concatenate([encoder_out[None, :, :], x], axis=0)    # (T+1, B, E)
    Tp1, B, E = x.shape
    Bp = _round_up(B, 8)
    if Bp != B:                                                  # pad batch to 8 sublanes only
        x = jnp.pad(x, ((0, 0), (0, Bp - B), (0, 0)))

    # Hoisted layer-0 input projection: one bf16 MXU matmul over all (T+1)*Bp rows,
    # written in bf16 to halve the gx HBM round-trip.
    gx = linear_pallas(x.reshape(Tp1 * Bp, E), prep["wih0_t"], prep["b0"],
                       out_dtype=jnp.bfloat16)
    gx = gx.reshape(Tp1, Bp, G)

    # Fused multi-layer, time-blocked LSTM recurrence (state + weights resident in VMEM).
    h = lstm_fused_pallas(gx, prep["whh0_t"], prep["wihL"], prep["whhL"], prep["bL"],
                          n_layers=n_layers)                     # (T+1, Bp, Hp) bf16

    # Tiled, lane-dense vocab projection (bf16 operands, f32 logits).
    logits = linear_pallas(h.reshape(Tp1 * Bp, Hp), prep["out_w_t"], prep["out_b"],
                           out_dtype=jnp.float32)
    return logits.reshape(Tp1, Bp, -1)[:, :B, :V]


# ----------------------------- Pure-JAX f32 reference -----------------------------

def decoder_reference(params, encoder_out, text):
    x = jnp.take(params["embedding"], text, axis=0)
    x = jnp.concatenate([encoder_out[None, :, :], x], axis=0)

    def layer_apply(seq, layer):
        H = layer["w_hh"].shape[1]
        B = seq.shape[1]

        def step(carry, x_t):
            h, c = carry
            gates = (x_t @ layer["w_ih"].T + layer["b_ih"]
                     + h @ layer["w_hh"].T + layer["b_hh"])
            i_g = jax.nn.sigmoid(gates[:, 0 * H:1 * H])
            f_g = jax.nn.sigmoid(gates[:, 1 * H:2 * H])
            g_g = jnp.tanh(gates[:, 2 * H:3 * H])
            o_g = jax.nn.sigmoid(gates[:, 3 * H:4 * H])
            c_new = f_g * c + i_g * g_g
            h_new = o_g * jnp.tanh(c_new)
            return (h_new, c_new), h_new

        init = (jnp.zeros((B, H), jnp.float32), jnp.zeros((B, H), jnp.float32))
        _, out = jax.lax.scan(step, init, seq)
        return out

    h = x
    for layer in params["lstm"]:
        h = layer_apply(h, layer)
    return h @ params["out_w"].T + params["out_b"]


# ----------------------------- Param init & main -----------------------------

def init_params(key, emb_size, vocab_size, hidden_state, n_layers):
    keys = jax.random.split(key, 3 + 4 * n_layers)
    params = {
        "embedding": 0.1 * jax.random.normal(keys[0], (vocab_size, emb_size), jnp.float32),
        "out_w": 0.1 * jax.random.normal(keys[1], (vocab_size, hidden_state), jnp.float32),
        "out_b": 0.1 * jax.random.normal(keys[2], (vocab_size,), jnp.float32),
        "lstm": [],
    }
    for l in range(n_layers):
        d_in = emb_size if l == 0 else hidden_state
        k0, k1, k2, k3 = keys[3 + 4 * l: 3 + 4 * (l + 1)]
        params["lstm"].append({
            "w_ih": 0.1 * jax.random.normal(k0, (4 * hidden_state, d_in), jnp.float32),
            "w_hh": 0.1 * jax.random.normal(k1, (4 * hidden_state, hidden_state), jnp.float32),
            "b_ih": 0.1 * jax.random.normal(k2, (4 * hidden_state,), jnp.float32),
            "b_hh": 0.1 * jax.random.normal(k3, (4 * hidden_state,), jnp.float32),
        })
    return params


if __name__ == "__main__":
    emb_size = 32
    vocab_size = 64
    hidden_state = 32
    n_layers = 2
    seq_len = 8
    batch = 2

    key = jax.random.PRNGKey(0)
    k_param, k_enc, k_txt = jax.random.split(key, 3)

    params = init_params(k_param, emb_size, vocab_size, hidden_state, n_layers)
    encoder_out = jax.random.normal(k_enc, (batch, emb_size), jnp.float32)
    text = jax.random.randint(k_txt, (seq_len, batch), 0, vocab_size, dtype=jnp.int32)

    prep = prepare_params(params)          # one-time transpose/pad/bf16 cast (not per call)

    logits = decoder_forward(prep, encoder_out, text, n_layers=n_layers)
    logits = jax.block_until_ready(logits)

    assert logits.shape == (seq_len + 1, batch, vocab_size), logits.shape

    # Reference is pure f32; the kernel uses bf16 MXU operands (f32 accumulation), so the
    # tolerance is loosened accordingly (real bugs produce O(0.1-1) errors, well above this).
    ref = decoder_reference(params, encoder_out, text)
    np.testing.assert_allclose(np.asarray(logits), np.asarray(ref), rtol=5e-2, atol=5e-2)

    print("KERNEL_OK")
</pallas_src>

<mosaic_0001>
module attributes {stable_mosaic.version = 11 : i64} {
  func.func @_linear_kernel(%arg0: i32, %arg1: i32, %arg2: memref<72x32xbf16, #tpu.memory_space<vmem>>, %arg3: memref<32x512xbf16, #tpu.memory_space<vmem>>, %arg4: memref<1x512xf32, #tpu.memory_space<vmem>>, %arg5: memref<72x512xbf16, #tpu.memory_space<vmem>>) attributes {dimension_semantics = [#tpu.dimension_semantics<parallel>, #tpu.dimension_semantics<parallel>], iteration_bounds = array<i64: 1, 1>, scalar_prefetch = 0 : i64, scratch_operands = 0 : i64, tpu.core_type = #tpu.core_type<tc>, window_params = [{transform_indices = @transform_0, window_bounds = array<i64: 72, 32>}, {transform_indices = @transform_1, window_bounds = array<i64: 32, 512>}, {transform_indices = @transform_2, window_bounds = array<i64: 1, 512>}, {transform_indices = @transform_3, window_bounds = array<i64: 72, 512>}]} {
    %c0 = arith.constant 0 : index
    %c0_0 = arith.constant 0 : index
    %0 = vector.load %arg2[%c0, %c0_0] : memref<72x32xbf16, #tpu.memory_space<vmem>>, vector<72x32xbf16>
    %c0_1 = arith.constant 0 : index
    %c0_2 = arith.constant 0 : index
    %1 = vector.load %arg3[%c0_1, %c0_2] : memref<32x512xbf16, #tpu.memory_space<vmem>>, vector<32x512xbf16>
    %cst = arith.constant dense<0.000000e+00> : vector<72x512xf32>
    %2 = tpu.matmul %0, %1, %cst {dimension_numbers = #tpu.dot_dimension_numbers<[1], [0], [0], [1], [0, 0, 1, 1], [], []>} : vector<72x32xbf16>, vector<32x512xbf16>, vector<72x512xf32> -> vector<72x512xf32>
    %c0_3 = arith.constant 0 : index
    %c0_4 = arith.constant 0 : index
    %3 = vector.load %arg4[%c0_3, %c0_4] : memref<1x512xf32, #tpu.memory_space<vmem>>, vector<1x512xf32>
    %4 = vector.broadcast %3 : vector<1x512xf32> to vector<72x512xf32>
    %5 = arith.addf %2, %4 : vector<72x512xf32>
    %6 = arith.truncf %5 : vector<72x512xf32> to vector<72x512xbf16>
    %c0_5 = arith.constant 0 : index
    %c0_6 = arith.constant 0 : index
    %7 = vector.load %arg5[%c0_5, %c0_6] : memref<72x512xbf16, #tpu.memory_space<vmem>>, vector<72x512xbf16>
    tpu.vector_store %arg5[%c0_5, %c0_6], %6 {strides = array<i32>} : memref<72x512xbf16, #tpu.memory_space<vmem>>, vector<72x512xbf16>,
    return
  }
  func.func @transform_0(%arg0: i32, %arg1: i32) -> (i32, i32) {
    %c0_i32 = arith.constant 0 : i32
    %c0_i32_0 = arith.constant 0 : i32
    return %arg0, %c0_i32 : i32, i32
  }
  func.func @transform_1(%arg0: i32, %arg1: i32) -> (i32, i32) {
    %c0_i32 = arith.constant 0 : i32
    %c0_i32_0 = arith.constant 0 : i32
    return %c0_i32, %arg1 : i32, i32
  }
  func.func @transform_2(%arg0: i32, %arg1: i32) -> (i32, i32) {
    %c0_i32 = arith.constant 0 : i32
    %c0_i32_0 = arith.constant 0 : i32
    return %c0_i32, %arg1 : i32, i32
  }
  func.func @transform_3(%arg0: i32, %arg1: i32) -> (i32, i32) {
    %c0_i32 = arith.constant 0 : i32
    return %arg0, %arg1 : i32, i32
  }
}

module attributes {stable_mosaic.version = 11 : i64} {
  func.func @_linear_kernel(%arg0: i32, %arg1: i32, %arg2: memref<72x128xbf16, #tpu.memory_space<vmem>>, %arg3: memref<128x128xbf16, #tpu.memory_space<vmem>>, %arg4: memref<1x128xf32, #tpu.memory_space<vmem>>, %arg5: memref<72x128xf32, #tpu.memory_space<vmem>>) attributes {dimension_semantics = [#tpu.dimension_semantics<parallel>, #tpu.dimension_semantics<parallel>], iteration_bounds = array<i64: 1, 1>, scalar_prefetch = 0 : i64, scratch_operands = 0 : i64, tpu.core_type = #tpu.core_type<tc>, window_params = [{transform_indices = @transform_0, window_bounds = array<i64: 72, 128>}, {transform_indices = @transform_1, window_bounds = array<i64: 128, 128>}, {transform_indices = @transform_2, window_bounds = array<i64: 1, 128>}, {transform_indices = @transform_3, window_bounds = array<i64: 72, 128>}]} {
    %c0 = arith.constant 0 : index
    %c0_0 = arith.constant 0 : index
    %0 = vector.load %arg2[%c0, %c0_0] : memref<72x128xbf16, #tpu.memory_space<vmem>>, vector<72x128xbf16>
    %c0_1 = arith.constant 0 : index
    %c0_2 = arith.constant 0 : index
    %1 = vector.load %arg3[%c0_1, %c0_2] : memref<128x128xbf16, #tpu.memory_space<vmem>>, vector<128x128xbf16>
    %cst = arith.constant dense<0.000000e+00> : vector<72x128xf32>
    %2 = tpu.matmul %0, %1, %cst {dimension_numbers = #tpu.dot_dimension_numbers<[1], [0], [0], [1], [0, 0, 1, 1], [], []>} : vector<72x128xbf16>, vector<128x128xbf16>, vector<72x128xf32> -> vector<72x128xf32>
    %c0_3 = arith.constant 0 : index
    %c0_4 = arith.constant 0 : index
    %3 = vector.load %arg4[%c0_3, %c0_4] : memref<1x128xf32, #tpu.memory_space<vmem>>, vector<1x128xf32>
    %4 = vector.broadcast %3 : vector<1x128xf32> to vector<72x128xf32>
    %5 = arith.addf %2, %4 : vector<72x128xf32>
    %c0_5 = arith.constant 0 : index
    %c0_6 = arith.constant 0 : index
    %6 = vector.load %arg5[%c0_5, %c0_6] : memref<72x128xf32, #tpu.memory_space<vmem>>, vector<72x128xf32>
    tpu.vector_store %arg5[%c0_5, %c0_6], %5 {strides = array<i32>} : memref<72x128xf32, #tpu.memory_space<vmem>>, vector<72x128xf32>,
    return
  }
  func.func @transform_0(%arg0: i32, %arg1: i32) -> (i32, i32) {
    %c0_i32 = arith.constant 0 : i32
    %c0_i32_0 = arith.constant 0 : i32
    return %arg0, %c0_i32 : i32, i32
  }
  func.func @transform_1(%arg0: i32, %arg1: i32) -> (i32, i32) {
    %c0_i32 = arith.constant 0 : i32
    %c0_i32_0 = arith.constant 0 : i32
    return %c0_i32, %arg1 : i32, i32
  }
  func.func @transform_2(%arg0: i32, %arg1: i32) -> (i32, i32) {
    %c0_i32 = arith.constant 0 : i32
    %c0_i32_0 = arith.constant 0 : i32
    return %c0_i32, %arg1 : i32, i32
  }
  func.func @transform_3(%arg0: i32, %arg1: i32) -> (i32, i32) {
    %c0_i32 = arith.constant 0 : i32
    return %arg0, %arg1 : i32, i32
  }
}

module attributes {stable_mosaic.version = 11 : i64} {
  func.func @_fused_lstm_kernel(%arg0: i32, %arg1: memref<4x8x512xbf16, #tpu.memory_space<vmem>>, %arg2: memref<128x512xbf16, #tpu.memory_space<vmem>>, %arg3: memref<1x128x512xbf16, #tpu.memory_space<vmem>>, %arg4: memref<1x128x512xbf16, #tpu.memory_space<vmem>>, %arg5: memref<1x1x512xf32, #tpu.memory_space<vmem>>, %arg6: memref<4x8x128xbf16, #tpu.memory_space<vmem>>, %arg7: memref<2x8x128xf32, #tpu.memory_space<vmem>>, %arg8: memref<2x8x128xf32, #tpu.memory_space<vmem>>) attributes {dimension_semantics = [#tpu.dimension_semantics<arbitrary>], iteration_bounds = array<i64: 3>, scalar_prefetch = 0 : i64, scratch_operands = 2 : i64, tpu.core_type = #tpu.core_type<tc>, window_params = [{transform_indices = @transform_0, window_bounds = array<i64: 4, 8, 512>}, {pipeline_mode = #tpu.pipeline_mode<synchronous>, transform_indices = @transform_1, window_bounds = array<i64: 128, 512>}, {pipeline_mode = #tpu.pipeline_mode<synchronous>, transform_indices = @transform_2, window_bounds = array<i64: 1, 128, 512>}, {pipeline_mode = #tpu.pipeline_mode<synchronous>, transform_indices = @transform_3, window_bounds = array<i64: 1, 128, 512>}, {pipeline_mode = #tpu.pipeline_mode<synchronous>, transform_indices = @transform_4, window_bounds = array<i64: 1, 1, 512>}, {transform_indices = @transform_5, window_bounds = array<i64: 4, 8, 128>}]} {
    %c0_i32 = arith.constant 0 : i32
    %0 = arith.cmpi eq, %arg0, %c0_i32 : i32
    %1 = arith.extui %0 : i1 to i32
    %c0_i32_0 = arith.constant 0 : i32
    %2 = arith.cmpi ne, %1, %c0_i32_0 : i32
    scf.if %2 {
      %cst_191 = arith.constant 0.000000e+00 : f32
      %387 = vector.broadcast %cst_191 : f32 to vector<2x8x128xf32>
      %c0_192 = arith.constant 0 : index
      %c0_193 = arith.constant 0 : index
      %c0_194 = arith.constant 0 : index
      %388 = vector.load %arg7[%c0_192, %c0_193, %c0_194] : memref<2x8x128xf32, #tpu.memory_space<vmem>>, vector<2x8x128xf32>
      tpu.vector_store %arg7[%c0_192, %c0_193, %c0_194], %387 {strides = array<i32>} : memref<2x8x128xf32, #tpu.memory_space<vmem>>, vector<2x8x128xf32>,
      %cst_195 = arith.constant 0.000000e+00 : f32
      %389 = vector.broadcast %cst_195 : f32 to vector<2x8x128xf32>
      %c0_196 = arith.constant 0 : index
      %c0_197 = arith.constant 0 : index
      %c0_198 = arith.constant 0 : index
      %390 = vector.load %arg8[%c0_196, %c0_197, %c0_198] : memref<2x8x128xf32, #tpu.memory_space<vmem>>, vector<2x8x128xf32>
      tpu.vector_store %arg8[%c0_196, %c0_197, %c0_198], %389 {strides = array<i32>} : memref<2x8x128xf32, #tpu.memory_space<vmem>>, vector<2x8x128xf32>,
    } else {
    }
    %c0_i32_1 = arith.constant 0 : i32
    %3 = arith.index_cast %c0_i32_1 : i32 to index
    %c0 = arith.constant 0 : index
    %c0_2 = arith.constant 0 : index
    %4 = vector.load %arg1[%3, %c0, %c0_2] : memref<4x8x512xbf16, #tpu.memory_space<vmem>>, vector<1x8x512xbf16>
    %5 = vector.shape_cast %4 : vector<1x8x512xbf16> to vector<8x512xbf16>
    %6 = arith.extf %5 : vector<8x512xbf16> to vector<8x512xf32>
    %c0_3 = arith.constant 0 : index
    %c0_4 = arith.constant 0 : index
    %c0_5 = arith.constant 0 : index
    %7 = vector.load %arg7[%c0_3, %c0_4, %c0_5] : memref<2x8x128xf32, #tpu.memory_space<vmem>>, vector<1x8x128xf32>
    %8 = vector.shape_cast %7 : vector<1x8x128xf32> to vector<8x128xf32>
    %9 = arith.truncf %8 : vector<8x128xf32> to vector<8x128xbf16>
    %c0_6 = arith.constant 0 : index
    %c0_7 = arith.constant 0 : index
    %10 = vector.load %arg2[%c0_6, %c0_7] : memref<128x512xbf16, #tpu.memory_space<vmem>>, vector<128x512xbf16>
    %cst = arith.constant dense<0.000000e+00> : vector<8x512xf32>
    %11 = tpu.matmul %9, %10, %cst {dimension_numbers = #tpu.dot_dimension_numbers<[1], [0], [0], [1], [0, 0, 1, 1], [], []>} : vector<8x128xbf16>, vector<128x512xbf16>, vector<8x512xf32> -> vector<8x512xf32>
    %12 = arith.addf %6, %11 : vector<8x512xf32>
    %c0_8 = arith.constant 0 : index
    %c0_9 = arith.constant 0 : index
    %c0_10 = arith.constant 0 : index
    %13 = vector.load %arg8[%c0_8, %c0_9, %c0_10] : memref<2x8x128xf32, #tpu.memory_space<vmem>>, vector<1x8x128xf32>
    %14 = vector.shape_cast %13 : vector<1x8x128xf32> to vector<8x128xf32>
    %15 = vector.extract_strided_slice %12 {offsets = [0, 0], sizes = [8, 128], strides = [1, 1]} : vector<8x512xf32> to vector<8x128xf32>
    %16 = arith.negf %15 : vector<8x128xf32>
    %17 = math.exp %16 : vector<8x128xf32>
    %cst_11 = arith.constant 1.000000e+00 : f32
    %18 = vector.broadcast %cst_11 : f32 to vector<8x128xf32>
    %19 = arith.addf %18, %17 : vector<8x128xf32>
    %20 = arith.divf %18, %19 : vector<8x128xf32>
    %21 = vector.extract_strided_slice %12 {offsets = [0, 128], sizes = [8, 128], strides = [1, 1]} : vector<8x512xf32> to vector<8x128xf32>
    %22 = arith.negf %21 : vector<8x128xf32>
    %23 = math.exp %22 : vector<8x128xf32>
    %cst_12 = arith.constant 1.000000e+00 : f32
    %24 = vector.broadcast %cst_12 : f32 to vector<8x128xf32>
    %25 = arith.addf %24, %23 : vector<8x128xf32>
    %26 = arith.divf %24, %25 : vector<8x128xf32>
    %27 = vector.extract_strided_slice %12 {offsets = [0, 256], sizes = [8, 128], strides = [1, 1]} : vector<8x512xf32> to vector<8x128xf32>
    %28 = math.tanh %27 : vector<8x128xf32>
    %29 = vector.extract_strided_slice %12 {offsets = [0, 384], sizes = [8, 128], strides = [1, 1]} : vector<8x512xf32> to vector<8x128xf32>
    %30 = arith.negf %29 : vector<8x128xf32>
    %31 = math.exp %30 : vector<8x128xf32>
    %cst_13 = arith.constant 1.000000e+00 : f32
    %32 = vector.broadcast %cst_13 : f32 to vector<8x128xf32>
    %33 = arith.addf %32, %31 : vector<8x128xf32>
    %34 = arith.divf %32, %33 : vector<8x128xf32>
    %35 = arith.mulf %26, %14 : vector<8x128xf32>
    %36 = arith.mulf %20, %28 : vector<8x128xf32>
    %37 = arith.addf %35, %36 : vector<8x128xf32>
    %38 = math.tanh %37 : vector<8x128xf32>
    %39 = arith.mulf %34, %38 : vector<8x128xf32>
    %c0_14 = arith.constant 0 : index
    %c0_15 = arith.constant 0 : index
    %c0_16 = arith.constant 0 : index
    %40 = vector.load %arg7[%c0_14, %c0_15, %c0_16] : memref<2x8x128xf32, #tpu.memory_space<vmem>>, vector<1x8x128xf32>
    %41 = vector.shape_cast %40 : vector<1x8x128xf32> to vector<8x128xf32>
    %42 = vector.shape_cast %39 : vector<8x128xf32> to vector<1x8x128xf32>
    tpu.vector_store %arg7[%c0_14, %c0_15, %c0_16], %42 {strides = array<i32>} : memref<2x8x128xf32, #tpu.memory_space<vmem>>, vector<1x8x128xf32>,
    %c0_17 = arith.constant 0 : index
    %c0_18 = arith.constant 0 : index
    %c0_19 = arith.constant 0 : index
    %43 = vector.load %arg8[%c0_17, %c0_18, %c0_19] : memref<2x8x128xf32, #tpu.memory_space<vmem>>, vector<1x8x128xf32>
    %44 = vector.shape_cast %43 : vector<1x8x128xf32> to vector<8x128xf32>
    %45 = vector.shape_cast %37 : vector<8x128xf32> to vector<1x8x128xf32>
    tpu.vector_store %arg8[%c0_17, %c0_18, %c0_19], %45 {strides = array<i32>} : memref<2x8x128xf32, #tpu.memory_space<vmem>>, vector<1x8x128xf32>,
    %46 = arith.truncf %39 : vector<8x128xf32> to vector<8x128xbf16>
    %c0_20 = arith.constant 0 : index
    %c0_21 = arith.constant 0 : index
    %c0_22 = arith.constant 0 : index
    %47 = vector.load %arg3[%c0_20, %c0_21, %c0_22] : memref<1x128x512xbf16, #tpu.memory_space<vmem>>, vector<1x128x512xbf16>
    %48 = vector.shape_cast %47 : vector<1x128x512xbf16> to vector<128x512xbf16>
    %cst_23 = arith.constant dense<0.000000e+00> : vector<8x512xf32>
    %49 = tpu.matmul %46, %48, %cst_23 {dimension_numbers = #tpu.dot_dimension_numbers<[1], [0], [0], [1], [0, 0, 1, 1], [], []>} : vector<8x128xbf16>, vector<128x512xbf16>, vector<8x512xf32> -> vector<8x512xf32>
    %c1 = arith.constant 1 : index
    %c0_24 = arith.constant 0 : index
    %c0_25 = arith.constant 0 : index
    %50 = vector.load %arg7[%c1, %c0_24, %c0_25] : memref<2x8x128xf32, #tpu.memory_space<vmem>>, vector<1x8x128xf32>
    %51 = vector.shape_cast %50 : vector<1x8x128xf32> to vector<8x128xf32>
    %52 = arith.truncf %51 : vector<8x128xf32> to vector<8x128xbf16>
    %c0_26 = arith.constant 0 : index
    %c0_27 = arith.constant 0 : index
    %c0_28 = arith.constant 0 : index
    %53 = vector.load %arg4[%c0_26, %c0_27, %c0_28] : memref<1x128x512xbf16, #tpu.memory_space<vmem>>, vector<1x128x512xbf16>
    %54 = vector.shape_cast %53 : vector<1x128x512xbf16> to vector<128x512xbf16>
    %cst_29 = arith.constant dense<0.000000e+00> : vector<8x512xf32>
    %55 = tpu.matmul %52, %54, %cst_29 {dimension_numbers = #tpu.dot_dimension_numbers<[1], [0], [0], [1], [0, 0, 1, 1], [], []>} : vector<8x128xbf16>, vector<128x512xbf16>, vector<8x512xf32> -> vector<8x512xf32>
    %56 = arith.addf %49, %55 : vector<8x512xf32>
    %c0_30 = arith.constant 0 : index
    %c0_31 = arith.constant 0 : index
    %c0_32 = arith.constant 0 : index
    %57 = vector.load %arg5[%c0_30, %c0_31, %c0_32] : memref<1x1x512xf32, #tpu.memory_space<vmem>>, vector<1x1x512xf32>
    %58 = vector.shape_cast %57 : vector<1x1x512xf32> to vector<1x512xf32>
    %59 = vector.broadcast %58 : vector<1x512xf32> to vector<8x512xf32>
    %60 = arith.addf %56, %59 : vector<8x512xf32>
    %c1_33 = arith.constant 1 : index
    %c0_34 = arith.constant 0 : index
    %c0_35 = arith.constant 0 : index
    %61 = vector.load %arg8[%c1_33, %c0_34, %c0_35] : memref<2x8x128xf32, #tpu.memory_space<vmem>>, vector<1x8x128xf32>
    %62 = vector.shape_cast %61 : vector<1x8x128xf32> to vector<8x128xf32>
    %63 = vector.extract_strided_slice %60 {offsets = [0, 0], sizes = [8, 128], strides = [1, 1]} : vector<8x512xf32> to vector<8x128xf32>
    %64 = arith.negf %63 : vector<8x128xf32>
    %65 = math.exp %64 : vector<8x128xf32>
    %cst_36 = arith.constant 1.000000e+00 : f32
    %66 = vector.broadcast %cst_36 : f32 to vector<8x128xf32>
    %67 = arith.addf %66, %65 : vector<8x128xf32>
    %68 = arith.divf %66, %67 : vector<8x128xf32>
    %69 = vector.extract_strided_slice %60 {offsets = [0, 128], sizes = [8, 128], strides = [1, 1]} : vector<8x512xf32> to vector<8x128xf32>
    %70 = arith.negf %69 : vector<8x128xf32>
    %71 = math.exp %70 : vector<8x128xf32>
    %cst_37 = arith.constant 1.000000e+00 : f32
    %72 = vector.broadcast %cst_37 : f32 to vector<8x128xf32>
    %73 = arith.addf %72, %71 : vector<8x128xf32>
    %74 = arith.divf %72, %73 : vector<8x128xf32>
    %75 = vector.extract_strided_slice %60 {offsets = [0, 256], sizes = [8, 128], strides = [1, 1]} : vector<8x512xf32> to vector<8x128xf32>
    %76 = math.tanh %75 : vector<8x128xf32>
    %77 = vector.extract_strided_slice %60 {offsets = [0, 384], sizes = [8, 128], strides = [1, 1]} : vector<8x512xf32> to vector<8x128xf32>
    %78 = arith.negf %77 : vector<8x128xf32>
    %79 = math.exp %78 : vector<8x128xf32>
    %cst_38 = arith.constant 1.000000e+00 : f32
    %80 = vector.broadcast %cst_38 : f32 to vector<8x128xf32>
    %81 = arith.addf %80, %79 : vector<8x128xf32>
    %82 = arith.divf %80, %81 : vector<8x128xf32>
    %83 = arith.mulf %74, %62 : vector<8x128xf32>
    %84 = arith.mulf %68, %76 : vector<8x128xf32>
    %85 = arith.addf %83, %84 : vector<8x128xf32>
    %86 = math.tanh %85 : vector<8x128xf32>
    %87 = arith.mulf %82, %86 : vector<8x128xf32>
    %c1_39 = arith.constant 1 : index
    %c0_40 = arith.constant 0 : index
    %c0_41 = arith.constant 0 : index
    %88 = vector.load %arg7[%c1_39, %c0_40, %c0_41] : memref<2x8x128xf32, #tpu.memory_space<vmem>>, vector<1x8x128xf32>
    %89 = vector.shape_cast %88 : vector<1x8x128xf32> to vector<8x128xf32>
    %90 = vector.shape_cast %87 : vector<8x128xf32> to vector<1x8x128xf32>
    tpu.vector_store %arg7[%c1_39, %c0_40, %c0_41], %90 {strides = array<i32>} : memref<2x8x128xf32, #tpu.memory_space<vmem>>, vector<1x8x128xf32>,
    %c1_42 = arith.constant 1 : index
    %c0_43 = arith.constant 0 : index
    %c0_44 = arith.constant 0 : index
    %91 = vector.load %arg8[%c1_42, %c0_43, %c0_44] : memref<2x8x128xf32, #tpu.memory_space<vmem>>, vector<1x8x128xf32>
    %92 = vector.shape_cast %91 : vector<1x8x128xf32> to vector<8x128xf32>
    %93 = vector.shape_cast %85 : vector<8x128xf32> to vector<1x8x128xf32>
    tpu.vector_store %arg8[%c1_42, %c0_43, %c0_44], %93 {strides = array<i32>} : memref<2x8x128xf32, #tpu.memory_space<vmem>>, vector<1x8x128xf32>,
    %94 = arith.truncf %87 : vector<8x128xf32> to vector<8x128xbf16>
    %95 = arith.index_cast %c0_i32_1 : i32 to index
    %c0_45 = arith.constant 0 : index
    %c0_46 = arith.constant 0 : index
    %96 = vector.load %arg6[%95, %c0_45, %c0_46] : memref<4x8x128xbf16, #tpu.memory_space<vmem>>, vector<1x8x128xbf16>
    %97 = vector.shape_cast %96 : vector<1x8x128xbf16> to vector<8x128xbf16>
    %98 = vector.shape_cast %94 : vector<8x128xbf16> to vector<1x8x128xbf16>
    tpu.vector_store %arg6[%95, %c0_45, %c0_46], %98 {strides = array<i32>} : memref<4x8x128xbf16, #tpu.memory_space<vmem>>, vector<1x8x128xbf16>,
    %c1_i32 = arith.constant 1 : i32
    %99 = arith.index_cast %c1_i32 : i32 to index
    %c0_47 = arith.constant 0 : index
    %c0_48 = arith.constant 0 : index
    %100 = vector.load %arg1[%99, %c0_47, %c0_48] : memref<4x8x512xbf16, #tpu.memory_space<vmem>>, vector<1x8x512xbf16>
    %101 = vector.shape_cast %100 : vector<1x8x512xbf16> to vector<8x512xbf16>
    %102 = arith.extf %101 : vector<8x512xbf16> to vector<8x512xf32>
    %c0_49 = arith.constant 0 : index
    %c0_50 = arith.constant 0 : index
    %c0_51 = arith.constant 0 : index
    %103 = vector.load %arg7[%c0_49, %c0_50, %c0_51] : memref<2x8x128xf32, #tpu.memory_space<vmem>>, vector<1x8x128xf32>
    %104 = vector.shape_cast %103 : vector<1x8x128xf32> to vector<8x128xf32>
    %105 = arith.truncf %104 : vector<8x128xf32> to vector<8x128xbf16>
    %c0_52 = arith.constant 0 : index
    %c0_53 = arith.constant 0 : index
    %106 = vector.load %arg2[%c0_52, %c0_53] : memref<128x512xbf16, #tpu.memory_space<vmem>>, vector<128x512xbf16>
    %cst_54 = arith.constant dense<0.000000e+00> : vector<8x512xf32>
    %107 = tpu.matmul %105, %106, %cst_54 {dimension_numbers = #tpu.dot_dimension_numbers<[1], [0], [0], [1], [0, 0, 1, 1], [], []>} : vector<8x128xbf16>, vector<128x512xbf16>, vector<8x512xf32> -> vector<8x512xf32>
    %108 = arith.addf %102, %107 : vector<8x512xf32>
    %c0_55 = arith.constant 0 : index
    %c0_56 = arith.constant 0 : index
    %c0_57 = arith.constant 0 : index
    %109 = vector.load %arg8[%c0_55, %c0_56, %c0_57] : memref<2x8x128xf32, #tpu.memory_space<vmem>>, vector<1x8x128xf32>
    %110 = vector.shape_cast %109 : vector<1x8x128xf32> to vector<8x128xf32>
    %111 = vector.extract_strided_slice %108 {offsets = [0, 0], sizes = [8, 128], strides = [1, 1]} : vector<8x512xf32> to vector<8x128xf32>
    %112 = arith.negf %111 : vector<8x128xf32>
    %113 = math.exp %112 : vector<8x128xf32>
    %cst_58 = arith.constant 1.000000e+00 : f32
    %114 = vector.broadcast %cst_58 : f32 to vector<8x128xf32>
    %115 = arith.addf %114, %113 : vector<8x128xf32>
    %116 = arith.divf %114, %115 : vector<8x128xf32>
    %117 = vector.extract_strided_slice %108 {offsets = [0, 128], sizes = [8, 128], strides = [1, 1]} : vector<8x512xf32> to vector<8x128xf32>
    %118 = arith.negf %117 : vector<8x128xf32>
    %119 = math.exp %118 : vector<8x128xf32>
    %cst_59 = arith.constant 1.000000e+00 : f32
    %120 = vector.broadcast %cst_59 : f32 to vector<8x128xf32>
    %121 = arith.addf %120, %119 : vector<8x128xf32>
    %122 = arith.divf %120, %121 : vector<8x128xf32>
    %123 = vector.extract_strided_slice %108 {offsets = [0, 256], sizes = [8, 128], strides = [1, 1]} : vector<8x512xf32> to vector<8x128xf32>
    %124 = math.tanh %123 : vector<8x128xf32>
    %125 = vector.extract_strided_slice %108 {offsets = [0, 384], sizes = [8, 128], strides = [1, 1]} : vector<8x512xf32> to vector<8x128xf32>
    %126 = arith.negf %125 : vector<8x128xf32>
    %127 = math.exp %126 : vector<8x128xf32>
    %cst_60 = arith.constant 1.000000e+00 : f32
    %128 = vector.broadcast %cst_60 : f32 to vector<8x128xf32>
    %129 = arith.addf %128, %127 : vector<8x128xf32>
    %130 = arith.divf %128, %129 : vector<8x128xf32>
    %131 = arith.mulf %122, %110 : vector<8x128xf32>
    %132 = arith.mulf %116, %124 : vector<8x128xf32>
    %133 = arith.addf %131, %132 : vector<8x128xf32>
    %134 = math.tanh %133 : vector<8x128xf32>
    %135 = arith.mulf %130, %134 : vector<8x128xf32>
    %c0_61 = arith.constant 0 : index
    %c0_62 = arith.constant 0 : index
    %c0_63 = arith.constant 0 : index
    %136 = vector.load %arg7[%c0_61, %c0_62, %c0_63] : memref<2x8x128xf32, #tpu.memory_space<vmem>>, vector<1x8x128xf32>
    %137 = vector.shape_cast %136 : vector<1x8x128xf32> to vector<8x128xf32>
    %138 = vector.shape_cast %135 : vector<8x128xf32> to vector<1x8x128xf32>
    tpu.vector_store %arg7[%c0_61, %c0_62, %c0_63], %138 {strides = array<i32>} : memref<2x8x128xf32, #tpu.memory_space<vmem>>, vector<1x8x128xf32>,
    %c0_64 = arith.constant 0 : index
    %c0_65 = arith.constant 0 : index
    %c0_66 = arith.constant 0 : index
    %139 = vector.load %arg8[%c0_64, %c0_65, %c0_66] : memref<2x8x128xf32, #tpu.memory_space<vmem>>, vector<1x8x128xf32>
    %140 = vector.shape_cast %139 : vector<1x8x128xf32> to vector<8x128xf32>
    %141 = vector.shape_cast %133 : vector<8x128xf32> to vector<1x8x128xf32>
    tpu.vector_store %arg8[%c0_64, %c0_65, %c0_66], %141 {strides = array<i32>} : memref<2x8x128xf32, #tpu.memory_space<vmem>>, vector<1x8x128xf32>,
    %142 = arith.truncf %135 : vector<8x128xf32> to vector<8x128xbf16>
    %c0_67 = arith.constant 0 : index
    %c0_68 = arith.constant 0 : index
    %c0_69 = arith.constant 0 : index
    %143 = vector.load %arg3[%c0_67, %c0_68, %c0_69] : memref<1x128x512xbf16, #tpu.memory_space<vmem>>, vector<1x128x512xbf16>
    %144 = vector.shape_cast %143 : vector<1x128x512xbf16> to vector<128x512xbf16>
    %cst_70 = arith.constant dense<0.000000e+00> : vector<8x512xf32>
    %145 = tpu.matmul %142, %144, %cst_70 {dimension_numbers = #tpu.dot_dimension_numbers<[1], [0], [0], [1], [0, 0, 1, 1], [], []>} : vector<8x128xbf16>, vector<128x512xbf16>, vector<8x512xf32> -> vector<8x512xf32>
    %c1_71 = arith.constant 1 : index
    %c0_72 = arith.constant 0 : index
    %c0_73 = arith.constant 0 : index
    %146 = vector.load %arg7[%c1_71, %c0_72, %c0_73] : memref<2x8x128xf32, #tpu.memory_space<vmem>>, vector<1x8x128xf32>
    %147 = vector.shape_cast %146 : vector<1x8x128xf32> to vector<8x128xf32>
    %148 = arith.truncf %147 : vector<8x128xf32> to vector<8x128xbf16>
    %c0_74 = arith.constant 0 : index
    %c0_75 = arith.constant 0 : index
    %c0_76 = arith.constant 0 : index
    %149 = vector.load %arg4[%c0_74, %c0_75, %c0_76] : memref<1x128x512xbf16, #tpu.memory_space<vmem>>, vector<1x128x512xbf16>
    %150 = vector.shape_cast %149 : vector<1x128x512xbf16> to vector<128x512xbf16>
    %cst_77 = arith.constant dense<0.000000e+00> : vector<8x512xf32>
    %151 = tpu.matmul %148, %150, %cst_77 {dimension_numbers = #tpu.dot_dimension_numbers<[1], [0], [0], [1], [0, 0, 1, 1], [], []>} : vector<8x128xbf16>, vector<128x512xbf16>, vector<8x512xf32> -> vector<8x512xf32>
    %152 = arith.addf %145, %151 : vector<8x512xf32>
    %c0_78 = arith.constant 0 : index
    %c0_79 = arith.constant 0 : index
    %c0_80 = arith.constant 0 : index
    %153 = vector.load %arg5[%c0_78, %c0_79, %c0_80] : memref<1x1x512xf32, #tpu.memory_space<vmem>>, vector<1x1x512xf32>
    %154 = vector.shape_cast %153 : vector<1x1x512xf32> to vector<1x512xf32>
    %155 = vector.broadcast %154 : vector<1x512xf32> to vector<8x512xf32>
    %156 = arith.addf %152, %155 : vector<8x512xf32>
    %c1_81 = arith.constant 1 : index
    %c0_82 = arith.constant 0 : index
    %c0_83 = arith.constant 0 : index
    %157 = vector.load %arg8[%c1_81, %c0_82, %c0_83] : memref<2x8x128xf32, #tpu.memory_space<vmem>>, vector<1x8x128xf32>
    %158 = vector.shape_cast %157 : vector<1x8x128xf32> to vector<8x128xf32>
    %159 = vector.extract_strided_slice %156 {offsets = [0, 0], sizes = [8, 128], strides = [1, 1]} : vector<8x512xf32> to vector<8x128xf32>
    %160 = arith.negf %159 : vector<8x128xf32>
    %161 = math.exp %160 : vector<8x128xf32>
    %cst_84 = arith.constant 1.000000e+00 : f32
    %162 = vector.broadcast %cst_84 : f32 to vector<8x128xf32>
    %163 = arith.addf %162, %161 : vector<8x128xf32>
    %164 = arith.divf %162, %163 : vector<8x128xf32>
    %165 = vector.extract_strided_slice %156 {offsets = [0, 128], sizes = [8, 128], strides = [1, 1]} : vector<8x512xf32> to vector<8x128xf32>
    %166 = arith.negf %165 : vector<8x128xf32>
    %167 = math.exp %166 : vector<8x128xf32>
    %cst_85 = arith.constant 1.000000e+00 : f32
    %168 = vector.broadcast %cst_85 : f32 to vector<8x128xf32>
    %169 = arith.addf %168, %167 : vector<8x128xf32>
    %170 = arith.divf %168, %169 : vector<8x128xf32>
    %171 = vector.extract_strided_slice %156 {offsets = [0, 256], sizes = [8, 128], strides = [1, 1]} : vector<8x512xf32> to vector<8x128xf32>
    %172 = math.tanh %171 : vector<8x128xf32>
    %173 = vector.extract_strided_slice %156 {offsets = [0, 384], sizes = [8, 128], strides = [1, 1]} : vector<8x512xf32> to vector<8x128xf32>
    %174 = arith.negf %173 : vector<8x128xf32>
    %175 = math.exp %174 : vector<8x128xf32>
    %cst_86 = arith.constant 1.000000e+00 : f32
    %176 = vector.broadcast %cst_86 : f32 to vector<8x128xf32>
    %177 = arith.addf %176, %175 : vector<8x128xf32>
    %178 = arith.divf %176, %177 : vector<8x128xf32>
    %179 = arith.mulf %170, %158 : vector<8x128xf32>
    %180 = arith.mulf %164, %172 : vector<8x128xf32>
    %181 = arith.addf %179, %180 : vector<8x128xf32>
    %182 = math.tanh %181 : vector<8x128xf32>
    %183 = arith.mulf %178, %182 : vector<8x128xf32>
    %c1_87 = arith.constant 1 : index
    %c0_88 = arith.constant 0 : index
    %c0_89 = arith.constant 0 : index
    %184 = vector.load %arg7[%c1_87, %c0_88, %c0_89] : memref<2x8x128xf32, #tpu.memory_space<vmem>>, vector<1x8x128xf32>
    %185 = vector.shape_cast %184 : vector<1x8x128xf32> to vector<8x128xf32>
    %186 = vector.shape_cast %183 : vector<8x128xf32> to vector<1x8x128xf32>
    tpu.vector_store %arg7[%c1_87, %c0_88, %c0_89], %186 {strides = array<i32>} : memref<2x8x128xf32, #tpu.memory_space<vmem>>, vector<1x8x128xf32>,
    %c1_90 = arith.constant 1 : index
    %c0_91 = arith.constant 0 : index
    %c0_92 = arith.constant 0 : index
    %187 = vector.load %arg8[%c1_90, %c0_91, %c0_92] : memref<2x8x128xf32, #tpu.memory_space<vmem>>, vector<1x8x128xf32>
    %188 = vector.shape_cast %187 : vector<1x8x128xf32> to vector<8x128xf32>
    %189 = vector.shape_cast %181 : vector<8x128xf32> to vector<1x8x128xf32>
    tpu.vector_store %arg8[%c1_90, %c0_91, %c0_92], %189 {strides = array<i32>} : memref<2x8x128xf32, #tpu.memory_space<vmem>>, vector<1x8x128xf32>,
    %190 = arith.truncf %183 : vector<8x128xf32> to vector<8x128xbf16>
    %191 = arith.index_cast %c1_i32 : i32 to index
    %c0_93 = arith.constant 0 : index
    %c0_94 = arith.constant 0 : index
    %192 = vector.load %arg6[%191, %c0_93, %c0_94] : memref<4x8x128xbf16, #tpu.memory_space<vmem>>, vector<1x8x128xbf16>
    %193 = vector.shape_cast %192 : vector<1x8x128xbf16> to vector<8x128xbf16>
    %194 = vector.shape_cast %190 : vector<8x128xbf16> to vector<1x8x128xbf16>
    tpu.vector_store %arg6[%191, %c0_93, %c0_94], %194 {strides = array<i32>} : memref<4x8x128xbf16, #tpu.memory_space<vmem>>, vector<1x8x128xbf16>,
    %c2_i32 = arith.constant 2 : i32
    %195 = arith.index_cast %c2_i32 : i32 to index
    %c0_95 = arith.constant 0 : index
    %c0_96 = arith.constant 0 : index
    %196 = vector.load %arg1[%195, %c0_95, %c0_96] : memref<4x8x512xbf16, #tpu.memory_space<vmem>>, vector<1x8x512xbf16>
    %197 = vector.shape_cast %196 : vector<1x8x512xbf16> to vector<8x512xbf16>
    %198 = arith.extf %197 : vector<8x512xbf16> to vector<8x512xf32>
    %c0_97 = arith.constant 0 : index
    %c0_98 = arith.constant 0 : index
    %c0_99 = arith.constant 0 : index
    %199 = vector.load %arg7[%c0_97, %c0_98, %c0_99] : memref<2x8x128xf32, #tpu.memory_space<vmem>>, vector<1x8x128xf32>
    %200 = vector.shape_cast %199 : vector<1x8x128xf32> to vector<8x128xf32>
    %201 = arith.truncf %200 : vector<8x128xf32> to vector<8x128xbf16>
    %c0_100 = arith.constant 0 : index
    %c0_101 = arith.constant 0 : index
    %202 = vector.load %arg2[%c0_100, %c0_101] : memref<128x512xbf16, #tpu.memory_space<vmem>>, vector<128x512xbf16>
    %cst_102 = arith.constant dense<0.000000e+00> : vector<8x512xf32>
    %203 = tpu.matmul %201, %202, %cst_102 {dimension_numbers = #tpu.dot_dimension_numbers<[1], [0], [0], [1], [0, 0, 1, 1], [], []>} : vector<8x128xbf16>, vector<128x512xbf16>, vector<8x512xf32> -> vector<8x512xf32>
    %204 = arith.addf %198, %203 : vector<8x512xf32>
    %c0_103 = arith.constant 0 : index
    %c0_104 = arith.constant 0 : index
    %c0_105 = arith.constant 0 : index
    %205 = vector.load %arg8[%c0_103, %c0_104, %c0_105] : memref<2x8x128xf32, #tpu.memory_space<vmem>>, vector<1x8x128xf32>
    %206 = vector.shape_cast %205 : vector<1x8x128xf32> to vector<8x128xf32>
    %207 = vector.extract_strided_slice %204 {offsets = [0, 0], sizes = [8, 128], strides = [1, 1]} : vector<8x512xf32> to vector<8x128xf32>
    %208 = arith.negf %207 : vector<8x128xf32>
    %209 = math.exp %208 : vector<8x128xf32>
    %cst_106 = arith.constant 1.000000e+00 : f32
    %210 = vector.broadcast %cst_106 : f32 to vector<8x128xf32>
    %211 = arith.addf %210, %209 : vector<8x128xf32>
    %212 = arith.divf %210, %211 : vector<8x128xf32>
    %213 = vector.extract_strided_slice %204 {offsets = [0, 128], sizes = [8, 128], strides = [1, 1]} : vector<8x512xf32> to vector<8x128xf32>
    %214 = arith.negf %213 : vector<8x128xf32>
    %215 = math.exp %214 : vector<8x128xf32>
    %cst_107 = arith.constant 1.000000e+00 : f32
    %216 = vector.broadcast %cst_107 : f32 to vector<8x128xf32>
    %217 = arith.addf %216, %215 : vector<8x128xf32>
    %218 = arith.divf %216, %217 : vector<8x128xf32>
    %219 = vector.extract_strided_slice %204 {offsets = [0, 256], sizes = [8, 128], strides = [1, 1]} : vector<8x512xf32> to vector<8x128xf32>
    %220 = math.tanh %219 : vector<8x128xf32>
    %221 = vector.extract_strided_slice %204 {offsets = [0, 384], sizes = [8, 128], strides = [1, 1]} : vector<8x512xf32> to vector<8x128xf32>
    %222 = arith.negf %221 : vector<8x128xf32>
    %223 = math.exp %222 : vector<8x128xf32>
    %cst_108 = arith.constant 1.000000e+00 : f32
    %224 = vector.broadcast %cst_108 : f32 to vector<8x128xf32>
    %225 = arith.addf %224, %223 : vector<8x128xf32>
    %226 = arith.divf %224, %225 : vector<8x128xf32>
    %227 = arith.mulf %218, %206 : vector<8x128xf32>
    %228 = arith.mulf %212, %220 : vector<8x128xf32>
    %229 = arith.addf %227, %228 : vector<8x128xf32>
    %230 = math.tanh %229 : vector<8x128xf32>
    %231 = arith.mulf %226, %230 : vector<8x128xf32>
    %c0_109 = arith.constant 0 : index
    %c0_110 = arith.constant 0 : index
    %c0_111 = arith.constant 0 : index
    %232 = vector.load %arg7[%c0_109, %c0_110, %c0_111] : memref<2x8x128xf32, #tpu.memory_space<vmem>>, vector<1x8x128xf32>
    %233 = vector.shape_cast %232 : vector<1x8x128xf32> to vector<8x128xf32>
    %234 = vector.shape_cast %231 : vector<8x128xf32> to vector<1x8x128xf32>
    tpu.vector_store %arg7[%c0_109, %c0_110, %c0_111], %234 {strides = array<i32>} : memref<2x8x128xf32, #tpu.memory_space<vmem>>, vector<1x8x128xf32>,
    %c0_112 = arith.constant 0 : index
    %c0_113 = arith.constant 0 : index
    %c0_114 = arith.constant 0 : index
    %235 = vector.load %arg8[%c0_112, %c0_113, %c0_114] : memref<2x8x128xf32, #tpu.memory_space<vmem>>, vector<1x8x128xf32>
    %236 = vector.shape_cast %235 : vector<1x8x128xf32> to vector<8x128xf32>
    %237 = vector.shape_cast %229 : vector<8x128xf32> to vector<1x8x128xf32>
    tpu.vector_store %arg8[%c0_112, %c0_113, %c0_114], %237 {strides = array<i32>} : memref<2x8x128xf32, #tpu.memory_space<vmem>>, vector<1x8x128xf32>,
    %238 = arith.truncf %231 : vector<8x128xf32> to vector<8x128xbf16>
    %c0_115 = arith.constant 0 : index
    %c0_116 = arith.constant 0 : index
    %c0_117 = arith.constant 0 : index
    %239 = vector.load %arg3[%c0_115, %c0_116, %c0_117] : memref<1x128x512xbf16, #tpu.memory_space<vmem>>, vector<1x128x512xbf16>
    %240 = vector.shape_cast %239 : vector<1x128x512xbf16> to vector<128x512xbf16>
    %cst_118 = arith.constant dense<0.000000e+00> : vector<8x512xf32>
    %241 = tpu.matmul %238, %240, %cst_118 {dimension_numbers = #tpu.dot_dimension_numbers<[1], [0], [0], [1], [0, 0, 1, 1], [], []>} : vector<8x128xbf16>, vector<128x512xbf16>, vector<8x512xf32> -> vector<8x512xf32>
    %c1_119 = arith.constant 1 : index
    %c0_120 = arith.constant 0 : index
    %c0_121 = arith.constant 0 : index
    %242 = vector.load %arg7[%c1_119, %c0_120, %c0_121] : memref<2x8x128xf32, #tpu.memory_space<vmem>>, vector<1x8x128xf32>
    %243 = vector.shape_cast %242 : vector<1x8x128xf32> to vector<8x128xf32>
    %244 = arith.truncf %243 : vector<8x128xf32> to vector<8x128xbf16>
    %c0_122 = arith.constant 0 : index
    %c0_123 = arith.constant 0 : index
    %c0_124 = arith.constant 0 : index
    %245 = vector.load %arg4[%c0_122, %c0_123, %c0_124] : memref<1x128x512xbf16, #tpu.memory_space<vmem>>, vector<1x128x512xbf16>
    %246 = vector.shape_cast %245 : vector<1x128x512xbf16> to vector<128x512xbf16>
    %cst_125 = arith.constant dense<0.000000e+00> : vector<8x512xf32>
    %247 = tpu.matmul %244, %246, %cst_125 {dimension_numbers = #tpu.dot_dimension_numbers<[1], [0], [0], [1], [0, 0, 1, 1], [], []>} : vector<8x128xbf16>, vector<128x512xbf16>, vector<8x512xf32> -> vector<8x512xf32>
    %248 = arith.addf %241, %247 : vector<8x512xf32>
    %c0_126 = arith.constant 0 : index
    %c0_127 = arith.constant 0 : index
    %c0_128 = arith.constant 0 : index
    %249 = vector.load %arg5[%c0_126, %c0_127, %c0_128] : memref<1x1x512xf32, #tpu.memory_space<vmem>>, vector<1x1x512xf32>
    %250 = vector.shape_cast %249 : vector<1x1x512xf32> to vector<1x512xf32>
    %251 = vector.broadcast %250 : vector<1x512xf32> to vector<8x512xf32>
    %252 = arith.addf %248, %251 : vector<8x512xf32>
    %c1_129 = arith.constant 1 : index
    %c0_130 = arith.constant 0 : index
    %c0_131 = arith.constant 0 : index
    %253 = vector.load %arg8[%c1_129, %c0_130, %c0_131] : memref<2x8x128xf32, #tpu.memory_space<vmem>>, vector<1x8x128xf32>
    %254 = vector.shape_cast %253 : vector<1x8x128xf32> to vector<8x128xf32>
    %255 = vector.extract_strided_slice %252 {offsets = [0, 0], sizes = [8, 128], strides = [1, 1]} : vector<8x512xf32> to vector<8x128xf32>
    %256 = arith.negf %255 : vector<8x128xf32>
    %257 = math.exp %256 : vector<8x128xf32>
    %cst_132 = arith.constant 1.000000e+00 : f32
    %258 = vector.broadcast %cst_132 : f32 to vector<8x128xf32>
    %259 = arith.addf %258, %257 : vector<8x128xf32>
    %260 = arith.divf %258, %259 : vector<8x128xf32>
    %261 = vector.extract_strided_slice %252 {offsets = [0, 128], sizes = [8, 128], strides = [1, 1]} : vector<8x512xf32> to vector<8x128xf32>
    %262 = arith.negf %261 : vector<8x128xf32>
    %263 = math.exp %262 : vector<8x128xf32>
    %cst_133 = arith.constant 1.000000e+00 : f32
    %264 = vector.broadcast %cst_133 : f32 to vector<8x128xf32>
    %265 = arith.addf %264, %263 : vector<8x128xf32>
    %266 = arith.divf %264, %265 : vector<8x128xf32>
    %267 = vector.extract_strided_slice %252 {offsets = [0, 256], sizes = [8, 128], strides = [1, 1]} : vector<8x512xf32> to vector<8x128xf32>
    %268 = math.tanh %267 : vector<8x128xf32>
    %269 = vector.extract_strided_slice %252 {offsets = [0, 384], sizes = [8, 128], strides = [1, 1]} : vector<8x512xf32> to vector<8x128xf32>
    %270 = arith.negf %269 : vector<8x128xf32>
    %271 = math.exp %270 : vector<8x128xf32>
    %cst_134 = arith.constant 1.000000e+00 : f32
    %272 = vector.broadcast %cst_134 : f32 to vector<8x128xf32>
    %273 = arith.addf %272, %271 : vector<8x128xf32>
    %274 = arith.divf %272, %273 : vector<8x128xf32>
    %275 = arith.mulf %266, %254 : vector<8x128xf32>
    %276 = arith.mulf %260, %268 : vector<8x128xf32>
    %277 = arith.addf %275, %276 : vector<8x128xf32>
    %278 = math.tanh %277 : vector<8x128xf32>
    %279 = arith.mulf %274, %278 : vector<8x128xf32>
    %c1_135 = arith.constant 1 : index
    %c0_136 = arith.constant 0 : index
    %c0_137 = arith.constant 0 : index
    %280 = vector.load %arg7[%c1_135, %c0_136, %c0_137] : memref<2x8x128xf32, #tpu.memory_space<vmem>>, vector<1x8x128xf32>
    %281 = vector.shape_cast %280 : vector<1x8x128xf32> to vector<8x128xf32>
    %282 = vector.shape_cast %279 : vector<8x128xf32> to vector<1x8x128xf32>
    tpu.vector_store %arg7[%c1_135, %c0_136, %c0_137], %282 {strides = array<i32>} : memref<2x8x128xf32, #tpu.memory_space<vmem>>, vector<1x8x128xf32>,
    %c1_138 = arith.constant 1 : index
    %c0_139 = arith.constant 0 : index
    %c0_140 = arith.constant 0 : index
    %283 = vector.load %arg8[%c1_138, %c0_139, %c0_140] : memref<2x8x128xf32, #tpu.memory_space<vmem>>, vector<1x8x128xf32>
    %284 = vector.shape_cast %283 : vector<1x8x128xf32> to vector<8x128xf32>
    %285 = vector.shape_cast %277 : vector<8x128xf32> to vector<1x8x128xf32>
    tpu.vector_store %arg8[%c1_138, %c0_139, %c0_140], %285 {strides = array<i32>} : memref<2x8x128xf32, #tpu.memory_space<vmem>>, vector<1x8x128xf32>,
    %286 = arith.truncf %279 : vector<8x128xf32> to vector<8x128xbf16>
    %287 = arith.index_cast %c2_i32 : i32 to index
    %c0_141 = arith.constant 0 : index
    %c0_142 = arith.constant 0 : index
    %288 = vector.load %arg6[%287, %c0_141, %c0_142] : memref<4x8x128xbf16, #tpu.memory_space<vmem>>, vector<1x8x128xbf16>
    %289 = vector.shape_cast %288 : vector<1x8x128xbf16> to vector<8x128xbf16>
    %290 = vector.shape_cast %286 : vector<8x128xbf16> to vector<1x8x128xbf16>
    tpu.vector_store %arg6[%287, %c0_141, %c0_142], %290 {strides = array<i32>} : memref<4x8x128xbf16, #tpu.memory_space<vmem>>, vector<1x8x128xbf16>,
    %c3_i32 = arith.constant 3 : i32
    %291 = arith.index_cast %c3_i32 : i32 to index
    %c0_143 = arith.constant 0 : index
    %c0_144 = arith.constant 0 : index
    %292 = vector.load %arg1[%291, %c0_143, %c0_144] : memref<4x8x512xbf16, #tpu.memory_space<vmem>>, vector<1x8x512xbf16>
    %293 = vector.shape_cast %292 : vector<1x8x512xbf16> to vector<8x512xbf16>
    %294 = arith.extf %293 : vector<8x512xbf16> to vector<8x512xf32>
    %c0_145 = arith.constant 0 : index
    %c0_146 = arith.constant 0 : index
    %c0_147 = arith.constant 0 : index
    %295 = vector.load %arg7[%c0_145, %c0_146, %c0_147] : memref<2x8x128xf32, #tpu.memory_space<vmem>>, vector<1x8x128xf32>
    %296 = vector.shape_cast %295 : vector<1x8x128xf32> to vector<8x128xf32>
    %297 = arith.truncf %296 : vector<8x128xf32> to vector<8x128xbf16>
    %c0_148 = arith.constant 0 : index
    %c0_149 = arith.constant 0 : index
    %298 = vector.load %arg2[%c0_148, %c0_149] : memref<128x512xbf16, #tpu.memory_space<vmem>>, vector<128x512xbf16>
    %cst_150 = arith.constant dense<0.000000e+00> : vector<8x512xf32>
    %299 = tpu.matmul %297, %298, %cst_150 {dimension_numbers = #tpu.dot_dimension_numbers<[1], [0], [0], [1], [0, 0, 1, 1], [], []>} : vector<8x128xbf16>, vector<128x512xbf16>, vector<8x512xf32> -> vector<8x512xf32>
    %300 = arith.addf %294, %299 : vector<8x512xf32>
    %c0_151 = arith.constant 0 : index
    %c0_152 = arith.constant 0 : index
    %c0_153 = arith.constant 0 : index
    %301 = vector.load %arg8[%c0_151, %c0_152, %c0_153] : memref<2x8x128xf32, #tpu.memory_space<vmem>>, vector<1x8x128xf32>
    %302 = vector.shape_cast %301 : vector<1x8x128xf32> to vector<8x128xf32>
    %303 = vector.extract_strided_slice %300 {offsets = [0, 0], sizes = [8, 128], strides = [1, 1]} : vector<8x512xf32> to vector<8x128xf32>
    %304 = arith.negf %303 : vector<8x128xf32>
    %305 = math.exp %304 : vector<8x128xf32>
    %cst_154 = arith.constant 1.000000e+00 : f32
    %306 = vector.broadcast %cst_154 : f32 to vector<8x128xf32>
    %307 = arith.addf %306, %305 : vector<8x128xf32>
    %308 = arith.divf %306, %307 : vector<8x128xf32>
    %309 = vector.extract_strided_slice %300 {offsets = [0, 128], sizes = [8, 128], strides = [1, 1]} : vector<8x512xf32> to vector<8x128xf32>
    %310 = arith.negf %309 : vector<8x128xf32>
    %311 = math.exp %310 : vector<8x128xf32>
    %cst_155 = arith.constant 1.000000e+00 : f32
    %312 = vector.broadcast %cst_155 : f32 to vector<8x128xf32>
    %313 = arith.addf %312, %311 : vector<8x128xf32>
    %314 = arith.divf %312, %313 : vector<8x128xf32>
    %315 = vector.extract_strided_slice %300 {offsets = [0, 256], sizes = [8, 128], strides = [1, 1]} : vector<8x512xf32> to vector<8x128xf32>
    %316 = math.tanh %315 : vector<8x128xf32>
    %317 = vector.extract_strided_slice %300 {offsets = [0, 384], sizes = [8, 128], strides = [1, 1]} : vector<8x512xf32> to vector<8x128xf32>
    %318 = arith.negf %317 : vector<8x128xf32>
    %319 = math.exp %318 : vector<8x128xf32>
    %cst_156 = arith.constant 1.000000e+00 : f32
    %320 = vector.broadcast %cst_156 : f32 to vector<8x128xf32>
    %321 = arith.addf %320, %319 : vector<8x128xf32>
    %322 = arith.divf %320, %321 : vector<8x128xf32>
    %323 = arith.mulf %314, %302 : vector<8x128xf32>
    %324 = arith.mulf %308, %316 : vector<8x128xf32>
    %325 = arith.addf %323, %324 : vector<8x128xf32>
    %326 = math.tanh %325 : vector<8x128xf32>
    %327 = arith.mulf %322, %326 : vector<8x128xf32>
    %c0_157 = arith.constant 0 : index
    %c0_158 = arith.constant 0 : index
    %c0_159 = arith.constant 0 : index
    %328 = vector.load %arg7[%c0_157, %c0_158, %c0_159] : memref<2x8x128xf32, #tpu.memory_space<vmem>>, vector<1x8x128xf32>
    %329 = vector.shape_cast %328 : vector<1x8x128xf32> to vector<8x128xf32>
    %330 = vector.shape_cast %327 : vector<8x128xf32> to vector<1x8x128xf32>
    tpu.vector_store %arg7[%c0_157, %c0_158, %c0_159], %330 {strides = array<i32>} : memref<2x8x128xf32, #tpu.memory_space<vmem>>, vector<1x8x128xf32>,
    %c0_160 = arith.constant 0 : index
    %c0_161 = arith.constant 0 : index
    %c0_162 = arith.constant 0 : index
    %331 = vector.load %arg8[%c0_160, %c0_161, %c0_162] : memref<2x8x128xf32, #tpu.memory_space<vmem>>, vector<1x8x128xf32>
    %332 = vector.shape_cast %331 : vector<1x8x128xf32> to vector<8x128xf32>
    %333 = vector.shape_cast %325 : vector<8x128xf32> to vector<1x8x128xf32>
    tpu.vector_store %arg8[%c0_160, %c0_161, %c0_162], %333 {strides = array<i32>} : memref<2x8x128xf32, #tpu.memory_space<vmem>>, vector<1x8x128xf32>,
    %334 = arith.truncf %327 : vector<8x128xf32> to vector<8x128xbf16>
    %c0_163 = arith.constant 0 : index
    %c0_164 = arith.constant 0 : index
    %c0_165 = arith.constant 0 : index
    %335 = vector.load %arg3[%c0_163, %c0_164, %c0_165] : memref<1x128x512xbf16, #tpu.memory_space<vmem>>, vector<1x128x512xbf16>
    %336 = vector.shape_cast %335 : vector<1x128x512xbf16> to vector<128x512xbf16>
    %cst_166 = arith.constant dense<0.000000e+00> : vector<8x512xf32>
    %337 = tpu.matmul %334, %336, %cst_166 {dimension_numbers = #tpu.dot_dimension_numbers<[1], [0], [0], [1], [0, 0, 1, 1], [], []>} : vector<8x128xbf16>, vector<128x512xbf16>, vector<8x512xf32> -> vector<8x512xf32>
    %c1_167 = arith.constant 1 : index
    %c0_168 = arith.constant 0 : index
    %c0_169 = arith.constant 0 : index
    %338 = vector.load %arg7[%c1_167, %c0_168, %c0_169] : memref<2x8x128xf32, #tpu.memory_space<vmem>>, vector<1x8x128xf32>
    %339 = vector.shape_cast %338 : vector<1x8x128xf32> to vector<8x128xf32>
    %340 = arith.truncf %339 : vector<8x128xf32> to vector<8x128xbf16>
    %c0_170 = arith.constant 0 : index
    %c0_171 = arith.constant 0 : index
    %c0_172 = arith.constant 0 : index
    %341 = vector.load %arg4[%c0_170, %c0_171, %c0_172] : memref<1x128x512xbf16, #tpu.memory_space<vmem>>, vector<1x128x512xbf16>
    %342 = vector.shape_cast %341 : vector<1x128x512xbf16> to vector<128x512xbf16>
    %cst_173 = arith.constant dense<0.000000e+00> : vector<8x512xf32>
    %343 = tpu.matmul %340, %342, %cst_173 {dimension_numbers = #tpu.dot_dimension_numbers<[1], [0], [0], [1], [0, 0, 1, 1], [], []>} : vector<8x128xbf16>, vector<128x512xbf16>, vector<8x512xf32> -> vector<8x512xf32>
    %344 = arith.addf %337, %343 : vector<8x512xf32>
    %c0_174 = arith.constant 0 : index
    %c0_175 = arith.constant 0 : index
    %c0_176 = arith.constant 0 : index
    %345 = vector.load %arg5[%c0_174, %c0_175, %c0_176] : memref<1x1x512xf32, #tpu.memory_space<vmem>>, vector<1x1x512xf32>
    %346 = vector.shape_cast %345 : vector<1x1x512xf32> to vector<1x512xf32>
    %347 = vector.broadcast %346 : vector<1x512xf32> to vector<8x512xf32>
    %348 = arith.addf %344, %347 : vector<8x512xf32>
    %c1_177 = arith.constant 1 : index
    %c0_178 = arith.constant 0 : index
    %c0_179 = arith.constant 0 : index
    %349 = vector.load %arg8[%c1_177, %c0_178, %c0_179] : memref<2x8x128xf32, #tpu.memory_space<vmem>>, vector<1x8x128xf32>
    %350 = vector.shape_cast %349 : vector<1x8x128xf32> to vector<8x128xf32>
    %351 = vector.extract_strided_slice %348 {offsets = [0, 0], sizes = [8, 128], strides = [1, 1]} : vector<8x512xf32> to vector<8x128xf32>
    %352 = arith.negf %351 : vector<8x128xf32>
    %353 = math.exp %352 : vector<8x128xf32>
    %cst_180 = arith.constant 1.000000e+00 : f32
    %354 = vector.broadcast %cst_180 : f32 to vector<8x128xf32>
    %355 = arith.addf %354, %353 : vector<8x128xf32>
    %356 = arith.divf %354, %355 : vector<8x128xf32>
    %357 = vector.extract_strided_slice %348 {offsets = [0, 128], sizes = [8, 128], strides = [1, 1]} : vector<8x512xf32> to vector<8x128xf32>
    %358 = arith.negf %357 : vector<8x128xf32>
    %359 = math.exp %358 : vector<8x128xf32>
    %cst_181 = arith.constant 1.000000e+00 : f32
    %360 = vector.broadcast %cst_181 : f32 to vector<8x128xf32>
    %361 = arith.addf %360, %359 : vector<8x128xf32>
    %362 = arith.divf %360, %361 : vector<8x128xf32>
    %363 = vector.extract_strided_slice %348 {offsets = [0, 256], sizes = [8, 128], strides = [1, 1]} : vector<8x512xf32> to vector<8x128xf32>
    %364 = math.tanh %363 : vector<8x128xf32>
    %365 = vector.extract_strided_slice %348 {offsets = [0, 384], sizes = [8, 128], strides = [1, 1]} : vector<8x512xf32> to vector<8x128xf32>
    %366 = arith.negf %365 : vector<8x128xf32>
    %367 = math.exp %366 : vector<8x128xf32>
    %cst_182 = arith.constant 1.000000e+00 : f32
    %368 = vector.broadcast %cst_182 : f32 to vector<8x128xf32>
    %369 = arith.addf %368, %367 : vector<8x128xf32>
    %370 = arith.divf %368, %369 : vector<8x128xf32>
    %371 = arith.mulf %362, %350 : vector<8x128xf32>
    %372 = arith.mulf %356, %364 : vector<8x128xf32>
    %373 = arith.addf %371, %372 : vector<8x128xf32>
    %374 = math.tanh %373 : vector<8x128xf32>
    %375 = arith.mulf %370, %374 : vector<8x128xf32>
    %c1_183 = arith.constant 1 : index
    %c0_184 = arith.constant 0 : index
    %c0_185 = arith.constant 0 : index
    %376 = vector.load %arg7[%c1_183, %c0_184, %c0_185] : memref<2x8x128xf32, #tpu.memory_space<vmem>>, vector<1x8x128xf32>
    %377 = vector.shape_cast %376 : vector<1x8x128xf32> to vector<8x128xf32>
    %378 = vector.shape_cast %375 : vector<8x128xf32> to vector<1x8x128xf32>
    tpu.vector_store %arg7[%c1_183, %c0_184, %c0_185], %378 {strides = array<i32>} : memref<2x8x128xf32, #tpu.memory_space<vmem>>, vector<1x8x128xf32>,
    %c1_186 = arith.constant 1 : index
    %c0_187 = arith.constant 0 : index
    %c0_188 = arith.constant 0 : index
    %379 = vector.load %arg8[%c1_186, %c0_187, %c0_188] : memref<2x8x128xf32, #tpu.memory_space<vmem>>, vector<1x8x128xf32>
    %380 = vector.shape_cast %379 : vector<1x8x128xf32> to vector<8x128xf32>
    %381 = vector.shape_cast %373 : vector<8x128xf32> to vector<1x8x128xf32>
    tpu.vector_store %arg8[%c1_186, %c0_187, %c0_188], %381 {strides = array<i32>} : memref<2x8x128xf32, #tpu.memory_space<vmem>>, vector<1x8x128xf32>,
    %382 = arith.truncf %375 : vector<8x128xf32> to vector<8x128xbf16>
    %383 = arith.index_cast %c3_i32 : i32 to index
    %c0_189 = arith.constant 0 : index
    %c0_190 = arith.constant 0 : index
    %384 = vector.load %arg6[%383, %c0_189, %c0_190] : memref<4x8x128xbf16, #tpu.memory_space<vmem>>, vector<1x8x128xbf16>
    %385 = vector.shape_cast %384 : vector<1x8x128xbf16> to vector<8x128xbf16>
    %386 = vector.shape_cast %382 : vector<8x128xbf16> to vector<1x8x128xbf16>
    tpu.vector_store %arg6[%383, %c0_189, %c0_190], %386 {strides = array<i32>} : memref<4x8x128xbf16, #tpu.memory_space<vmem>>, vector<1x8x128xbf16>,
    %c4_i32 = arith.constant 4 : i32
    return
  }
  func.func @transform_0(%arg0: i32) -> (i32, i32, i32) {
    %c0_i32 = arith.constant 0 : i32
    %c0_i32_0 = arith.constant 0 : i32
    %c0_i32_1 = arith.constant 0 : i32
    return %arg0, %c0_i32, %c0_i32_0 : i32, i32, i32
  }
  func.func @transform_1(%arg0: i32) -> (i32, i32) {
    %c0_i32 = arith.constant 0 : i32
    %c0_i32_0 = arith.constant 0 : i32
    %c0_i32_1 = arith.constant 0 : i32
    return %c0_i32, %c0_i32_0 : i32, i32
  }
  func.func @transform_2(%arg0: i32) -> (i32, i32, i32) {
    %c0_i32 = arith.constant 0 : i32
    %c0_i32_0 = arith.constant 0 : i32
    %c0_i32_1 = arith.constant 0 : i32
    %c0_i32_2 = arith.constant 0 : i32
    return %c0_i32, %c0_i32_0, %c0_i32_1 : i32, i32, i32
  }
  func.func @transform_3(%arg0: i32) -> (i32, i32, i32) {
    %c0_i32 = arith.constant 0 : i32
    %c0_i32_0 = arith.constant 0 : i32
    %c0_i32_1 = arith.constant 0 : i32
    %c0_i32_2 = arith.constant 0 : i32
    return %c0_i32, %c0_i32_0, %c0_i32_1 : i32, i32, i32
  }
  func.func @transform_4(%arg0: i32) -> (i32, i32, i32) {
    %c0_i32 = arith.constant 0 : i32
    %c0_i32_0 = arith.constant 0 : i32
    %c0_i32_1 = arith.constant 0 : i32
    %c0_i32_2 = arith.constant 0 : i32
    return %c0_i32, %c0_i32_0, %c0_i32_1 : i32, i32, i32
  }
  func.func @transform_5(%arg0: i32) -> (i32, i32, i32) {
    %c0_i32 = arith.constant 0 : i32
    %c0_i32_0 = arith.constant 0 : i32
    %c0_i32_1 = arith.constant 0 : i32
    return %arg0, %c0_i32, %c0_i32_0 : i32, i32, i32
  }
}

</mosaic_0001>

<bundles_post_ra>
// kernel: decoder_forward.5
= control target key start
LH: loop header
LB: loop body
LE: loop exit
PB: predicated region body
PF: predicated region fallthrough
CT: control target
= control target key end

     0   :  { %v302_v0 = vmov 0.0   ;;  %vm303_vm0 = vmmov 0   ;;  %s398_s1 = inlined_call_operand.vmem [shape: bf16[128,128], index: 1, kind: input, shape index: {}]   ;;  %s399_s0 = inlined_call_operand.vmem [shape: bf16[72,128], index: 0, kind: input, shape index: {}]   ;;  %s400_s2 = inlined_call_operand.vmem [shape: f32[1,128], index: 2, kind: input, shape index: {}]   ;;  %s401_s3 = inlined_call_operand.vmem [shape: f32[72,128], index: 3, kind: output, shape index: {}]  }
   0x1   :  { %235 = vmatprep.subr.bf16.mxu0 %v302_v0  ;;  %v289_v1 = vld [vmem:[%s398_s1] sm:$0xff]   ;;  %271 = vmatprep.subr.bf16.mxu1 %v302_v0  ;;  %v290_v2 = vld [vmem:[%s398_s1 + $0x8] sm:$0xff]   ;;  %v291_v3 = vld [vmem:[%s398_s1 + $0x10] sm:$0xff]  }
   0x2   :  { %251 = vmatprep.mubr.msk.bf16.mxu0 %vm303_vm0, %v302_v0  ;;  %263 = vmatprep.mubr.msk.bf16.mxu1 %vm303_vm0, %v302_v0  ;;  %v292_v4 = vld [vmem:[%s398_s1 + $0x18] sm:$0xff]   ;;  %v293_v5 = vld [vmem:[%s398_s1 + $0x20] sm:$0xff]   ;;  %v294_v6 = vld [vmem:[%s398_s1 + $0x28] sm:$0xff]  }
   0x3   :  { %236 = vmatpush3.bf16.msra.mxu0 %v289_v1  ;;  %279 = vmatpush3.bf16.msra.mxu1 %v289_v1  ;;  %v295_v7 = vld [vmem:[%s398_s1 + $0x30] sm:$0xff]   ;;  %v296_v8 = vld [vmem:[%s398_s1 + $0x38] sm:$0xff]   ;;  %v297_v9 = vld [vmem:[%s399_s0] sm:$0xff]  }
   0x4   :  { %237 = vmatprep.subr.bf16.mxu0 %v302_v0  ;;  %272 = vmatprep.subr.bf16.mxu1 %v302_v0  ;;  %v298_v10 = vld [vmem:[%s399_s0 + $0x18] sm:$0xff]   ;;  %v299_v11 = vld [vmem:[%s399_s0 + $0x8] sm:$0xff]   ;;  %v300_v12 = vld [vmem:[%s399_s0 + $0x20] ss:$0 sps:$4 sm:$0xff]  }
   0x5   :  { %v301_v13 = vld [vmem:[%s399_s0 + $0x10] sm:$0xff]   ;;  %v208_v14 = vld [vmem:[%s400_s2] ss:$0 sm:$0xff] }
   0x7   :  { %238 = vmatpush3.bf16.msra.mxu0 %v290_v2  ;;  %280 = vmatpush3.bf16.msra.mxu1 %v290_v2 }
   0x8   :  { %239 = vmatprep.subr.bf16.mxu0 %v302_v0  ;;  %273 = vmatprep.subr.bf16.mxu1 %v302_v0 }
   0xb   :  { %240 = vmatpush3.bf16.msra.mxu0 %v291_v3  ;;  %281 = vmatpush3.bf16.msra.mxu1 %v291_v3 }
   0xc   :  { %241 = vmatprep.subr.bf16.mxu0 %v302_v0  ;;  %274 = vmatprep.subr.bf16.mxu1 %v302_v0 }
   0xf   :  { %242 = vmatpush3.bf16.msra.mxu0 %v292_v4  ;;  %282 = vmatpush3.bf16.msra.mxu1 %v292_v4 }
  0x10   :  { %243 = vmatprep.subr.bf16.mxu0 %v302_v0  ;;  %275 = vmatprep.subr.bf16.mxu1 %v302_v0 }
  0x13   :  { %244 = vmatpush3.bf16.msra.mxu0 %v293_v5  ;;  %283 = vmatpush3.bf16.msra.mxu1 %v293_v5 }
  0x14   :  { %245 = vmatprep.subr.bf16.mxu0 %v302_v0  ;;  %276 = vmatprep.subr.bf16.mxu1 %v302_v0 }
  0x17   :  { %246 = vmatpush3.bf16.msra.mxu0 %v294_v6  ;;  %284 = vmatpush3.bf16.msra.mxu1 %v294_v6 }
  0x18   :  { %247 = vmatprep.subr.bf16.mxu0 %v302_v0  ;;  %277 = vmatprep.subr.bf16.mxu1 %v302_v0 }
  0x1b   :  { %248 = vmatpush3.bf16.msra.mxu0 %v295_v7  ;;  %285 = vmatpush3.bf16.msra.mxu1 %v295_v7 }
  0x1c   :  { %249 = vmatprep.subr.bf16.mxu0 %v302_v0  ;;  %278 = vmatprep.subr.bf16.mxu1 %v302_v0 }
  0x1f   :  { %250 = vmatpush3.bf16.msra.mxu0 %v296_v8  ;;  %286 = vmatpush3.bf16.msra.mxu1 %v296_v8 }
  0x22   :  { %252 = vmatmul.mubr.bf16.vlgmr.msra.gmra.mrb[0].mxu0 %v297_v9  ;;  %264 = vmatmul.mubr.bf16.vlgmr.msra.gmra.mrb[0].mxu1 %v298_v10 }
  0x23   :  { %255 = vmatprep.mubr.msk.bf16.mxu0 %vm303_vm0, %v302_v0  ;;  %267 = vmatprep.mubr.msk.bf16.mxu1 %vm303_vm0, %v302_v0 }
  0x2a   :  { %256 = vmatmul.mubr.bf16.gmra.mrb[4].mxu0 %v299_v11  ;;  %268 = vmatmul.mubr.bf16.gmra.mrb[4].mxu1 %v300_v12 }
  0x2b   :  { %259 = vmatprep.mubr.msk.bf16.mxu0 %vm303_vm0, %v302_v0 }
  0x32   :  { %260 = vmatmul.mubr.bf16.gmra.mrb[8].mxu0 %v301_v13 }
  0xf5   :  { %v157_v15 = vpop.f32.mrb[0].mxu0  ;;  %v181_v16 = vpop.f32.mrb[0].mxu1 }
  0xf6   :  { %v158_v17 = vadd.f32 %v208_v14, %v157_v15  ;;  %v253_v18 = vpop.f32.mrb[1].mxu0  ;;  %v182_v19 = vadd.f32 %v208_v14, %v181_v16  ;;  %v265_v20 = vpop.f32.mrb[1].mxu1 }
  0xf7   :  { %v160_v21 = vpop.f32.mrb[2].mxu0  ;;  %v184_v22 = vpop.f32.mrb[2].mxu1 }
  0xf8   :  { %195 = vst [vmem:[%s401_s3] sm:$0xff] %v158_v17  ;;  %v161_v23 = vadd.f32 %v208_v14, %v160_v21  ;;  %v254_v24 = vpop.f32.mrb[3].mxu0  ;;  %201 = vst [vmem:[%s401_s3 + $0x30] sm:$0xff] %v182_v19  ;;  %v185_v25 = vadd.f32 %v208_v14, %v184_v22  ;;  %v266_v26 = vpop.f32.mrb[3].mxu1 }
  0xfa   :  { %196 = vst [vmem:[%s401_s3 + $0x8] sm:$0xff] %v161_v23  ;;  %202 = vst [vmem:[%s401_s3 + $0x38] sm:$0xff] %v185_v25 }
  0xfd   :  { %v165_v27 = vpop.f32.mrb[4].mxu0  ;;  %v189_v28 = vpop.f32.mrb[4].mxu1 }
  0xfe   :  { %v166_v29 = vadd.f32 %v208_v14, %v165_v27  ;;  %v257_v30 = vpop.f32.mrb[5].mxu0  ;;  %v190_v31 = vadd.f32 %v208_v14, %v189_v28  ;;  %v269_v32 = vpop.f32.mrb[5].mxu1 }
  0xff   :  { %v168_v33 = vpop.f32.mrb[6].mxu0  ;;  %v192_v34 = vpop.f32.mrb[6].mxu1 }
 0x100   :  { %197 = vst [vmem:[%s401_s3 + $0x10] sm:$0xff] %v166_v29  ;;  %v169_v35 = vadd.f32 %v208_v14, %v168_v33  ;;  %v258_v36 = vpop.f32.mrb[7].mxu0  ;;  %203 = vst [vmem:[%s401_s3 + $0x40] sm:$0xff] %v190_v31  ;;  %v270_v37 = vpop.f32.mrb[7].mxu1 }
 0x102   :  { %198 = vst [vmem:[%s401_s3 + $0x18] sm:$0xff] %v169_v35 }
 0x105   :  { %v173_v38 = vpop.f32.mrb[8].mxu0 }
 0x106   :  { %v174_v39 = vadd.f32 %v208_v14, %v173_v38  ;;  %v261_v40 = vpop.f32.mrb[9].mxu0 }
 0x107   :  { %v176_v41 = vpop.f32.mrb[10].mxu0 }
 0x108   :  { %199 = vst [vmem:[%s401_s3 + $0x20] sm:$0xff] %v174_v39  ;;  %v177_v42 = vadd.f32 %v208_v14, %v176_v41  ;;  %v262_v43 = vpop.f32.mrb[11].mxu0 }
 0x10a   :  { %200 = vst [vmem:[%s401_s3 + $0x28] sm:$0xff] %v177_v42 }

// kernel: decoder_forward.3
= control target key start
LH: loop header
LB: loop body
LE: loop exit
PB: predicated region body
PF: predicated region fallthrough
CT: control target
= control target key end

     0   :  { %v506_v1 = vmov 0   ;;  %vm117_vm0 = vcmask 261120   ;;  %v34_v14 = vlaneseq  ;;  %s677_s1 = inlined_call_operand.vmem [shape: bf16[32,512], index: 1, kind: input, shape index: {}]   ;;  %s678_s0 = inlined_call_operand.vmem [shape: bf16[72,32], index: 0, kind: input, shape index: {}]   ;;  %s679_s2 = inlined_call_operand.vmem [shape: f32[1,512], index: 2, kind: input, shape index: {}]   ;;  %s680_s3 = inlined_call_operand.vmem [shape: bf16[72,512], index: 3, kind: output, shape index: {}]  }
   0x1   :  { %v489_v0 = vld [vmem:[%s677_s1 + $0x4] ss:$16 sps:$4 sm:$0xff]   ;;  %165 = vmatprep.mubr.bf16.mxu0 %v506_v1  ;;  %246 = vmatprep.mubr.bf16.mxu1 %v506_v1  ;;  %v491_v2 = vld [vmem:[%s677_s1 + $0xc] ss:$16 sps:$4 sm:$0xff]   ;;  %v493_v3 = vld [vmem:[%s677_s1] ss:$16 sps:$4 sm:$0xff]  }
   0x2   :  { %133 = vmatprep.subr.bf16.mxu0 %v489_v0  ;;  %v494_v4 = vld [vmem:[%s677_s1 + $0x8] ss:$16 sps:$4 sm:$0xff]   ;;  %214 = vmatprep.subr.bf16.mxu1 %v491_v2  ;;  %v495_v5 = vld [vmem:[%s677_s1 + $0x24] ss:$16 sps:$4 sm:$0xff]   ;;  %v497_v6 = vld [vmem:[%s677_s1 + $0x2c] ss:$16 sps:$4 sm:$0xff]  }
   0x3   :  { %134 = vmatpush1.bf16.msra.mxu0 %v493_v3  ;;  %215 = vmatpush1.bf16.msra.mxu1 %v494_v4  ;;  %v499_v7 = vld [vmem:[%s677_s1 + $0x20] ss:$16 sps:$4 sm:$0xff]   ;;  %v500_v8 = vld [vmem:[%s677_s1 + $0x28] ss:$16 sps:$4 sm:$0xff]   ;;  %v35_v15 = vshrl.u32 %v34_v14, 7 }
   0x4   :  { %135 = vmatprep.subr.bf16.mxu0 %v495_v5  ;;  %216 = vmatprep.subr.bf16.mxu1 %v497_v6  ;;  %v501_v9 = vld [vmem:[%s678_s0] sm:$0xff]   ;;  %v502_v10 = vld [vmem:[%s678_s0 + $0x8] sm:$0xff]   ;;  %v503_v11 = vld [vmem:[%s678_s0 + $0x10] sm:$0xff]  }
   0x5   :  { %v504_v12 = vld [vmem:[%s678_s0 + $0x18] sm:$0xff]   ;;  %v505_v13 = vld [vmem:[%s678_s0 + $0x20] ss:$0 sps:$4 sm:$0xff]   ;;  %v36_v16 = vsub.s32 0, %v35_v15  ;;  %v44_v17 = vsub.s32 2, %v35_v15  ;;  %v40_v19 = vsub.s32 1, %v35_v15 }
   0x6   :  { %v32_v18 = vld [vmem:[%s679_s2] sm:$0xf]  ;;  %v48_v20 = vsub.s32 3, %v35_v15 }
   0x7   :  { %136 = vmatpush1.bf16.msra.mxu0 %v499_v7  ;;  %217 = vmatpush1.bf16.msra.mxu1 %v500_v8  ;;  %v579_v21 = vrot.slane %v32_v18, %v36_v16  ;;  %v581_v22 = vrot.slane %v32_v18, %v44_v17  ;;  %v583_v23 = vrot.slane %v32_v18, %v40_v19 }
   0x8   :  { %v585_v24 = vrot.slane %v32_v18, %v48_v20 }
   0xa   :  { %442 = vmatmul.mubr.msk.bf16.vlgmr.msra.gmra.mrb[0].mxu0 %vm117_vm0, %v501_v9  ;;  %447 = vmatmul.mubr.msk.bf16.vlgmr.msra.gmra.mrb[0].mxu1 %vm117_vm0, %v501_v9 }
   0xb   :  { %175 = vmatprep.mubr.bf16.mxu0 %v506_v1  ;;  %256 = vmatprep.mubr.bf16.mxu1 %v506_v1 }
  0x12   :  { %443 = vmatmul.mubr.msk.bf16.gmra.mrb[4].mxu0 %vm117_vm0, %v502_v10  ;;  %448 = vmatmul.mubr.msk.bf16.gmra.mrb[4].mxu1 %vm117_vm0, %v502_v10 }
  0x13   :  { %185 = vmatprep.mubr.bf16.mxu0 %v506_v1  ;;  %266 = vmatprep.mubr.bf16.mxu1 %v506_v1 }
  0x1a   :  { %444 = vmatmul.mubr.msk.bf16.gmra.mrb[8].mxu0 %vm117_vm0, %v503_v11  ;;  %449 = vmatmul.mubr.msk.bf16.gmra.mrb[8].mxu1 %vm117_vm0, %v503_v11 }
  0x1b   :  { %195 = vmatprep.mubr.bf16.mxu0 %v506_v1  ;;  %276 = vmatprep.mubr.bf16.mxu1 %v506_v1 }
  0x22   :  { %445 = vmatmul.mubr.msk.bf16.gmra.mrb[12].mxu0 %vm117_vm0, %v504_v12  ;;  %450 = vmatmul.mubr.msk.bf16.gmra.mrb[12].mxu1 %vm117_vm0, %v504_v12 }
  0x23   :  { %205 = vmatprep.mubr.bf16.mxu0 %v506_v1  ;;  %286 = vmatprep.mubr.bf16.mxu1 %v506_v1 }
  0x2a   :  { %446 = vmatmul.mubr.msk.bf16.gmra.mrb[16].mxu0 %vm117_vm0, %v505_v13  ;;  %451 = vmatmul.mubr.msk.bf16.gmra.mrb[16].mxu1 %vm117_vm0, %v505_v13 }
  0xdd   :  { %v167_v25 = vpop.f32.mrb[0].mxu0  ;;  %v248_v26 = vpop.f32.mrb[0].mxu1 }
  0xde   :  { %v168_v27 = vadd.f32 %v167_v25, %v579_v21  ;;  %v249_v28 = vadd.f32 %v248_v26, %v581_v22  ;;  %v169_v29 = vpop.f32.mrb[1].mxu0  ;;  %v250_v30 = vpop.f32.mrb[1].mxu1 }
  0xdf   :  { %v170_v31 = vadd.f32 %v169_v29, %v583_v23  ;;  %v251_v32 = vadd.f32 %v250_v30, %v585_v24  ;;  %v171_v33 = vpop.f32.mrb[2].mxu0  ;;  %v252_v34 = vpop.f32.mrb[2].mxu1 }
  0xe0   :  { %v172_v35 = vadd.f32 %v171_v33, %v579_v21  ;;  %v253_v36 = vadd.f32 %v252_v34, %v581_v22  ;;  %v173_v37 = vpop.f32.mrb[3].mxu0  ;;  %v254_v38 = vpop.f32.mrb[3].mxu1 }
  0xe1   :  { %v470_v39 = vpack.c.bf16 %v170_v31, %v168_v27  ;;  %v471_v40 = vpack.c.bf16 %v251_v32, %v249_v28  ;;  %v174_v41 = vadd.f32 %v173_v37, %v583_v23  ;;  %v255_v42 = vadd.f32 %v254_v38, %v585_v24 }
  0xe3   :  { %407 = vst [vmem:[%s680_s3] sm:$0xff] %v470_v39  ;;  %408 = vst [vmem:[%s680_s3 + $0x8] sm:$0xff] %v471_v40  ;;  %v472_v43 = vpack.c.bf16 %v174_v41, %v172_v35  ;;  %v473_v44 = vpack.c.bf16 %v255_v42, %v253_v36 }
  0xe5   :  { %409 = vst [vmem:[%s680_s3 + $0x10] sm:$0xff] %v472_v43  ;;  %410 = vst [vmem:[%s680_s3 + $0x18] sm:$0xff] %v473_v44  ;;  %v177_v45 = vpop.f32.mrb[4].mxu0  ;;  %v258_v46 = vpop.f32.mrb[4].mxu1 }
  0xe6   :  { %v178_v47 = vadd.f32 %v177_v45, %v579_v21  ;;  %v259_v48 = vadd.f32 %v258_v46, %v581_v22  ;;  %v179_v49 = vpop.f32.mrb[5].mxu0  ;;  %v260_v50 = vpop.f32.mrb[5].mxu1 }
  0xe7   :  { %v180_v51 = vadd.f32 %v179_v49, %v583_v23  ;;  %v261_v52 = vadd.f32 %v260_v50, %v585_v24  ;;  %v181_v53 = vpop.f32.mrb[6].mxu0  ;;  %v262_v54 = vpop.f32.mrb[6].mxu1 }
  0xe8   :  { %v182_v55 = vadd.f32 %v181_v53, %v579_v21  ;;  %v263_v56 = vadd.f32 %v262_v54, %v581_v22  ;;  %v183_v57 = vpop.f32.mrb[7].mxu0  ;;  %v264_v58 = vpop.f32.mrb[7].mxu1 }
  0xe9   :  { %v474_v59 = vpack.c.bf16 %v180_v51, %v178_v47  ;;  %v475_v60 = vpack.c.bf16 %v261_v52, %v259_v48  ;;  %v184_v61 = vadd.f32 %v183_v57, %v583_v23  ;;  %v265_v62 = vadd.f32 %v264_v58, %v585_v24 }
  0xeb   :  { %411 = vst [vmem:[%s680_s3 + $0x20] sm:$0xff] %v474_v59  ;;  %412 = vst [vmem:[%s680_s3 + $0x28] sm:$0xff] %v475_v60  ;;  %v476_v63 = vpack.c.bf16 %v184_v61, %v182_v55  ;;  %v477_v0 = vpack.c.bf16 %v265_v62, %v263_v56 }
  0xed   :  { %413 = vst [vmem:[%s680_s3 + $0x30] sm:$0xff] %v476_v63  ;;  %414 = vst [vmem:[%s680_s3 + $0x38] sm:$0xff] %v477_v0  ;;  %v187_v1 = vpop.f32.mrb[8].mxu0  ;;  %v268_v2 = vpop.f32.mrb[8].mxu1 }
  0xee   :  { %v188_v3 = vadd.f32 %v187_v1, %v579_v21  ;;  %v269_v4 = vadd.f32 %v268_v2, %v581_v22  ;;  %v189_v5 = vpop.f32.mrb[9].mxu0  ;;  %v270_v6 = vpop.f32.mrb[9].mxu1 }
  0xef   :  { %v190_v7 = vadd.f32 %v189_v5, %v583_v23  ;;  %v271_v8 = vadd.f32 %v270_v6, %v585_v24  ;;  %v191_v9 = vpop.f32.mrb[10].mxu0  ;;  %v272_v10 = vpop.f32.mrb[10].mxu1 }
  0xf0   :  { %v192_v11 = vadd.f32 %v191_v9, %v579_v21  ;;  %v273_v12 = vadd.f32 %v272_v10, %v581_v22  ;;  %v193_v13 = vpop.f32.mrb[11].mxu0  ;;  %v274_v14 = vpop.f32.mrb[11].mxu1 }
  0xf1   :  { %v478_v15 = vpack.c.bf16 %v190_v7, %v188_v3  ;;  %v479_v16 = vpack.c.bf16 %v271_v8, %v269_v4  ;;  %v194_v17 = vadd.f32 %v193_v13, %v583_v23  ;;  %v275_v18 = vadd.f32 %v274_v14, %v585_v24 }
  0xf3   :  { %415 = vst [vmem:[%s680_s3 + $0x40] sm:$0xff] %v478_v15  ;;  %416 = vst [vmem:[%s680_s3 + $0x48] sm:$0xff] %v479_v16  ;;  %v480_v19 = vpack.c.bf16 %v194_v17, %v192_v11  ;;  %v481_v20 = vpack.c.bf16 %v275_v18, %v273_v12 }
  0xf5   :  { %417 = vst [vmem:[%s680_s3 + $0x50] sm:$0xff] %v480_v19  ;;  %418 = vst [vmem:[%s680_s3 + $0x58] sm:$0xff] %v481_v20  ;;  %v197_v25 = vpop.f32.mrb[12].mxu0  ;;  %v278_v26 = vpop.f32.mrb[12].mxu1 }
  0xf6   :  { %v198_v27 = vadd.f32 %v197_v25, %v579_v21  ;;  %v279_v28 = vadd.f32 %v278_v26, %v581_v22  ;;  %v199_v29 = vpop.f32.mrb[13].mxu0  ;;  %v280_v30 = vpop.f32.mrb[13].mxu1 }
  0xf7   :  { %v200_v31 = vadd.f32 %v199_v29, %v583_v23  ;;  %v281_v32 = vadd.f32 %v280_v30, %v585_v24  ;;  %v201_v33 = vpop.f32.mrb[14].mxu0  ;;  %v282_v34 = vpop.f32.mrb[14].mxu1 }
  0xf8   :  { %v202_v35 = vadd.f32 %v201_v33, %v579_v21  ;;  %v283_v36 = vadd.f32 %v282_v34, %v581_v22  ;;  %v203_v37 = vpop.f32.mrb[15].mxu0  ;;  %v284_v38 = vpop.f32.mrb[15].mxu1 }
  0xf9   :  { %v482_v39 = vpack.c.bf16 %v200_v31, %v198_v27  ;;  %v483_v40 = vpack.c.bf16 %v281_v32, %v279_v28  ;;  %v204_v41 = vadd.f32 %v203_v37, %v583_v23  ;;  %v285_v42 = vadd.f32 %v284_v38, %v585_v24 }
  0xfb   :  { %419 = vst [vmem:[%s680_s3 + $0x60] sm:$0xff] %v482_v39  ;;  %420 = vst [vmem:[%s680_s3 + $0x68] sm:$0xff] %v483_v40  ;;  %v484_v43 = vpack.c.bf16 %v204_v41, %v202_v35  ;;  %v485_v44 = vpack.c.bf16 %v285_v42, %v283_v36 }
  0xfd   :  { %421 = vst [vmem:[%s680_s3 + $0x70] sm:$0xff] %v484_v43  ;;  %422 = vst [vmem:[%s680_s3 + $0x78] sm:$0xff] %v485_v44  ;;  %v207_v45 = vpop.f32.mrb[16].mxu0  ;;  %v288_v46 = vpop.f32.mrb[16].mxu1 }
  0xfe   :  { %v208_v47 = vadd.f32 %v207_v45, %v579_v21  ;;  %v289_v48 = vadd.f32 %v288_v46, %v581_v22  ;;  %v209_v49 = vpop.f32.mrb[17].mxu0  ;;  %v290_v50 = vpop.f32.mrb[17].mxu1 }
  0xff   :  { %v210_v51 = vadd.f32 %v209_v49, %v583_v23  ;;  %v291_v52 = vadd.f32 %v290_v50, %v585_v24  ;;  %v211_v53 = vpop.f32.mrb[18].mxu0  ;;  %v292_v54 = vpop.f32.mrb[18].mxu1 }
 0x100   :  { %v212_v55 = vpop.f32.mrb[19].mxu0  ;;  %v293_v56 = vpop.f32.mrb[19].mxu1 }
 0x101   :  { %v486_v57 = vpack.c.bf16 %v210_v51, %v208_v47  ;;  %v487_v58 = vpack.c.bf16 %v291_v52, %v289_v48 }
 0x103   :  { %423 = vst [vmem:[%s680_s3 + $0x80] sm:$0xff] %v486_v57  ;;  %424 = vst [vmem:[%s680_s3 + $0x88] sm:$0xff] %v487_v58 }

// kernel: decoder_forward.4
= control target key start
LH: loop header
LB: loop body
LE: loop exit
PB: predicated region body
PF: predicated region fallthrough
CT: control target
= control target key end

     0   :  { %10 = vsyncpa [#allocation5], 0  ;;  %s4948_s18 = smov 0   ;;  %s6444_s0 = inlined_call_operand.vmem [shape: bf16[12,8,512], index: 0, kind: input, shape index: {}]   ;;  %s6445_s1 = inlined_call_operand.vmem [shape: bf16[128,512], index: 1, kind: input, shape index: {}]   ;;  %s6446_s2 = inlined_call_operand.vmem [shape: bf16[1,128,512], index: 2, kind: input, shape index: {}]   ;;  %s6447_s3 = inlined_call_operand.vmem [shape: bf16[1,128,512], index: 3, kind: input, shape index: {}]   ;;  %s6448_s4 = inlined_call_operand.hbm [shape: f32[1,1,512], index: 4, kind: input, shape index: {}]   ;;  %s6449_s5 = inlined_call_operand.vmem [shape: bf16[12,8,128], index: 5, kind: output, shape index: {}]  }
   0x1 LB: > { %s4954_s19 = sadd.s32 4294967295, %s4913_s18   ;;  %p4007_p0 = scmp.ge.s32.totalorder %s4913_s18, 1  ;;  %s4913_s18 = sphi %s4948_s18, %s16_s18  }
   0x2   : > { %p157_p1 = scmp.lt.s32.totalorder %s4913_s18, 4  ;;  %p6450_p4 = scmp.eq.s32.totalorder %s4954_s19, 0 }
   0x3   : > { %s4915_s21 = smov [#allocation4]   ;;  %s4875_s26 = scalar_lea.hbm %s6448_s4, 64 }
   0x4   : > { %p4959_p3 = pnand %p4007_p0, %p157_p1  ;;  %s179_s22 = sshll.u32 %s4915_s21, 4  ;;  %s180_s22 = int_to_ptr.vmem [resolvable:$true] %s179_s22 }
   0x5   : > { %p4876_p7 = scmp.ne.s32.totalorder %s6448_s4, %s4875_s26  ;;  %p4882_p11 = scmp.lt.u32.totalorder %s4875_s26, %s6448_s4 }
   0x6   : > { %s6551_s20 = scalar_select %p4959_p3, 1, 0 }
   0x7   : > { %p4442_p5 = pneg %p4959_p3 }
   0x9   : > { %p4968_p6 = pnand %p6450_p4, %p4442_p5 }
   0xb   : > { %p4877_p8 = pneg %p4968_p6 }
   0xd   : > { %p4878_p9 = pnand %p4877_p8, %p4876_p7 }
   0xf   : > { %p4879_p10 = pneg %p4878_p9 }
  0x11   : > { %p4884_p12 = pnand %p4882_p11, %p4879_p10 }
  0x13   : > { %4887 = shalt.err (!%p4884_p12)
}
  0x14   : > { %s4888_s6 = scalar_lea.vmem %s180_s22, 64  ;;  %p4896_p5 = scmp.lt.s32.totalorder %s180_s22, %s180_s22 }
  0x15   : > { %p4889_p13 = scmp.ne.s32.totalorder %s180_s22, %s4888_s6  ;;  %p4897_p2 = scmp.lt.s32.totalorder %s4888_s6, %s4888_s6 }
  0x17   : > { %p4891_p0 = pnand %p4889_p13, %p4877_p8  ;;  %p4898_p4 = por %p4897_p2, %p4896_p5 }
  0x19   : > { %p4892_p1 = pneg %p4891_p0 }
  0x1b   : > { %p4899_p3 = pnand %p4898_p4, %p4892_p1 }
  0x1d   : > { %4902 = shalt.err (!%p4899_p3)
}
  0x1e   : > { %4445 = dma.hbm_to_vmem [thread:$0]  (!%p4968_p6), %s6448_s4, 64, %s180_s22, [#allocation5]  }
  0x1f   : > { %p6553_p7 = scmp.ne.s32.totalorder %s6551_s20, 0 }
  0x21   : > { %202 = sbr.rel (%p6553_p7) target bundleno = 1491 (0x5d3), region = 40 }
  0x28   : > { %p6554_p9 = scmp.eq.s32.totalorder %s4954_s19, 0 }
  0x2a   : > { %4908 = dma.done.wait (%p6554_p9), [#allocation5], 64   ;;  %p6555_p8 = pmov %p6554_p9 }
  0x2b   : > { %s4012_s9 = sshll.u32 %s4954_s19, 2  ;;  %p6556_p3 = scmp.ne.s32.totalorder %s4954_s19, 0 }
  0x2c   : > { %4910 = vsyncadd (%p6555_p8), [#allocation5], 4294967232  ;;  %p232_p2 = scmp.lt.s32.totalorder %s4012_s9, 11  ;;  %v4916_v0 = vmov (!%p6556_p3), 0.0  }
  0x2d   : > { %248 = sbr.rel (%p6556_p3) target bundleno = 52 (0x34), region = 48  ;;  %249 = vst [vmem:[#allocation2] sm:$0xff] (!%p6556_p3), %v4916_v0  ;;  %250 = vst [vmem:[#allocation2 + $0x8] sm:$0xff] (!%p6556_p3), %v4916_v0 }
  0x2e   : > { %s6749_s9 = smov (!%p232_p2, %s4012_s9), 11  ;;  %251 = vst [vmem:[#allocation3] sm:$0xff] (!%p6556_p3), %v4916_v0  ;;  %252 = vst [vmem:[#allocation3 + $0x8] sm:$0xff] (!%p6556_p3), %v4916_v0 }
  0x2f   : > { %s4437_s10 = sshll.u32 %s6749_s9, 4  ;;  %s4016_s11 = sshll.u32 %s6749_s9, 2 }
  0x30   : > { %s4998_s14 = scalar_lea.vmem %s6444_s0, %s4437_s10  ;;  %s5003_s17 = scalar_lea.vmem %s6449_s5, %s4016_s11 }
  0x34 PF: > { %v5010_v1 = vld [vmem:[%s6445_s1 + $0x4] ss:$16 sps:$4 sm:$0xff]   ;;  %v5015_v2 = vld [vmem:[%s6445_s1] ss:$16 sps:$4 sm:$0xff]   ;;  %v6452_v3 = vmov 0  }
  0x35   : > { %485 = vmatprep.mubr.bf16.mxu0 %v6452_v3  ;;  %526 = vmatprep.mubr.bf16.mxu1 %v6452_v3  ;;  %v5023_v4 = vld [vmem:[%s6445_s1 + $0x24] ss:$16 sps:$4 sm:$0xff]   ;;  %v5029_v5 = vld [vmem:[%s6445_s1 + $0x20] ss:$16 sps:$4 sm:$0xff]   ;;  %v5040_v7 = vld [vmem:[%s6445_s1 + $0xc] ss:$16 sps:$4 sm:$0xff]  }
  0x36   : > { %453 = vmatprep.subr.bf16.mxu0 %v5010_v1  ;;  %v5035_v6 = vld [vmem:[%s6445_s1 + $0x44] ss:$16 sps:$4 sm:$0xff]   ;;  %v5045_v8 = vld [vmem:[%s6445_s1 + $0x8] ss:$16 sps:$4 sm:$0xff]   ;;  %v5051_v9 = vld [vmem:[%s6445_s1 + $0x40] ss:$16 sps:$4 sm:$0xff]   ;;  %494 = vmatprep.subr.bf16.mxu1 %v5040_v7 }
  0x37   : > { %454 = vmatpush1.bf16.msra.mxu0 %v5015_v2  ;;  %v5058_v10 = vld [vmem:[%s6445_s1 + $0x64] ss:$16 sps:$4 sm:$0xff]   ;;  %495 = vmatpush1.bf16.msra.mxu1 %v5045_v8  ;;  %v5064_v11 = vld [vmem:[%s6445_s1 + $0x2c] ss:$16 sps:$4 sm:$0xff]   ;;  %v5069_v12 = vld [vmem:[%s6445_s1 + $0x28] ss:$16 sps:$4 sm:$0xff]  }
  0x38   : > { %455 = vmatprep.subr.bf16.mxu0 %v5023_v4  ;;  %496 = vmatprep.subr.bf16.mxu1 %v5064_v11  ;;  %v5076_v13 = vld [vmem:[%s6445_s1 + $0x60] ss:$16 sps:$4 sm:$0xff]   ;;  %v5081_v14 = vld [vmem:[%s6445_s1 + $0x84] ss:$16 sps:$4 sm:$0xff]   ;;  %v5086_v15 = vld [vmem:[%s6445_s1 + $0x4c] ss:$16 sps:$4 sm:$0xff]  }
  0x39   : > { %v5093_v16 = vld [vmem:[%s6445_s1 + $0x48] ss:$16 sps:$4 sm:$0xff]   ;;  %v5099_v17 = vld [vmem:[%s6445_s1 + $0x6c] ss:$16 sps:$4 sm:$0xff]   ;;  %v5105_v18 = vld [vmem:[%s6445_s1 + $0x80] ss:$16 sps:$4 sm:$0xff]  }
  0x3a   : > { %v5111_v19 = vld [vmem:[%s6445_s1 + $0xa4] ss:$16 sps:$4 sm:$0xff]   ;;  %v5117_v20 = vld [vmem:[%s6445_s1 + $0x68] ss:$16 sps:$4 sm:$0xff]   ;;  %v5123_v21 = vld [vmem:[%s6445_s1 + $0x8c] ss:$16 sps:$4 sm:$0xff]  }
  0x3b   : > { %456 = vmatpush1.bf16.msra.mxu0 %v5029_v5  ;;  %497 = vmatpush1.bf16.msra.mxu1 %v5069_v12  ;;  %v5128_v22 = vld [vmem:[%s6445_s1 + $0xa0] ss:$16 sps:$4 sm:$0xff]   ;;  %v5134_v23 = vld [vmem:[%s6445_s1 + $0xc4] ss:$16 sps:$4 sm:$0xff]   ;;  %v5141_v24 = vld [vmem:[%s6445_s1 + $0x88] ss:$16 sps:$4 sm:$0xff]  }
  0x3c   : > { %457 = vmatprep.subr.bf16.mxu0 %v5035_v6  ;;  %498 = vmatprep.subr.bf16.mxu1 %v5086_v15  ;;  %v5147_v25 = vld [vmem:[%s6445_s1 + $0xac] ss:$16 sps:$4 sm:$0xff]   ;;  %v5152_v26 = vld [vmem:[%s6445_s1 + $0xc0] ss:$16 sps:$4 sm:$0xff]   ;;  %v5158_v27 = vld [vmem:[%s6445_s1 + $0xe4] ss:$16 sps:$4 sm:$0xff]  }
  0x3d   : > { %v5165_v28 = vld [vmem:[%s6445_s1 + $0xa8] ss:$16 sps:$4 sm:$0xff]   ;;  %v5171_v29 = vld [vmem:[%s6445_s1 + $0xcc] ss:$16 sps:$4 sm:$0xff]   ;;  %v5176_v30 = vld [vmem:[%s6445_s1 + $0xe0] ss:$16 sps:$4 sm:$0xff]  }
  0x3e   : > { %v259_v31 = vld [vmem:[#allocation2] sm:$0xff]  ;;  %v5182_v32 = vld [vmem:[%s6445_s1 + $0xc8] ss:$16 sps:$4 sm:$0xff]   ;;  %v5195_v34 = vld [vmem:[%s6445_s1 + $0xec] ss:$16 sps:$4 sm:$0xff]  }
  0x3f   : > { %458 = vmatpush1.bf16.msra.mxu0 %v5051_v9  ;;  %499 = vmatpush1.bf16.msra.mxu1 %v5093_v16  ;;  %v5189_v33 = vld [vmem:[%s6447_s3 + $0x4] ss:$16 sps:$4 sm:$0xff]   ;;  %v260_v35 = vpack.c.bf16 %v259_v31, %v259_v31  ;;  %v5200_v36 = vld [vmem:[%s6445_s1 + $0xe8] ss:$16 sps:$4 sm:$0xff]   ;;  %v5206_v37 = vld [vmem:[%s6447_s3] ss:$16 sps:$4 sm:$0xff]  }
  0x40   : > { %459 = vmatprep.subr.bf16.mxu0 %v5058_v10  ;;  %500 = vmatprep.subr.bf16.mxu1 %v5099_v17  ;;  %v5213_v38 = vld [vmem:[%s6447_s3 + $0x24] ss:$16 sps:$4 sm:$0xff]   ;;  %v5219_v39 = vld [vmem:[%s6447_s3 + $0xc] ss:$16 sps:$4 sm:$0xff]   ;;  %v5224_v40 = vld [vmem:[%s6447_s3 + $0x20] ss:$16 sps:$4 sm:$0xff]  }
  0x41   : > { %v5229_v41 = vld [vmem:[%s6447_s3 + $0x8] ss:$16 sps:$4 sm:$0xff]   ;;  %v5234_v42 = vld [vmem:[%s6447_s3 + $0x44] ss:$16 sps:$4 sm:$0xff]   ;;  %v5240_v43 = vld [vmem:[%s6447_s3 + $0x2c] ss:$16 sps:$4 sm:$0xff]  }
  0x42   : > { %v5249_v44 = vld [vmem:[%s6447_s3 + $0x40] ss:$16 sps:$4 sm:$0xff]   ;;  %v5254_v45 = vld [vmem:[%s6447_s3 + $0x28] ss:$16 sps:$4 sm:$0xff]   ;;  %v5259_v46 = vld [vmem:[%s6447_s3 + $0x64] ss:$16 sps:$4 sm:$0xff]  }
  0x43   : > { %460 = vmatpush1.bf16.msra.mxu0 %v5076_v13  ;;  %501 = vmatpush1.bf16.msra.mxu1 %v5117_v20  ;;  %6557 = vst [vmem:[#allocation7_spill] sm:$0xff] %v5259_v46  ;;  %v5265_v47 = vld [vmem:[%s6447_s3 + $0x4c] ss:$16 sps:$4 sm:$0xff]   ;;  %v5273_v48 = vld [vmem:[%s6447_s3 + $0x60] ss:$16 sps:$4 sm:$0xff]  }
  0x44   : > { %461 = vmatprep.subr.bf16.mxu0 %v5081_v14  ;;  %502 = vmatprep.subr.bf16.mxu1 %v5123_v21  ;;  %6558 = vst [vmem:[#allocation8_spill] sm:$0xff] %v5273_v48  ;;  %v5279_v49 = vld [vmem:[%s6447_s3 + $0x48] ss:$16 sps:$4 sm:$0xff]   ;;  %v5284_v50 = vld [vmem:[%s6447_s3 + $0x84] ss:$16 sps:$4 sm:$0xff]  }
  0x45   : > { %6559 = vst [vmem:[#allocation9_spill] sm:$0xff] %v5284_v50  ;;  %v5290_v51 = vld [vmem:[%s6447_s3 + $0x6c] ss:$16 sps:$4 sm:$0xff]   ;;  %v5298_v52 = vld [vmem:[%s6447_s3 + $0x80] ss:$16 sps:$4 sm:$0xff]  }
  0x46   : > { %6560 = vst [vmem:[#allocation10_spill] sm:$0xff] %v5290_v51  ;;  %6561 = vst [vmem:[#allocation11_spill] sm:$0xff] %v5298_v52  ;;  %v5303_v53 = vld [vmem:[%s6447_s3 + $0x68] ss:$16 sps:$4 sm:$0xff]   ;;  %v5314_v54 = vld [vmem:[%s6447_s3 + $0x8c] ss:$16 sps:$4 sm:$0xff]  }
  0x47   : > { %462 = vmatpush1.bf16.msra.mxu0 %v5105_v18  ;;  %503 = vmatpush1.bf16.msra.mxu1 %v5141_v24  ;;  %6562 = vst [vmem:[#allocation12_spill] sm:$0xff] %v5303_v53  ;;  %6563 = vst [vmem:[#allocation13_spill] sm:$0xff] %v5314_v54  ;;  %v5319_v55 = vld [vmem:[%s6447_s3 + $0x88] ss:$16 sps:$4 sm:$0xff]   ;;  %v5326_v56 = vld [vmem:[%s6447_s3 + $0xa4] ss:$16 sps:$4 sm:$0xff]  }
  0x48   : > { %463 = vmatprep.subr.bf16.mxu0 %v5111_v19  ;;  %504 = vmatprep.subr.bf16.mxu1 %v5147_v25  ;;  %6564 = vst [vmem:[#allocation14_spill] sm:$0xff] %v5319_v55  ;;  %6565 = vst [vmem:[#allocation15_spill] sm:$0xff] %v5326_v56  ;;  %v5331_v57 = vld [vmem:[%s6447_s3 + $0xa0] ss:$16 sps:$4 sm:$0xff]   ;;  %v5336_v58 = vld [vmem:[%s6447_s3 + $0xac] ss:$16 sps:$4 sm:$0xff]  }
  0x49   : > { %6566 = vst [vmem:[#allocation16_spill] sm:$0xff] %v5331_v57  ;;  %6567 = vst [vmem:[#allocation17_spill] sm:$0xff] %v5336_v58  ;;  %v5342_v59 = vld [vmem:[%s6447_s3 + $0xa8] ss:$16 sps:$4 sm:$0xff]   ;;  %v5350_v60 = vld [vmem:[%s6447_s3 + $0xc4] ss:$16 sps:$4 sm:$0xff]  }
  0x4a   : > { %6568 = vst [vmem:[#allocation18_spill] sm:$0xff] %v5342_v59  ;;  %6569 = vst [vmem:[#allocation19_spill] sm:$0xff] %v5350_v60  ;;  %v5355_v61 = vld [vmem:[%s6447_s3 + $0xc0] ss:$16 sps:$4 sm:$0xff]   ;;  %v5360_v62 = vld [vmem:[%s6447_s3 + $0xcc] ss:$16 sps:$4 sm:$0xff]  }
  0x4b   : > { %464 = vmatpush1.bf16.msra.mxu0 %v5128_v22  ;;  %505 = vmatpush1.bf16.msra.mxu1 %v5165_v28  ;;  %6570 = vst [vmem:[#allocation20_spill] sm:$0xff] %v5355_v61  ;;  %6571 = vst [vmem:[#allocation21_spill] sm:$0xff] %v5360_v62  ;;  %v5366_v63 = vld [vmem:[%s6447_s3 + $0xc8] ss:$16 sps:$4 sm:$0xff]   ;;  %v5374_v0 = vld [vmem:[%s6447_s3 + $0xe4] ss:$16 sps:$4 sm:$0xff]  }
  0x4c   : > { %465 = vmatprep.subr.bf16.mxu0 %v5134_v23  ;;  %506 = vmatprep.subr.bf16.mxu1 %v5171_v29  ;;  %6572 = vst [vmem:[#allocation22_spill] sm:$0xff] %v5366_v63  ;;  %6573 = vst [vmem:[#allocation23_spill] sm:$0xff] %v5374_v0  ;;  %v5379_v31 = vld [vmem:[%s6447_s3 + $0xe0] ss:$16 sps:$4 sm:$0xff]  }
  0x4d   : > { %6574 = vst [vmem:[#allocation24_spill] sm:$0xff] %v5379_v31 }
  0x4f   : > { %466 = vmatpush1.bf16.msra.mxu0 %v5152_v26  ;;  %507 = vmatpush1.bf16.msra.mxu1 %v5182_v32 }
  0x50   : > { %467 = vmatprep.subr.bf16.mxu0 %v5158_v27  ;;  %508 = vmatprep.subr.bf16.mxu1 %v5195_v34 }
  0x53   : > { %468 = vmatpush1.bf16.msra.mxu0 %v5176_v30  ;;  %509 = vmatpush1.bf16.msra.mxu1 %v5200_v36 }
  0x54   : > { %794 = vmatprep.subr.bf16.mxu0 %v5189_v33  ;;  %835 = vmatprep.subr.bf16.mxu1 %v5219_v39 }
  0x56   : > { %486 = vmatmul.mubr.bf16.vlgmr.msra.gmra.mrb[0].mxu0 %v260_v35  ;;  %527 = vmatmul.mubr.bf16.vlgmr.msra.gmra.mrb[0].mxu1 %v260_v35  ;;  %v5384_v35 = vld [vmem:[%s6447_s3 + $0xec] ss:$16 sps:$4 sm:$0xff]  }
  0x57   : > { %795 = vmatpush1.bf16.msra.mxu0 %v5206_v37  ;;  %826 = vmatprep.mubr.bf16.mxu0 %v6452_v3  ;;  %6575 = vst [vmem:[#allocation25_spill] sm:$0xff] %v5384_v35 }
  0x58   : > { %796 = vmatprep.subr.bf16.mxu0 %v5213_v38  ;;  %836 = vmatpush1.bf16.msra.mxu1 %v5229_v41 }
  0x59   : > { %837 = vmatprep.subr.bf16.mxu1 %v5240_v43  ;;  %867 = vmatprep.mubr.bf16.mxu1 %v6452_v3  ;;  %v5390_v3 = vld [vmem:[%s6447_s3 + $0xe8] ss:$16 sps:$4 sm:$0xff]  }
  0x5a   : > { %6576 = vst [vmem:[#allocation26_spill] sm:$0xff] %v5390_v3 }
  0x5b   : > { %797 = vmatpush1.bf16.msra.mxu0 %v5224_v40 }
  0x5c   : > { %798 = vmatprep.subr.bf16.mxu0 %v5234_v42  ;;  %838 = vmatpush1.bf16.msra.mxu1 %v5254_v45 }
  0x5d   : > { %839 = vmatprep.subr.bf16.mxu1 %v5265_v47 }
  0x5f   : > { %799 = vmatpush1.bf16.msra.mxu0 %v5249_v44 }
  0x60   : > { %800 = vmatprep.subr.bf16.mxu0 %v5259_v46  ;;  %840 = vmatpush1.bf16.msra.mxu1 %v5279_v49 }
  0x61   : > { %841 = vmatprep.subr.bf16.mxu1 %v5290_v51 }
  0x63   : > { %801 = vmatpush1.bf16.msra.mxu0 %v5273_v48 }
  0x64   : > { %802 = vmatprep.subr.bf16.mxu0 %v5284_v50  ;;  %842 = vmatpush1.bf16.msra.mxu1 %v5303_v53 }
  0x65   : > { %843 = vmatprep.subr.bf16.mxu1 %v5314_v54 }
  0x67   : > { %803 = vmatpush1.bf16.msra.mxu0 %v5298_v52 }
  0x68   : > { %844 = vmatpush1.bf16.msra.mxu1 %v5319_v55  ;;  %804 = vmatprep.subr.bf16.mxu0 %v5326_v56 }
  0x69   : > { %845 = vmatprep.subr.bf16.mxu1 %v5336_v58 }
  0x6b   : > { %805 = vmatpush1.bf16.msra.mxu0 %v5331_v57 }
  0x6c   : > { %846 = vmatpush1.bf16.msra.mxu1 %v5342_v59  ;;  %806 = vmatprep.subr.bf16.mxu0 %v5350_v60  ;;  %v6583_v60 = vmov 0  }
  0x6d   : > { %847 = vmatprep.subr.bf16.mxu1 %v5360_v62  ;;  %v5398_v62 = vld [vmem:[%s6446_s2 + $0x4] ss:$16 sps:$4 sm:$0xff]  }
  0x6e   : > { %6577 = vst [vmem:[#allocation27_spill] sm:$0xff] %v5398_v62 }
  0x6f   : > { %807 = vmatpush1.bf16.msra.mxu0 %v5355_v61 }
  0x70   : > { %848 = vmatpush1.bf16.msra.mxu1 %v5366_v63  ;;  %808 = vmatprep.subr.bf16.mxu0 %v5374_v0  ;;  %v600_v63 = vld [vmem:[#allocation2 + $0x8] sm:$0xff] }
  0x71   : > { %849 = vmatprep.subr.bf16.mxu1 %v5384_v35  ;;  %v601_v61 = vpack.c.bf16 %v600_v63, %v600_v63  ;;  %v5403_v0 = vld [vmem:[%s6446_s2 + $0xc] ss:$16 sps:$4 sm:$0xff]   ;;  %v5413_v63 = vld [vmem:[%s6446_s2 + $0x8] ss:$16 sps:$4 sm:$0xff]  }
  0x72   : > { %6578 = vst [vmem:[#allocation28_spill] sm:$0xff] %v5403_v0  ;;  %6580 = vst [vmem:[#allocation30_spill] sm:$0xff] %v5413_v63  ;;  %v5427_v35 = vld [vmem:[%s6446_s2 + $0x2c] ss:$16 sps:$4 sm:$0xff]  }
  0x73   : > { %809 = vmatpush1.bf16.msra.mxu0 %v5379_v31  ;;  %v5408_v31 = vld [vmem:[%s6446_s2] ss:$16 sps:$4 sm:$0xff]   ;;  %6582 = vst [vmem:[#allocation32_spill] sm:$0xff] %v5427_v35 }
  0x74   : > { %850 = vmatpush1.bf16.msra.mxu1 %v5390_v3  ;;  %6579 = vst [vmem:[#allocation29_spill] sm:$0xff] %v5408_v31  ;;  %1036 = vmatprep.subr.bf16.mxu0 %v5398_v62  ;;  %v5422_v3 = vld [vmem:[%s6446_s2 + $0x24] ss:$16 sps:$4 sm:$0xff]   ;;  %v5553_v62 = vld [vmem:[%s6446_s2 + $0xc0] ss:$16 sps:$4 sm:$0xff]  }
  0x75   : > { %1077 = vmatprep.subr.bf16.mxu1 %v5403_v0  ;;  %6581 = vst [vmem:[#allocation31_spill] sm:$0xff] %v5422_v3  ;;  %v5453_v0 = vld [vmem:[%s6446_s2 + $0x4c] ss:$16 sps:$4 sm:$0xff]   ;;  %6604 = vst [vmem:[#allocation53_spill] sm:$0xff] %v5553_v62 }
  0x76   : > { %827 = vmatmul.mubr.bf16.vlgmr.msra.gmra.mrb[4].mxu0 %v601_v61  ;;  %6587 = vst [vmem:[#allocation36_spill] sm:$0xff] %v5453_v0 }
  0x77   : > { %868 = vmatmul.mubr.bf16.vlgmr.msra.gmra.mrb[4].mxu1 %v601_v61  ;;  %1037 = vmatpush1.bf16.msra.mxu0 %v5408_v31  ;;  %v5433_v61 = vld [vmem:[%s6446_s2 + $0x20] ss:$16 sps:$4 sm:$0xff]   ;;  %v5448_v31 = vld [vmem:[%s6446_s2 + $0x44] ss:$16 sps:$4 sm:$0xff]  }
  0x78   : > { %1078 = vmatpush1.bf16.msra.mxu1 %v5413_v63  ;;  %1068 = vmatprep.mubr.bf16.mxu0 %v6583_v60  ;;  %6584 = vst [vmem:[#allocation33_spill] sm:$0xff] %v5433_v61  ;;  %v5438_v63 = vld [vmem:[%s6446_s2 + $0x28] ss:$16 sps:$4 sm:$0xff]   ;;  %6586 = vst [vmem:[#allocation35_spill] sm:$0xff] %v5448_v31 }
  0x79   : > { %6585 = vst [vmem:[#allocation34_spill] sm:$0xff] %v5438_v63  ;;  %1109 = vmatprep.mubr.bf16.mxu1 %v6583_v60  ;;  %1038 = vmatprep.subr.bf16.mxu0 %v5422_v3  ;;  %v5458_v3 = vld [vmem:[%s6446_s2 + $0x40] ss:$16 sps:$4 sm:$0xff]  }
  0x7a   : > { %1079 = vmatprep.subr.bf16.mxu1 %v5427_v35  ;;  %6588 = vst [vmem:[#allocation37_spill] sm:$0xff] %v5458_v3  ;;  %v5477_v35 = vld [vmem:[%s6446_s2 + $0x6c] ss:$16 sps:$4 sm:$0xff]  }
  0x7b   : > { %1039 = vmatpush1.bf16.msra.mxu0 %v5433_v61  ;;  %v5463_v61 = vld [vmem:[%s6446_s2 + $0x48] ss:$16 sps:$4 sm:$0xff]   ;;  %6591 = vst [vmem:[#allocation40_spill] sm:$0xff] %v5477_v35 }
  0x7c   : > { %1080 = vmatpush1.bf16.msra.mxu1 %v5438_v63  ;;  %6589 = vst [vmem:[#allocation38_spill] sm:$0xff] %v5463_v61  ;;  %1040 = vmatprep.subr.bf16.mxu0 %v5448_v31  ;;  %v5472_v63 = vld [vmem:[%s6446_s2 + $0x64] ss:$16 sps:$4 sm:$0xff]   ;;  %v5482_v31 = vld [vmem:[%s6446_s2 + $0x60] ss:$16 sps:$4 sm:$0xff]  }
  0x7d   : > { %1081 = vmatprep.subr.bf16.mxu1 %v5453_v0  ;;  %6590 = vst [vmem:[#allocation39_spill] sm:$0xff] %v5472_v63  ;;  %6592 = vst [vmem:[#allocation41_spill] sm:$0xff] %v5482_v31  ;;  %v5501_v0 = vld [vmem:[%s6446_s2 + $0x8c] ss:$16 sps:$4 sm:$0xff]  }
  0x7e   : > { %6595 = vst [vmem:[#allocation44_spill] sm:$0xff] %v5501_v0 }
  0x7f   : > { %1041 = vmatpush1.bf16.msra.mxu0 %v5458_v3  ;;  %v5487_v3 = vld [vmem:[%s6446_s2 + $0x68] ss:$16 sps:$4 sm:$0xff]  }
  0x80   : > { %1082 = vmatpush1.bf16.msra.mxu1 %v5463_v61  ;;  %6593 = vst [vmem:[#allocation42_spill] sm:$0xff] %v5487_v3  ;;  %1042 = vmatprep.subr.bf16.mxu0 %v5472_v63  ;;  %v5496_v61 = vld [vmem:[%s6446_s2 + $0x84] ss:$16 sps:$4 sm:$0xff]   ;;  %v5506_v63 = vld [vmem:[%s6446_s2 + $0x80] ss:$16 sps:$4 sm:$0xff]  }
  0x81   : > { %1083 = vmatprep.subr.bf16.mxu1 %v5477_v35  ;;  %6594 = vst [vmem:[#allocation43_spill] sm:$0xff] %v5496_v61  ;;  %6596 = vst [vmem:[#allocation45_spill] sm:$0xff] %v5506_v63  ;;  %v5525_v35 = vld [vmem:[%s6446_s2 + $0xa4] ss:$16 sps:$4 sm:$0xff]  }
  0x82   : > { %6599 = vst [vmem:[#allocation48_spill] sm:$0xff] %v5525_v35 }
  0x83   : > { %1043 = vmatpush1.bf16.msra.mxu0 %v5482_v31  ;;  %v5511_v31 = vld [vmem:[%s6446_s2 + $0x88] ss:$16 sps:$4 sm:$0xff]  }
  0x84   : > { %1084 = vmatpush1.bf16.msra.mxu1 %v5487_v3  ;;  %6597 = vst [vmem:[#allocation46_spill] sm:$0xff] %v5511_v31  ;;  %1044 = vmatprep.subr.bf16.mxu0 %v5496_v61  ;;  %v5520_v3 = vld [vmem:[%s6446_s2 + $0xa0] ss:$16 sps:$4 sm:$0xff]   ;;  %v5530_v61 = vld [vmem:[%s6446_s2 + $0xa8] ss:$16 sps:$4 sm:$0xff]  }
  0x85   : > { %1085 = vmatprep.subr.bf16.mxu1 %v5501_v0  ;;  %6598 = vst [vmem:[#allocation47_spill] sm:$0xff] %v5520_v3  ;;  %6600 = vst [vmem:[#allocation49_spill] sm:$0xff] %v5530_v61  ;;  %v5546_v0 = vld [vmem:[%s6446_s2 + $0xcc] ss:$16 sps:$4 sm:$0xff]  }
  0x86   : > { %6603 = vst [vmem:[#allocation52_spill] sm:$0xff] %v5546_v0 }
  0x87   : > { %1045 = vmatpush1.bf16.msra.mxu0 %v5506_v63  ;;  %v5535_v63 = vld [vmem:[%s6446_s2 + $0xac] ss:$16 sps:$4 sm:$0xff]  }
  0x88   : > { %1086 = vmatpush1.bf16.msra.mxu1 %v5511_v31  ;;  %6601 = vst [vmem:[#allocation50_spill] sm:$0xff] %v5535_v63  ;;  %v5540_v31 = vld [vmem:[%s6446_s2 + $0xc4] ss:$16 sps:$4 sm:$0xff]   ;;  %1046 = vmatprep.subr.bf16.mxu0 %v5525_v35  ;;  %v5560_v35 = vld [vmem:[%s6446_s2 + $0xc8] ss:$16 sps:$4 sm:$0xff]  }
  0x89   : > { %6602 = vst [vmem:[#allocation51_spill] sm:$0xff] %v5540_v31  ;;  %1087 = vmatprep.subr.bf16.mxu1 %v5535_v63  ;;  %6605 = vst [vmem:[#allocation54_spill] sm:$0xff] %v5560_v35  ;;  %v5565_v63 = vld [vmem:[%s6446_s2 + $0xe4] ss:$16 sps:$4 sm:$0xff]  }
  0x8a   : > { %6606 = vst [vmem:[#allocation55_spill] sm:$0xff] %v5565_v63 }
  0x8b   : > { %1047 = vmatpush1.bf16.msra.mxu0 %v5520_v3 }
  0x8c   : > { %1088 = vmatpush1.bf16.msra.mxu1 %v5530_v61  ;;  %1048 = vmatprep.subr.bf16.mxu0 %v5540_v31  ;;  %v5571_v61 = vld [vmem:[%s6446_s2 + $0xec] ss:$16 sps:$4 sm:$0xff]   ;;  %v5577_v31 = vld [vmem:[%s6446_s2 + $0xe0] ss:$16 sps:$4 sm:$0xff]  }
  0x8d   : > { %1089 = vmatprep.subr.bf16.mxu1 %v5546_v0  ;;  %6607 = vst [vmem:[#allocation56_spill] sm:$0xff] %v5571_v61  ;;  %6608 = vst [vmem:[#allocation57_spill] sm:$0xff] %v5577_v31  ;;  %v5584_v0 = vld [vmem:[%s6446_s2 + $0xe8] ss:$16 sps:$4 sm:$0xff]  }
  0x8e   : > { %6609 = vst [vmem:[#allocation58_spill] sm:$0xff] %v5584_v0 }
  0x8f   : > { %1049 = vmatpush1.bf16.msra.mxu0 %v5553_v62  ;;  %v253_v62 = vld [vmem:[%s4998_s14] sm:$0xff] }
  0x90   : > { %1090 = vmatpush1.bf16.msra.mxu1 %v5560_v35  ;;  %1050 = vmatprep.subr.bf16.mxu0 %v5565_v63  ;;  %v255_v3 = vunpack.c.l.bf16 %v253_v62  ;;  %v256_v35 = vunpack.c.h.bf16 %v253_v62  ;;  %v254_v63 = vld [vmem:[%s4998_s14 + $0x8] sm:$0xff] }
  0x91   : > { %1091 = vmatprep.subr.bf16.mxu1 %v5571_v61  ;;  %v258_v61 = vunpack.c.h.bf16 %v254_v63 }
  0x93   : > { %1051 = vmatpush1.bf16.msra.mxu0 %v5577_v31 }
  0x94   : > { %1092 = vmatpush1.bf16.msra.mxu1 %v5584_v0  ;;  %1375 = vmatprep.subr.bf16.mxu0 %v5010_v1 }
  0x95   : > { %1416 = vmatprep.subr.bf16.mxu1 %v5040_v7  ;;  %v257_v7 = vunpack.c.l.bf16 %v254_v63 }
 0x129   : > { %v487_v59 = vpop.f32.mrb[0].mxu0  ;;  %v528_v31 = vpop.f32.mrb[0].mxu1 }
 0x12a   : > { %v535_v57 = vadd.f32 %v487_v59, %v255_v3  ;;  %v489_v58 = vpop.f32.mrb[1].mxu0  ;;  %v530_v0 = vpop.f32.mrb[1].mxu1  ;;  %v537_v62 = vadd.f32 %v528_v31, %v257_v7 }
 0x12b   : > { %v536_v56 = vadd.f32 %v489_v58, %v256_v35  ;;  %v491_v55 = vpop.f32.mrb[2].mxu0  ;;  %v538_v1 = vadd.f32 %v530_v0, %v258_v61  ;;  %v532_v53 = vpop.f32.mrb[2].mxu1 }
 0x12c   : > { %v4050_v52 = vmul.f32 -1.442695, %v535_v57  ;;  %v492_v54 = vpop.f32.mrb[3].mxu0  ;;  %v533_v48 = vpop.f32.mrb[3].mxu1 }
 0x12d   : > { %v4051_v50 = vmul.f32 -1.442695, %v536_v56  ;;  %v4052_v51 = vmul.f32 -1.442695, %v538_v1 }
 0x12e   : > { %4747 = vpow2.f32 %v4050_v52  ;;  %v539_v52 = vld [vmem:[#allocation3] sm:$0xff] }
 0x12f   : > { %4749 = vpow2.f32 %v4051_v50 }
 0x130   : > { %4751 = vpow2.f32 %v4052_v51 }
 0x131   : > { %4753 = vtanh.f32 %v537_v62 }
 0x138   : > { %v4748_v46 = vpop.eup %4747 }
 0x139   : > { %v4750_v3 = vpop.eup %4749  ;;  %v543_v59 = vadd.f32 1.0, %v4748_v46 }
 0x13a   : > { %v549_v55 = vadd.f32 1.0, %v4750_v3  ;;  %v4752_v54 = vpop.eup %4751 }
 0x13b   : > { %4755 = vrcp.f32 %v543_v59  ;;  %v4754_v56 = vpop.eup %4753  ;;  %v556_v50 = vadd.f32 1.0, %v4752_v54 }
 0x13c   : > { %4757 = vrcp.f32 %v549_v55 }
 0x13d   : > { %4759 = vrcp.f32 %v556_v50 }
 0x145   : > { %v4756_v57 = vpop.eup %4755 }
 0x146   : > { %v4758_v58 = vpop.eup %4757  ;;  %v560_v0 = vmul.f32 %v4756_v57, %v4754_v56 }
 0x147   : > { %v559_v53 = vmul.f32 %v4758_v58, %v539_v52  ;;  %v4760_v48 = vpop.eup %4759 }
 0x149   : > { %v5593_v35 = vadd.f32 %v560_v0, %v559_v53 }
 0x14b   : > { %4761 = vtanh.f32 %v5593_v35 }
 0x155   : > { %v4762_v51 = vpop.eup %4761 }
 0x156   : > { %v563_v46 = vmul.f32 %v4762_v51, %v4760_v48 }
 0x158   : > { %v566_v31 = vpack.c.bf16 %v563_v46, %v563_v46 }
 0x15a   : > { %1069 = vmatmul.mubr.bf16.vlgmr.msra.gmra.mrb[8].mxu0 %v566_v31  ;;  %1110 = vmatmul.mubr.bf16.vlgmr.msra.gmra.mrb[8].mxu1 %v566_v31 }
 0x15b   : > { %1376 = vmatpush1.bf16.msra.mxu0 %v5015_v2  ;;  %1417 = vmatpush1.bf16.msra.mxu1 %v5045_v8  ;;  %v6610_v2 = vld [vmem:[#allocation7_spill] sm:$0xff]  ;;  %v6614_v8 = vld [vmem:[#allocation9_spill] sm:$0xff] }
 0x15c   : > { %1377 = vmatprep.subr.bf16.mxu0 %v5023_v4  ;;  %1418 = vmatprep.subr.bf16.mxu1 %v5064_v11  ;;  %v6611_v4 = vld [vmem:[#allocation10_spill] sm:$0xff]  ;;  %v6616_v11 = vld [vmem:[#allocation11_spill] sm:$0xff] }
 0x15d   : > { %1407 = vmatprep.mubr.bf16.mxu0 %v6583_v60  ;;  %1448 = vmatprep.mubr.bf16.mxu1 %v6583_v60 }
 0x15f   : > { %1378 = vmatpush1.bf16.msra.mxu0 %v5029_v5  ;;  %1419 = vmatpush1.bf16.msra.mxu1 %v5069_v12  ;;  %v6612_v5 = vld [vmem:[#allocation8_spill] sm:$0xff]  ;;  %v6617_v12 = vld [vmem:[#allocation14_spill] sm:$0xff] }
 0x160   : > { %1379 = vmatprep.subr.bf16.mxu0 %v5035_v6  ;;  %1420 = vmatprep.subr.bf16.mxu1 %v5086_v15  ;;  %v6613_v6 = vld [vmem:[#allocation12_spill] sm:$0xff]  ;;  %v6619_v15 = vld [vmem:[#allocation17_spill] sm:$0xff] }
 0x163   : > { %1380 = vmatpush1.bf16.msra.mxu0 %v5051_v9  ;;  %1421 = vmatpush1.bf16.msra.mxu1 %v5093_v16  ;;  %v6615_v9 = vld [vmem:[#allocation13_spill] sm:$0xff] }
 0x164   : > { %1381 = vmatprep.subr.bf16.mxu0 %v5058_v10  ;;  %1422 = vmatprep.subr.bf16.mxu1 %v5099_v17  ;;  %v828_v10 = vpop.f32.mrb[4].mxu0  ;;  %v869_v17 = vpop.f32.mrb[4].mxu1 }
 0x167   : > { %1382 = vmatpush1.bf16.msra.mxu0 %v5076_v13  ;;  %1423 = vmatpush1.bf16.msra.mxu1 %v5117_v20  ;;  %v830_v13 = vpop.f32.mrb[5].mxu0 }
 0x168   : > { %1383 = vmatprep.subr.bf16.mxu0 %v5081_v14  ;;  %1424 = vmatprep.subr.bf16.mxu1 %v5123_v21  ;;  %v6618_v14 = vld [vmem:[#allocation15_spill] sm:$0xff]  ;;  %v832_v16 = vpop.f32.mrb[6].mxu0  ;;  %v6620_v21 = vld [vmem:[#allocation16_spill] sm:$0xff] }
 0x16b   : > { %1384 = vmatpush1.bf16.msra.mxu0 %v5105_v18  ;;  %1425 = vmatpush1.bf16.msra.mxu1 %v5141_v24  ;;  %v833_v18 = vpop.f32.mrb[7].mxu0  ;;  %v6622_v24 = vld [vmem:[#allocation19_spill] sm:$0xff] }
 0x16c   : > { %1385 = vmatprep.subr.bf16.mxu0 %v5111_v19  ;;  %1426 = vmatprep.subr.bf16.mxu1 %v5147_v25  ;;  %v871_v19 = vpop.f32.mrb[5].mxu1  ;;  %v6623_v25 = vld [vmem:[#allocation21_spill] sm:$0xff] }
 0x16d   : > { %v873_v20 = vpop.f32.mrb[6].mxu1 }
 0x16e   : > { %v4121_v20 = vld [vmem:[%s4998_s14 + $0x18] sm:$0xff] }
 0x16f   : > { %1386 = vmatpush1.bf16.msra.mxu0 %v5128_v22  ;;  %1427 = vmatpush1.bf16.msra.mxu1 %v5165_v28  ;;  %v6621_v22 = vld [vmem:[#allocation18_spill] sm:$0xff]  ;;  %v6626_v28 = vld [vmem:[#allocation23_spill] sm:$0xff] }
 0x170   : > { %1387 = vmatprep.subr.bf16.mxu0 %v5134_v23  ;;  %1428 = vmatprep.subr.bf16.mxu1 %v5171_v29  ;;  %v874_v23 = vpop.f32.mrb[7].mxu1  ;;  %v6627_v29 = vld [vmem:[#allocation25_spill] sm:$0xff] }
 0x173   : > { %1388 = vmatpush1.bf16.msra.mxu0 %v5152_v26  ;;  %1429 = vmatpush1.bf16.msra.mxu1 %v5182_v32  ;;  %v6624_v26 = vld [vmem:[#allocation20_spill] sm:$0xff]  ;;  %v6629_v32 = vld [vmem:[#allocation26_spill] sm:$0xff] }
 0x174   : > { %1389 = vmatprep.subr.bf16.mxu0 %v5158_v27  ;;  %1430 = vmatprep.subr.bf16.mxu1 %v5195_v34  ;;  %v6625_v27 = vld [vmem:[#allocation22_spill] sm:$0xff]  ;;  %v6631_v34 = vld [vmem:[#allocation28_spill] sm:$0xff] }
 0x177   : > { %1390 = vmatpush1.bf16.msra.mxu0 %v5176_v30  ;;  %1431 = vmatpush1.bf16.msra.mxu1 %v5200_v36  ;;  %v6628_v30 = vld [vmem:[#allocation24_spill] sm:$0xff]  ;;  %v1120_v36 = vlaneseq }
 0x178   : > { %1715 = vmatprep.subr.bf16.mxu0 %v5189_v33  ;;  %1756 = vmatprep.subr.bf16.mxu1 %v5219_v39  ;;  %v6630_v33 = vld [vmem:[#allocation27_spill] sm:$0xff]  ;;  %v1118_v39 = vld [vmem:[#allocation4] sm:$0xf] }
 0x17a   : > { %1408 = vmatmul.mubr.bf16.vlgmr.msra.gmra.mrb[12].mxu0 %v566_v31  ;;  %1449 = vmatmul.mubr.bf16.vlgmr.msra.gmra.mrb[12].mxu1 %v566_v31 }
 0x17b   : > { %1716 = vmatpush1.bf16.msra.mxu0 %v5206_v37  ;;  %1757 = vmatpush1.bf16.msra.mxu1 %v5229_v41  ;;  %v1121_v37 = vshrl.u32 %v1120_v36, 7 }
 0x17c   : > { %1717 = vmatprep.subr.bf16.mxu0 %v5213_v38  ;;  %1758 = vmatprep.subr.bf16.mxu1 %v5240_v43 }
 0x17d   : > { %1747 = vmatprep.mubr.bf16.mxu0 %v6583_v60  ;;  %1788 = vmatprep.mubr.bf16.mxu1 %v6583_v60  ;;  %v5664_v38 = vsub.s32 0, %v1121_v37  ;;  %v5670_v7 = vsub.s32 3, %v1121_v37  ;;  %v5673_v58 = vsub.s32 2, %v1121_v37 }
 0x17f   : > { %1718 = vmatpush1.bf16.msra.mxu0 %v5224_v40  ;;  %1759 = vmatpush1.bf16.msra.mxu1 %v5254_v45  ;;  %6632 = vst [vmem:[#allocation7_spill] sm:$0xff] %v5664_v38  ;;  %v5666_v40 = vsub.s32 1, %v1121_v37  ;;  %v1123_v41 = vrot.slane %v1118_v39, %v5664_v38  ;;  %v1135_v50 = vrot.slane %v1118_v39, %v5670_v7 }
 0x180   : > { %1719 = vmatprep.subr.bf16.mxu0 %v5234_v42  ;;  %1760 = vmatprep.subr.bf16.mxu1 %v5265_v47  ;;  %v1131_v53 = vrot.slane %v1118_v39, %v5673_v58 }
 0x181   : > { %6633 = vst [vmem:[#allocation10_spill] sm:$0xff] %v5666_v40 }
 0x183   : > { %1720 = vmatpush1.bf16.msra.mxu0 %v5249_v44  ;;  %1761 = vmatpush1.bf16.msra.mxu1 %v5279_v49  ;;  %v1127_v44 = vrot.slane %v1118_v39, %v5666_v40 }
 0x184   : > { %1721 = vmatprep.subr.bf16.mxu0 %v6610_v2  ;;  %1762 = vmatprep.subr.bf16.mxu1 %v6611_v4 }
 0x187   : > { %1722 = vmatpush1.bf16.msra.mxu0 %v6612_v5  ;;  %1763 = vmatpush1.bf16.msra.mxu1 %v6613_v6  ;;  %v4120_v5 = vld [vmem:[%s4998_s14 + $0x10] sm:$0xff] }
 0x188   : > { %1723 = vmatprep.subr.bf16.mxu0 %v6614_v8  ;;  %1764 = vmatprep.subr.bf16.mxu1 %v6615_v9  ;;  %v1145_v9 = vld [vmem:[#allocation3 + $0x8] sm:$0xff] }
 0x18b   : > { %1724 = vmatpush1.bf16.msra.mxu0 %v6616_v11  ;;  %1765 = vmatpush1.bf16.msra.mxu1 %v6617_v12  ;;  %v1178_v12 = vunpack.c.h.bf16 %v4120_v5 }
 0x18c   : > { %1725 = vmatprep.subr.bf16.mxu0 %v6618_v14  ;;  %1766 = vmatprep.subr.bf16.mxu1 %v6619_v15 }
 0x18f   : > { %1726 = vmatpush1.bf16.msra.mxu0 %v6620_v21  ;;  %1767 = vmatpush1.bf16.msra.mxu1 %v6621_v22 }
 0x190   : > { %1727 = vmatprep.subr.bf16.mxu0 %v6622_v24  ;;  %1768 = vmatprep.subr.bf16.mxu1 %v6623_v25 }
 0x193   : > { %1728 = vmatpush1.bf16.msra.mxu0 %v6624_v26  ;;  %1769 = vmatpush1.bf16.msra.mxu1 %v6625_v27 }
 0x194   : > { %1729 = vmatprep.subr.bf16.mxu0 %v6626_v28  ;;  %1770 = vmatprep.subr.bf16.mxu1 %v6627_v29 }
 0x197   : > { %1730 = vmatpush1.bf16.msra.mxu0 %v6628_v30  ;;  %1771 = vmatpush1.bf16.msra.mxu1 %v6629_v32  ;;  %v1180_v32 = vunpack.c.h.bf16 %v4121_v20 }
 0x198   : > { %1957 = vmatprep.subr.bf16.mxu0 %v6630_v33  ;;  %1998 = vmatprep.subr.bf16.mxu1 %v6631_v34  ;;  %v1179_v34 = vunpack.c.l.bf16 %v4121_v20  ;;  %v6659_v20 = vld [vmem:[#allocation54_spill] sm:$0xff] }
 0x22d   : > { %v1070_v42 = vpop.f32.mrb[8].mxu0  ;;  %v1111_v43 = vpop.f32.mrb[8].mxu1 }
 0x22e   : > { %v1071_v45 = vadd.f32 %v1070_v42, %v828_v10  ;;  %v1112_v47 = vadd.f32 %v1111_v43, %v869_v17  ;;  %v1072_v49 = vpop.f32.mrb[9].mxu0  ;;  %v1113_v63 = vpop.f32.mrb[9].mxu1  ;;  %v1177_v10 = vunpack.c.l.bf16 %v4120_v5  ;;  %v6646_v5 = vld [vmem:[#allocation41_spill] sm:$0xff] }
 0x22f   : > { %v1073_v61 = vadd.f32 %v1072_v49, %v830_v13  ;;  %v1114_v1 = vadd.f32 %v1113_v63, %v871_v19  ;;  %v1074_v62 = vpop.f32.mrb[10].mxu0  ;;  %v1115_v3 = vpop.f32.mrb[10].mxu1  ;;  %v6634_v63 = vld [vmem:[#allocation29_spill] sm:$0xff] }
 0x230   : > { %v1140_v59 = vadd.f32 %v1123_v41, %v1071_v45  ;;  %v1075_v55 = vpop.f32.mrb[11].mxu0  ;;  %v1116_v54 = vpop.f32.mrb[11].mxu1  ;;  %v1142_v51 = vadd.f32 %v1131_v53, %v1112_v47  ;;  %v6637_v62 = vld [vmem:[#allocation32_spill] sm:$0xff]  ;;  %v6638_v3 = vld [vmem:[#allocation33_spill] sm:$0xff] }
 0x231   : > { %v1141_v56 = vadd.f32 %v1127_v44, %v1073_v61  ;;  %v1143_v0 = vadd.f32 %v1135_v50, %v1114_v1  ;;  %v6635_v61 = vld [vmem:[#allocation30_spill] sm:$0xff]  ;;  %v6636_v1 = vld [vmem:[#allocation31_spill] sm:$0xff]  ;;  %v6641_v54 = vld [vmem:[#allocation36_spill] sm:$0xff] }
 0x232   : > { %v4117_v52 = vmul.f32 -1.442695, %v1140_v59  ;;  %v6639_v59 = vld [vmem:[#allocation34_spill] sm:$0xff]  ;;  %v6640_v55 = vld [vmem:[#allocation35_spill] sm:$0xff]  ;;  %v6642_v50 = vld [vmem:[#allocation37_spill] sm:$0xff] }
 0x233   : > { %v4118_v57 = vmul.f32 -1.442695, %v1141_v56  ;;  %v4119_v48 = vmul.f32 -1.442695, %v1143_v0  ;;  %v6643_v0 = vld [vmem:[#allocation38_spill] sm:$0xff] }
 0x234   : > { %4763 = vpow2.f32 %v4117_v52 }
 0x235   : > { %4765 = vpow2.f32 %v4118_v57 }
 0x236   : > { %4767 = vpow2.f32 %v4119_v48 }
 0x237   : > { %4769 = vtanh.f32 %v1142_v51 }
 0x23e   : > { %v4764_v46 = vpop.eup %4763 }
 0x23f   : > { %v4766_v31 = vpop.eup %4765  ;;  %v1149_v2 = vadd.f32 1.0, %v4764_v46  ;;  %v6644_v46 = vld [vmem:[#allocation39_spill] sm:$0xff] }
 0x240   : > { %v1155_v4 = vadd.f32 1.0, %v4766_v31  ;;  %v4768_v6 = vpop.eup %4767  ;;  %v6645_v31 = vld [vmem:[#allocation40_spill] sm:$0xff] }
 0x241   : > { %4771 = vrcp.f32 %v1149_v2  ;;  %v4770_v8 = vpop.eup %4769  ;;  %v1162_v15 = vadd.f32 1.0, %v4768_v6  ;;  %v6647_v6 = vld [vmem:[#allocation42_spill] sm:$0xff] }
 0x242   : > { %4773 = vrcp.f32 %v1155_v4 }
 0x243   : > { %4775 = vrcp.f32 %v1162_v15  ;;  %v6656_v15 = vld [vmem:[#allocation51_spill] sm:$0xff] }
 0x24b   : > { %v4772_v11 = vpop.eup %4771 }
 0x24c   : > { %v4774_v13 = vpop.eup %4773  ;;  %v1166_v14 = vmul.f32 %v4772_v11, %v4770_v8  ;;  %v6648_v8 = vld [vmem:[#allocation43_spill] sm:$0xff]  ;;  %v6651_v11 = vld [vmem:[#allocation46_spill] sm:$0xff] }
 0x24d   : > { %v1165_v16 = vmul.f32 %v4774_v13, %v1145_v9  ;;  %v1409_v17 = vpop.f32.mrb[12].mxu0  ;;  %v1450_v18 = vpop.f32.mrb[12].mxu1  ;;  %v6649_v9 = vld [vmem:[#allocation44_spill] sm:$0xff]  ;;  %v6654_v13 = vld [vmem:[#allocation47_spill] sm:$0xff] }
 0x24e   : > { %v1457_v19 = vadd.f32 %v1409_v17, %v1177_v10  ;;  %v1411_v21 = vpop.f32.mrb[13].mxu0  ;;  %v1452_v22 = vpop.f32.mrb[13].mxu1  ;;  %v1459_v39 = vadd.f32 %v1450_v18, %v1179_v34  ;;  %v6650_v10 = vld [vmem:[#allocation45_spill] sm:$0xff]  ;;  %v5750_v34 = vld [vmem:[%s6445_s1 + $0x2c] ss:$16 sps:$4 sm:$0xff]  }
 0x24f   : > { %v5678_v23 = vadd.f32 %v1166_v14, %v1165_v16  ;;  %v1458_v24 = vadd.f32 %v1411_v21, %v1178_v12  ;;  %v1413_v25 = vpop.f32.mrb[14].mxu0  ;;  %v1454_v26 = vpop.f32.mrb[14].mxu1  ;;  %v1460_v33 = vadd.f32 %v1452_v22, %v1180_v32  ;;  %v6652_v12 = vld [vmem:[#allocation48_spill] sm:$0xff]  ;;  %v6655_v14 = vld [vmem:[#allocation49_spill] sm:$0xff]  ;;  %v6660_v21 = vld [vmem:[#allocation55_spill] sm:$0xff] }
 0x250   : > { %v4154_v27 = vmul.f32 -1.442695, %v1457_v19  ;;  %v1414_v28 = vpop.f32.mrb[15].mxu0  ;;  %v1455_v29 = vpop.f32.mrb[15].mxu1  ;;  %v6657_v16 = vld [vmem:[#allocation52_spill] sm:$0xff]  ;;  %v6658_v19 = vld [vmem:[#allocation53_spill] sm:$0xff] }
 0x251   : > { %4777 = vtanh.f32 %v5678_v23  ;;  %v4155_v30 = vmul.f32 -1.442695, %v1458_v24  ;;  %v4156_v36 = vmul.f32 -1.442695, %v1460_v33  ;;  %v4776_v37 = vpop.eup %4775  ;;  %v6661_v22 = vld [vmem:[#allocation56_spill] sm:$0xff]  ;;  %v6663_v28 = vld [vmem:[#allocation58_spill] sm:$0xff] }
 0x252   : > { %4779 = vpow2.f32 %v4154_v27  ;;  %v5719_v25 = vld [vmem:[%s6445_s1 + $0x4] ss:$16 sps:$4 sm:$0xff]   ;;  %v5724_v26 = vld [vmem:[%s6445_s1 + $0xc] ss:$16 sps:$4 sm:$0xff]   ;;  %v5731_v29 = vld [vmem:[%s6445_s1] ss:$16 sps:$4 sm:$0xff]  }
 0x253   : > { %4781 = vpow2.f32 %v4155_v30  ;;  %v6662_v27 = vld [vmem:[#allocation57_spill] sm:$0xff] }
 0x254   : > { %4783 = vpow2.f32 %v4156_v36  ;;  %v5736_v30 = vld [vmem:[%s6445_s1 + $0x8] ss:$16 sps:$4 sm:$0xff]   ;;  %v5745_v33 = vld [vmem:[%s6445_s1 + $0x24] ss:$16 sps:$4 sm:$0xff]   ;;  %v5759_v36 = vld [vmem:[%s6445_s1 + $0x20] ss:$16 sps:$4 sm:$0xff]  }
 0x255   : > { %4785 = vtanh.f32 %v1459_v39  ;;  %v5771_v39 = vld [vmem:[%s6445_s1 + $0x44] ss:$16 sps:$4 sm:$0xff]  }
 0x25b   : > { %v4778_v41 = vpop.eup %4777 }
 0x25c   : > { %v4780_v42 = vpop.eup %4779  ;;  %v1169_v43 = vmul.f32 %v4778_v41, %v4776_v37  ;;  %v5764_v37 = vld [vmem:[%s6445_s1 + $0x28] ss:$16 sps:$4 sm:$0xff]   ;;  %v5776_v41 = vld [vmem:[%s6445_s1 + $0x4c] ss:$16 sps:$4 sm:$0xff]  }
 0x25d   : > { %v4782_v44 = vpop.eup %4781  ;;  %v1465_v45 = vadd.f32 1.0, %v4780_v42  ;;  %v5785_v42 = vld [vmem:[%s6445_s1 + $0x40] ss:$16 sps:$4 sm:$0xff]  }
 0x25e   : > { %v1172_v47 = vpack.c.bf16 %v1169_v43, %v1169_v43  ;;  %v1471_v49 = vadd.f32 1.0, %v4782_v44  ;;  %v4784_v56 = vpop.eup %4783  ;;  %v5790_v43 = vld [vmem:[%s6445_s1 + $0x48] ss:$16 sps:$4 sm:$0xff]   ;;  %v5797_v44 = vld [vmem:[%s6445_s1 + $0x64] ss:$16 sps:$4 sm:$0xff]  }
 0x25f   : > { %4787 = vrcp.f32 %v1465_v45  ;;  %v4786_v52 = vpop.eup %4785  ;;  %v1478_v51 = vadd.f32 1.0, %v4784_v56  ;;  %v5802_v45 = vld [vmem:[%s6445_s1 + $0x6c] ss:$16 sps:$4 sm:$0xff]   ;;  %v5869_v56 = vld [vmem:[%s6445_s1 + $0xc4] ss:$16 sps:$4 sm:$0xff]  }
 0x260   : > { %1173 = vst [vmem:[%s5003_s17] sm:$0xf] %v1172_v47  ;;  %4789 = vrcp.f32 %v1471_v49  ;;  %1748 = vmatmul.mubr.bf16.vlgmr.msra.gmra.mrb[16].mxu0 %v1172_v47  ;;  %1789 = vmatmul.mubr.bf16.vlgmr.msra.gmra.mrb[16].mxu1 %v1172_v47  ;;  %v5809_v47 = vld [vmem:[%s6445_s1 + $0x60] ss:$16 sps:$4 sm:$0xff]   ;;  %v5814_v49 = vld [vmem:[%s6445_s1 + $0x68] ss:$16 sps:$4 sm:$0xff]  }
 0x261   : > { %1958 = vmatpush1.bf16.msra.mxu0 %v6634_v63  ;;  %1999 = vmatpush1.bf16.msra.mxu1 %v6635_v61  ;;  %4791 = vrcp.f32 %v1478_v51  ;;  %v5821_v63 = vld [vmem:[%s6445_s1 + $0x84] ss:$16 sps:$4 sm:$0xff]   ;;  %v5826_v61 = vld [vmem:[%s6445_s1 + $0x8c] ss:$16 sps:$4 sm:$0xff]   ;;  %v5910_v51 = vld [vmem:[%s6445_s1 + $0xe8] ss:$16 sps:$4 sm:$0xff]  }
 0x262   : > { %1959 = vmatprep.subr.bf16.mxu0 %v6636_v1  ;;  %2000 = vmatprep.subr.bf16.mxu1 %v6637_v62  ;;  %v5833_v1 = vld [vmem:[%s6445_s1 + $0x80] ss:$16 sps:$4 sm:$0xff]   ;;  %v5838_v62 = vld [vmem:[%s6445_s1 + $0x88] ss:$16 sps:$4 sm:$0xff]  }
 0x263   : > { %1989 = vmatprep.mubr.bf16.mxu0 %v6583_v60  ;;  %2030 = vmatprep.mubr.bf16.mxu1 %v6583_v60 }
 0x265   : > { %1960 = vmatpush1.bf16.msra.mxu0 %v6638_v3  ;;  %2001 = vmatpush1.bf16.msra.mxu1 %v6639_v59  ;;  %v5845_v3 = vld [vmem:[%s6445_s1 + $0xa4] ss:$16 sps:$4 sm:$0xff]   ;;  %v5850_v59 = vld [vmem:[%s6445_s1 + $0xac] ss:$16 sps:$4 sm:$0xff]  }
 0x266   : > { %1961 = vmatprep.subr.bf16.mxu0 %v6640_v55  ;;  %2002 = vmatprep.subr.bf16.mxu1 %v6641_v54  ;;  %v5857_v55 = vld [vmem:[%s6445_s1 + $0xa0] ss:$16 sps:$4 sm:$0xff]   ;;  %v5862_v54 = vld [vmem:[%s6445_s1 + $0xa8] ss:$16 sps:$4 sm:$0xff]  }
 0x269   : > { %v4788_v57 = vpop.eup %4787  ;;  %1962 = vmatpush1.bf16.msra.mxu0 %v6642_v50  ;;  %2003 = vmatpush1.bf16.msra.mxu1 %v6643_v0  ;;  %v5886_v50 = vld [vmem:[%s6445_s1 + $0xc8] ss:$16 sps:$4 sm:$0xff]   ;;  %v5893_v0 = vld [vmem:[%s6445_s1 + $0xe4] ss:$16 sps:$4 sm:$0xff]  }
 0x26a   : > { %v4790_v53 = vpop.eup %4789  ;;  %v1482_v48 = vmul.f32 %v4788_v57, %v4786_v52  ;;  %1963 = vmatprep.subr.bf16.mxu0 %v6644_v46  ;;  %2004 = vmatprep.subr.bf16.mxu1 %v6645_v31  ;;  %v5874_v52 = vld [vmem:[%s6445_s1 + $0xcc] ss:$16 sps:$4 sm:$0xff]   ;;  %v5881_v57 = vld [vmem:[%s6445_s1 + $0xc0] ss:$16 sps:$4 sm:$0xff]   ;;  %v5923_v46 = vld [vmem:[%s6447_s3 + $0x4] ss:$16 sps:$4 sm:$0xff]  }
 0x26b   : > { %v1481_v2 = vmul.f32 %v4790_v53, %v5593_v35  ;;  %v6653_v35 = vld [vmem:[#allocation50_spill] sm:$0xff]  ;;  %v4792_v17 = vpop.eup %4791 }
 0x26c   : > { %v5898_v53 = vld [vmem:[%s6445_s1 + $0xec] ss:$16 sps:$4 sm:$0xff]  }
 0x26d   : > { %v5697_v4 = vadd.f32 %v1482_v48, %v1481_v2  ;;  %1964 = vmatpush1.bf16.msra.mxu0 %v6646_v5  ;;  %2005 = vmatpush1.bf16.msra.mxu1 %v6647_v6  ;;  %v5905_v48 = vld [vmem:[%s6445_s1 + $0xe0] ss:$16 sps:$4 sm:$0xff]   ;;  %v5928_v31 = vld [vmem:[%s6447_s3 + $0xc] ss:$16 sps:$4 sm:$0xff]   ;;  %v5938_v5 = vld [vmem:[%s6447_s3 + $0x8] ss:$16 sps:$4 sm:$0xff]  }
 0x26e   : > { %1965 = vmatprep.subr.bf16.mxu0 %v6648_v8  ;;  %2006 = vmatprep.subr.bf16.mxu1 %v6649_v9  ;;  %v5933_v2 = vld [vmem:[%s6447_s3] ss:$16 sps:$4 sm:$0xff]   ;;  %6665 = vst [vmem:[#allocation12_spill] sm:$0xff] %v5938_v5  ;;  %v5947_v6 = vld [vmem:[%s6447_s3 + $0x24] ss:$16 sps:$4 sm:$0xff]  }
 0x26f   : > { %4793 = vtanh.f32 %v5697_v4  ;;  %6664 = vst [vmem:[#allocation8_spill] sm:$0xff] %v5933_v2  ;;  %6666 = vst [vmem:[#allocation9_spill] sm:$0xff] %v5947_v6  ;;  %v5952_v8 = vld [vmem:[%s6447_s3 + $0x2c] ss:$16 sps:$4 sm:$0xff]   ;;  %v5957_v9 = vld [vmem:[%s6447_s3 + $0x20] ss:$16 sps:$4 sm:$0xff]  }
 0x270   : > { %6667 = vst [vmem:[#allocation13_spill] sm:$0xff] %v5952_v8  ;;  %6668 = vst [vmem:[#allocation11_spill] sm:$0xff] %v5957_v9 }
 0x271   : > { %1966 = vmatpush1.bf16.msra.mxu0 %v6650_v10  ;;  %2007 = vmatpush1.bf16.msra.mxu1 %v6651_v11  ;;  %v5962_v10 = vld [vmem:[%s6447_s3 + $0x28] ss:$16 sps:$4 sm:$0xff]   ;;  %v5971_v11 = vld [vmem:[%s6447_s3 + $0x44] ss:$16 sps:$4 sm:$0xff]  }
 0x272   : > { %1967 = vmatprep.subr.bf16.mxu0 %v6652_v12  ;;  %2008 = vmatprep.subr.bf16.mxu1 %v6653_v35  ;;  %6669 = vst [vmem:[#allocation14_spill] sm:$0xff] %v5962_v10  ;;  %6670 = vst [vmem:[#allocation15_spill] sm:$0xff] %v5971_v11  ;;  %v5976_v12 = vld [vmem:[%s6447_s3 + $0x4c] ss:$16 sps:$4 sm:$0xff]   ;;  %v5981_v35 = vld [vmem:[%s6447_s3 + $0x40] ss:$16 sps:$4 sm:$0xff]  }
 0x273   : > { %6671 = vst [vmem:[#allocation17_spill] sm:$0xff] %v5976_v12  ;;  %6672 = vst [vmem:[#allocation16_spill] sm:$0xff] %v5981_v35 }
 0x275   : > { %1968 = vmatpush1.bf16.msra.mxu0 %v6654_v13  ;;  %2009 = vmatpush1.bf16.msra.mxu1 %v6655_v14  ;;  %v5986_v13 = vld [vmem:[%s6447_s3 + $0x48] ss:$16 sps:$4 sm:$0xff]   ;;  %v5995_v14 = vld [vmem:[%s6447_s3 + $0x64] ss:$16 sps:$4 sm:$0xff]  }
 0x276   : > { %1969 = vmatprep.subr.bf16.mxu0 %v6656_v15  ;;  %2010 = vmatprep.subr.bf16.mxu1 %v6657_v16  ;;  %6673 = vst [vmem:[#allocation18_spill] sm:$0xff] %v5986_v13  ;;  %6674 = vst [vmem:[#allocation19_spill] sm:$0xff] %v5995_v14  ;;  %v6000_v15 = vld [vmem:[%s6447_s3 + $0x6c] ss:$16 sps:$4 sm:$0xff]   ;;  %v6005_v16 = vld [vmem:[%s6447_s3 + $0x60] ss:$16 sps:$4 sm:$0xff]  }
 0x277   : > { %6675 = vst [vmem:[#allocation21_spill] sm:$0xff] %v6000_v15  ;;  %6676 = vst [vmem:[#allocation20_spill] sm:$0xff] %v6005_v16 }
 0x279   : > { %v4794_v18 = vpop.eup %4793  ;;  %1970 = vmatpush1.bf16.msra.mxu0 %v6658_v19  ;;  %2011 = vmatpush1.bf16.msra.mxu1 %v6659_v20  ;;  %v6024_v19 = vld [vmem:[%s6447_s3 + $0x8c] ss:$16 sps:$4 sm:$0xff]   ;;  %v6029_v20 = vld [vmem:[%s6447_s3 + $0x80] ss:$16 sps:$4 sm:$0xff]  }
 0x27a   : > { %1971 = vmatprep.subr.bf16.mxu0 %v6660_v21  ;;  %2012 = vmatprep.subr.bf16.mxu1 %v6661_v22  ;;  %v1485_v24 = vmul.f32 %v4794_v18, %v4792_v17  ;;  %v6010_v17 = vld [vmem:[%s6447_s3 + $0x68] ss:$16 sps:$4 sm:$0xff]   ;;  %v6019_v18 = vld [vmem:[%s6447_s3 + $0x84] ss:$16 sps:$4 sm:$0xff]   ;;  %6679 = vst [vmem:[#allocation25_spill] sm:$0xff] %v6024_v19  ;;  %6680 = vst [vmem:[#allocation24_spill] sm:$0xff] %v6029_v20 }
 0x27b   : > { %6677 = vst [vmem:[#allocation22_spill] sm:$0xff] %v6010_v17  ;;  %6678 = vst [vmem:[#allocation23_spill] sm:$0xff] %v6019_v18  ;;  %v6034_v21 = vld [vmem:[%s6447_s3 + $0x88] ss:$16 sps:$4 sm:$0xff]   ;;  %v6043_v22 = vld [vmem:[%s6447_s3 + $0xa4] ss:$16 sps:$4 sm:$0xff]  }
 0x27c   : > { %v5738_v32 = vpack.c.bf16 %v1485_v24, %v1485_v24  ;;  %6681 = vst [vmem:[#allocation26_spill] sm:$0xff] %v6034_v21  ;;  %6682 = vst [vmem:[#allocation27_spill] sm:$0xff] %v6043_v22  ;;  %v6048_v24 = vld [vmem:[%s6447_s3 + $0xac] ss:$16 sps:$4 sm:$0xff]  }
 0x27d   : > { %1972 = vmatpush1.bf16.msra.mxu0 %v6662_v27  ;;  %2013 = vmatpush1.bf16.msra.mxu1 %v6663_v28  ;;  %6683 = vst [vmem:[#allocation28_spill] sm:$0xff] %v6048_v24  ;;  %v6053_v27 = vld [vmem:[%s6447_s3 + $0xa0] ss:$16 sps:$4 sm:$0xff]   ;;  %v6058_v28 = vld [vmem:[%s6447_s3 + $0xa8] ss:$16 sps:$4 sm:$0xff]  }
 0x27e   : > { %2296 = vmatprep.subr.bf16.mxu0 %v5719_v25  ;;  %2337 = vmatprep.subr.bf16.mxu1 %v5724_v26  ;;  %6684 = vst [vmem:[#allocation29_spill] sm:$0xff] %v6053_v27  ;;  %6685 = vst [vmem:[#allocation30_spill] sm:$0xff] %v6058_v28 }
 0x280   : > { %1990 = vmatmul.mubr.bf16.vlgmr.msra.gmra.mrb[20].mxu0 %v5738_v32  ;;  %2031 = vmatmul.mubr.bf16.vlgmr.msra.gmra.mrb[20].mxu1 %v5738_v32 }
 0x281   : > { %2297 = vmatpush1.bf16.msra.mxu0 %v5731_v29  ;;  %2338 = vmatpush1.bf16.msra.mxu1 %v5736_v30 }
 0x282   : > { %2298 = vmatprep.subr.bf16.mxu0 %v5745_v33  ;;  %2339 = vmatprep.subr.bf16.mxu1 %v5750_v34 }
 0x283   : > { %2328 = vmatprep.mubr.bf16.mxu0 %v6583_v60  ;;  %2369 = vmatprep.mubr.bf16.mxu1 %v6583_v60 }
 0x285   : > { %2299 = vmatpush1.bf16.msra.mxu0 %v5759_v36  ;;  %2340 = vmatpush1.bf16.msra.mxu1 %v5764_v37 }
 0x286   : > { %2300 = vmatprep.subr.bf16.mxu0 %v5771_v39  ;;  %2341 = vmatprep.subr.bf16.mxu1 %v5776_v41 }
 0x289   : > { %2301 = vmatpush1.bf16.msra.mxu0 %v5785_v42  ;;  %2342 = vmatpush1.bf16.msra.mxu1 %v5790_v43 }
 0x28a   : > { %2302 = vmatprep.subr.bf16.mxu0 %v5797_v44  ;;  %2343 = vmatprep.subr.bf16.mxu1 %v5802_v45 }
 0x28d   : > { %2303 = vmatpush1.bf16.msra.mxu0 %v5809_v47  ;;  %2344 = vmatpush1.bf16.msra.mxu1 %v5814_v49 }
 0x28e   : > { %2304 = vmatprep.subr.bf16.mxu0 %v5821_v63  ;;  %2345 = vmatprep.subr.bf16.mxu1 %v5826_v61 }
 0x291   : > { %2305 = vmatpush1.bf16.msra.mxu0 %v5833_v1  ;;  %2346 = vmatpush1.bf16.msra.mxu1 %v5838_v62 }
 0x292   : > { %2306 = vmatprep.subr.bf16.mxu0 %v5845_v3  ;;  %2347 = vmatprep.subr.bf16.mxu1 %v5850_v59 }
 0x295   : > { %2307 = vmatpush1.bf16.msra.mxu0 %v5857_v55  ;;  %2348 = vmatpush1.bf16.msra.mxu1 %v5862_v54 }
 0x296   : > { %2308 = vmatprep.subr.bf16.mxu0 %v5869_v56  ;;  %2349 = vmatprep.subr.bf16.mxu1 %v5874_v52 }
 0x299   : > { %2309 = vmatpush1.bf16.msra.mxu0 %v5881_v57  ;;  %2350 = vmatpush1.bf16.msra.mxu1 %v5886_v50 }
 0x29a   : > { %2310 = vmatprep.subr.bf16.mxu0 %v5893_v0  ;;  %2351 = vmatprep.subr.bf16.mxu1 %v5898_v53 }
 0x29d   : > { %2311 = vmatpush1.bf16.msra.mxu0 %v5905_v48  ;;  %2352 = vmatpush1.bf16.msra.mxu1 %v5910_v51 }
 0x29e   : > { %2636 = vmatprep.subr.bf16.mxu0 %v5923_v46  ;;  %2677 = vmatprep.subr.bf16.mxu1 %v5928_v31 }
 0x2a0   : > { %2329 = vmatmul.mubr.bf16.vlgmr.msra.gmra.mrb[24].mxu0 %v5738_v32  ;;  %2370 = vmatmul.mubr.bf16.vlgmr.msra.gmra.mrb[24].mxu1 %v5738_v32  ;;  %v6067_v32 = vld [vmem:[%s6447_s3 + $0xc4] ss:$16 sps:$4 sm:$0xff]  }
 0x2a1   : > { %2668 = vmatprep.mubr.bf16.mxu0 %v6583_v60  ;;  %2709 = vmatprep.mubr.bf16.mxu1 %v6583_v60  ;;  %6686 = vst [vmem:[#allocation31_spill] sm:$0xff] %v6067_v32 }
 0x2a2   : > { %2637 = vmatpush1.bf16.msra.mxu0 %v5933_v2  ;;  %2678 = vmatpush1.bf16.msra.mxu1 %v5938_v5 }
 0x2a3   : > { %2638 = vmatprep.subr.bf16.mxu0 %v5947_v6  ;;  %2679 = vmatprep.subr.bf16.mxu1 %v5952_v8 }
 0x2a6   : > { %2639 = vmatpush1.bf16.msra.mxu0 %v5957_v9  ;;  %2680 = vmatpush1.bf16.msra.mxu1 %v5962_v10 }
 0x2a7   : > { %2640 = vmatprep.subr.bf16.mxu0 %v5971_v11  ;;  %2681 = vmatprep.subr.bf16.mxu1 %v5976_v12 }
 0x2aa   : > { %2641 = vmatpush1.bf16.msra.mxu0 %v5981_v35  ;;  %2682 = vmatpush1.bf16.msra.mxu1 %v5986_v13 }
 0x2ab   : > { %2642 = vmatprep.subr.bf16.mxu0 %v5995_v14  ;;  %2683 = vmatprep.subr.bf16.mxu1 %v6000_v15 }
 0x2ae   : > { %2643 = vmatpush1.bf16.msra.mxu0 %v6005_v16  ;;  %2684 = vmatpush1.bf16.msra.mxu1 %v6010_v17  ;;  %v2039_v16 = vld [vmem:[#allocation4] sm:$0xf] }
 0x2af   : > { %2644 = vmatprep.subr.bf16.mxu0 %v6019_v18  ;;  %2685 = vmatprep.subr.bf16.mxu1 %v6024_v19  ;;  %v2044_v15 = vrot.slane %v2039_v16, %v5664_v38  ;;  %v2048_v35 = vrot.slane %v2039_v16, %v5666_v40  ;;  %v2056_v38 = vrot.slane %v2039_v16, %v5670_v7 }
 0x2b2   : > { %2645 = vmatpush1.bf16.msra.mxu0 %v6029_v20  ;;  %2686 = vmatpush1.bf16.msra.mxu1 %v6034_v21  ;;  %v6072_v21 = vld [vmem:[%s6447_s3 + $0xcc] ss:$16 sps:$4 sm:$0xff]  }
 0x2b3   : > { %2646 = vmatprep.subr.bf16.mxu0 %v6043_v22  ;;  %2687 = vmatprep.subr.bf16.mxu1 %v6048_v24  ;;  %6687 = vst [vmem:[#allocation32_spill] sm:$0xff] %v6072_v21  ;;  %v6077_v22 = vld [vmem:[%s6447_s3 + $0xc0] ss:$16 sps:$4 sm:$0xff]   ;;  %v6096_v24 = vld [vmem:[%s6447_s3 + $0xec] ss:$16 sps:$4 sm:$0xff]  }
 0x2b4   : > { %6688 = vst [vmem:[#allocation33_spill] sm:$0xff] %v6077_v22  ;;  %6691 = vst [vmem:[#allocation36_spill] sm:$0xff] %v6096_v24 }
 0x2b6   : > { %2647 = vmatpush1.bf16.msra.mxu0 %v6053_v27  ;;  %2688 = vmatpush1.bf16.msra.mxu1 %v6058_v28  ;;  %v6082_v27 = vld [vmem:[%s6447_s3 + $0xc8] ss:$16 sps:$4 sm:$0xff]   ;;  %v6091_v28 = vld [vmem:[%s6447_s3 + $0xe4] ss:$16 sps:$4 sm:$0xff]  }
 0x2b7   : > { %6689 = vst [vmem:[#allocation34_spill] sm:$0xff] %v6082_v27  ;;  %2648 = vmatprep.subr.bf16.mxu0 %v6067_v32  ;;  %2689 = vmatprep.subr.bf16.mxu1 %v6072_v21  ;;  %6690 = vst [vmem:[#allocation35_spill] sm:$0xff] %v6091_v28  ;;  %v6101_v32 = vld [vmem:[%s6447_s3 + $0xe0] ss:$16 sps:$4 sm:$0xff]   ;;  %v6120_v21 = vld [vmem:[%s6446_s2 + $0xc] ss:$16 sps:$4 sm:$0xff]  }
 0x2b8   : > { %6692 = vst [vmem:[#allocation37_spill] sm:$0xff] %v6101_v32  ;;  %6695 = vst [vmem:[#allocation40_spill] sm:$0xff] %v6120_v21 }
 0x2ba   : > { %2649 = vmatpush1.bf16.msra.mxu0 %v6077_v22  ;;  %2690 = vmatpush1.bf16.msra.mxu1 %v6082_v27  ;;  %v6106_v22 = vld [vmem:[%s6447_s3 + $0xe8] ss:$16 sps:$4 sm:$0xff]   ;;  %v6115_v27 = vld [vmem:[%s6446_s2 + $0x4] ss:$16 sps:$4 sm:$0xff]  }
 0x2bb   : > { %6693 = vst [vmem:[#allocation38_spill] sm:$0xff] %v6106_v22  ;;  %2650 = vmatprep.subr.bf16.mxu0 %v6091_v28  ;;  %2691 = vmatprep.subr.bf16.mxu1 %v6096_v24  ;;  %6694 = vst [vmem:[#allocation39_spill] sm:$0xff] %v6115_v27 }
 0x2be   : > { %2651 = vmatpush1.bf16.msra.mxu0 %v6101_v32  ;;  %2692 = vmatpush1.bf16.msra.mxu1 %v6106_v22 }
 0x2bf   : > { %2878 = vmatprep.subr.bf16.mxu0 %v6115_v27  ;;  %2919 = vmatprep.subr.bf16.mxu1 %v6120_v21 }
 0x333   : > { %v1749_v28 = vpop.f32.mrb[16].mxu0  ;;  %v1790_v24 = vpop.f32.mrb[16].mxu1 }
 0x334   : > { %v1751_v20 = vpop.f32.mrb[17].mxu0  ;;  %v1792_v32 = vpop.f32.mrb[17].mxu1 }
 0x335   : > { %v1753_v19 = vpop.f32.mrb[18].mxu0  ;;  %v1794_v22 = vpop.f32.mrb[18].mxu1 }
 0x336   : > { %v1754_v18 = vpop.f32.mrb[19].mxu0  ;;  %v1795_v17 = vpop.f32.mrb[19].mxu1 }
 0x353   : > { %v1991_v14 = vpop.f32.mrb[20].mxu0  ;;  %v2032_v13 = vpop.f32.mrb[20].mxu1 }
 0x354   : > { %v1992_v12 = vadd.f32 %v1991_v14, %v1749_v28  ;;  %v2033_v11 = vadd.f32 %v2032_v13, %v1790_v24  ;;  %v1993_v27 = vpop.f32.mrb[21].mxu0  ;;  %v2034_v10 = vpop.f32.mrb[21].mxu1  ;;  %v2052_v13 = vrot.slane %v2039_v16, %v5673_v58 }
 0x355   : > { %v1994_v21 = vadd.f32 %v1993_v27, %v1751_v20  ;;  %v2035_v9 = vadd.f32 %v2034_v10, %v1792_v32  ;;  %v1995_v8 = vpop.f32.mrb[22].mxu0  ;;  %v2036_v6 = vpop.f32.mrb[22].mxu1  ;;  %v4226_v32 = vld [vmem:[%s4998_s14 + $0x28] sm:$0xff] }
 0x356   : > { %v2061_v5 = vadd.f32 %v2044_v15, %v1992_v12  ;;  %v1996_v19 = vpop.f32.mrb[23].mxu0  ;;  %v2037_v22 = vpop.f32.mrb[23].mxu1  ;;  %v2063_v24 = vadd.f32 %v2052_v13, %v2033_v11 }
 0x357   : > { %v2062_v18 = vadd.f32 %v2048_v35, %v1994_v21  ;;  %v2064_v40 = vadd.f32 %v2056_v38, %v2035_v9 }
 0x358   : > { %v4221_v17 = vmul.f32 -1.442695, %v2061_v5  ;;  %v4225_v5 = vld [vmem:[%s4998_s14 + $0x20] sm:$0xff] }
 0x359   : > { %v4222_v2 = vmul.f32 -1.442695, %v2062_v18  ;;  %v4223_v14 = vmul.f32 -1.442695, %v2064_v40  ;;  %v2098_v15 = vunpack.c.l.bf16 %v4225_v5 }
 0x35a   : > { %4795 = vpow2.f32 %v4221_v17 }
 0x35b   : > { %4797 = vpow2.f32 %v4222_v2  ;;  %v2099_v2 = vunpack.c.h.bf16 %v4225_v5  ;;  %v2100_v5 = vunpack.c.l.bf16 %v4226_v32 }
 0x35c   : > { %4799 = vpow2.f32 %v4223_v14 }
 0x35d   : > { %4801 = vtanh.f32 %v2063_v24 }
 0x364   : > { %v4796_v20 = vpop.eup %4795 }
 0x365   : > { %v4798_v10 = vpop.eup %4797  ;;  %v2069_v8 = vadd.f32 1.0, %v4796_v20 }
 0x366   : > { %v2075_v6 = vadd.f32 1.0, %v4798_v10  ;;  %v4800_v12 = vpop.eup %4799 }
 0x367   : > { %4803 = vrcp.f32 %v2069_v8  ;;  %v4802_v35 = vpop.eup %4801  ;;  %v2082_v16 = vadd.f32 1.0, %v4800_v12 }
 0x368   : > { %4805 = vrcp.f32 %v2075_v6  ;;  %v2101_v6 = vunpack.c.h.bf16 %v4226_v32 }
 0x369   : > { %4807 = vrcp.f32 %v2082_v16 }
 0x371   : > { %v4804_v21 = vpop.eup %4803 }
 0x372   : > { %v4806_v38 = vpop.eup %4805  ;;  %v2086_v9 = vmul.f32 %v4804_v21, %v4802_v35 }
 0x373   : > { %v2085_v40 = vmul.f32 %v4806_v38, %v5678_v23  ;;  %v2330_v11 = vpop.f32.mrb[24].mxu0  ;;  %v2371_v27 = vpop.f32.mrb[24].mxu1 }
 0x374   : > { %v2378_v28 = vadd.f32 %v2330_v11, %v2098_v15  ;;  %v2332_v19 = vpop.f32.mrb[25].mxu0  ;;  %v2373_v22 = vpop.f32.mrb[25].mxu1  ;;  %v2380_v15 = vadd.f32 %v2371_v27, %v2100_v5  ;;  %v6142_v11 = vld [vmem:[%s6446_s2 + $0x8] ss:$16 sps:$4 sm:$0xff]   ;;  %v6147_v27 = vld [vmem:[%s6446_s2 + $0x24] ss:$16 sps:$4 sm:$0xff]  }
 0x375   : > { %v6131_v18 = vadd.f32 %v2086_v9, %v2085_v40  ;;  %v2379_v17 = vadd.f32 %v2332_v19, %v2099_v2  ;;  %v2334_v13 = vpop.f32.mrb[26].mxu0  ;;  %v2375_v14 = vpop.f32.mrb[26].mxu1  ;;  %v2381_v23 = vadd.f32 %v2373_v22, %v2101_v6  ;;  %v6137_v40 = vld [vmem:[%s6446_s2] ss:$16 sps:$4 sm:$0xff]   ;;  %v6152_v19 = vld [vmem:[%s6446_s2 + $0x2c] ss:$16 sps:$4 sm:$0xff]  }
 0x376   : > { %v4259_v24 = vmul.f32 -1.442695, %v2378_v28  ;;  %v2335_v20 = vpop.f32.mrb[27].mxu0  ;;  %v2376_v10 = vpop.f32.mrb[27].mxu1  ;;  %v6160_v22 = vld [vmem:[%s6446_s2 + $0x20] ss:$16 sps:$4 sm:$0xff]  }
 0x377   : > { %4809 = vtanh.f32 %v6131_v18  ;;  %v4260_v8 = vmul.f32 -1.442695, %v2379_v17  ;;  %v4261_v12 = vmul.f32 -1.442695, %v2381_v23  ;;  %v4808_v35 = vpop.eup %4807  ;;  %v6165_v17 = vld [vmem:[%s6446_s2 + $0x28] ss:$16 sps:$4 sm:$0xff]  }
 0x378   : > { %4811 = vpow2.f32 %v4259_v24  ;;  %v6172_v13 = vld [vmem:[%s6446_s2 + $0x44] ss:$16 sps:$4 sm:$0xff]   ;;  %v6177_v14 = vld [vmem:[%s6446_s2 + $0x4c] ss:$16 sps:$4 sm:$0xff]   ;;  %v6186_v24 = vld [vmem:[%s6446_s2 + $0x40] ss:$16 sps:$4 sm:$0xff]  }
 0x379   : > { %4813 = vpow2.f32 %v4260_v8  ;;  %v6191_v20 = vld [vmem:[%s6446_s2 + $0x48] ss:$16 sps:$4 sm:$0xff]   ;;  %v6198_v10 = vld [vmem:[%s6446_s2 + $0x64] ss:$16 sps:$4 sm:$0xff]   ;;  %v6203_v8 = vld [vmem:[%s6446_s2 + $0x6c] ss:$16 sps:$4 sm:$0xff]  }
 0x37a   : > { %4815 = vpow2.f32 %v4261_v12  ;;  %v6210_v12 = vld [vmem:[%s6446_s2 + $0x60] ss:$16 sps:$4 sm:$0xff]  }
 0x37b   : > { %4817 = vtanh.f32 %v2380_v15 }
 0x381   : > { %v4810_v21 = vpop.eup %4809 }
 0x382   : > { %v4812_v2 = vpop.eup %4811  ;;  %v2089_v38 = vmul.f32 %v4810_v21, %v4808_v35  ;;  %v6215_v35 = vld [vmem:[%s6446_s2 + $0x68] ss:$16 sps:$4 sm:$0xff]  }
 0x383   : > { %v4814_v9 = vpop.eup %4813  ;;  %v2386_v16 = vadd.f32 1.0, %v4812_v2 }
 0x384   : > { %v2092_v28 = vpack.c.bf16 %v2089_v38, %v2089_v38  ;;  %v2392_v32 = vadd.f32 1.0, %v4814_v9  ;;  %v4816_v6 = vpop.eup %4815  ;;  %v6222_v38 = vld [vmem:[%s6446_s2 + $0x84] ss:$16 sps:$4 sm:$0xff]   ;;  %v6227_v9 = vld [vmem:[%s6446_s2 + $0x8c] ss:$16 sps:$4 sm:$0xff]  }
 0x385   : > { %4819 = vrcp.f32 %v2386_v16  ;;  %v4818_v23 = vpop.eup %4817  ;;  %v2399_v2 = vadd.f32 1.0, %v4816_v6  ;;  %6696 = vst [vmem:[#allocation41_spill] sm:$0xff] %v6227_v9  ;;  %v6242_v6 = vld [vmem:[%s6446_s2 + $0x88] ss:$16 sps:$4 sm:$0xff]  }
 0x386   : > { %4224 = vst [vmem:[%s5003_s17 + $0x4] sm:$0xf] %v2092_v28  ;;  %4821 = vrcp.f32 %v2392_v32  ;;  %2669 = vmatmul.mubr.bf16.vlgmr.msra.gmra.mrb[28].mxu0 %v2092_v28  ;;  %2710 = vmatmul.mubr.bf16.vlgmr.msra.gmra.mrb[28].mxu1 %v2092_v28  ;;  %v6237_v32 = vld [vmem:[%s6446_s2 + $0x80] ss:$16 sps:$4 sm:$0xff]   ;;  %6698 = vst [vmem:[#allocation43_spill] sm:$0xff] %v6242_v6 }
 0x387   : > { %2879 = vmatpush1.bf16.msra.mxu0 %v6137_v40  ;;  %2920 = vmatpush1.bf16.msra.mxu1 %v6142_v11  ;;  %6697 = vst [vmem:[#allocation42_spill] sm:$0xff] %v6237_v32  ;;  %4823 = vrcp.f32 %v2399_v2  ;;  %v6279_v2 = vld [vmem:[%s6446_s2 + $0xcc] ss:$16 sps:$4 sm:$0xff]  }
 0x388   : > { %2880 = vmatprep.subr.bf16.mxu0 %v6147_v27  ;;  %2921 = vmatprep.subr.bf16.mxu1 %v6152_v19  ;;  %6704 = vst [vmem:[#allocation47_spill] sm:$0xff] %v6279_v2 }
 0x389   : > { %2910 = vmatprep.mubr.bf16.mxu0 %v6583_v60  ;;  %2951 = vmatprep.mubr.bf16.mxu1 %v6583_v60 }
 0x38b   : > { %2881 = vmatpush1.bf16.msra.mxu0 %v6160_v22  ;;  %2922 = vmatpush1.bf16.msra.mxu1 %v6165_v17 }
 0x38c   : > { %2882 = vmatprep.subr.bf16.mxu0 %v6172_v13  ;;  %2923 = vmatprep.subr.bf16.mxu1 %v6177_v14 }
 0x38f   : > { %v4820_v5 = vpop.eup %4819  ;;  %2883 = vmatpush1.bf16.msra.mxu0 %v6186_v24  ;;  %2924 = vmatpush1.bf16.msra.mxu1 %v6191_v20 }
 0x390   : > { %v4822_v15 = vpop.eup %4821  ;;  %v2403_v21 = vmul.f32 %v4820_v5, %v4818_v23  ;;  %2884 = vmatprep.subr.bf16.mxu0 %v6198_v10  ;;  %2925 = vmatprep.subr.bf16.mxu1 %v6203_v8  ;;  %v6254_v23 = vld [vmem:[%s6446_s2 + $0xac] ss:$16 sps:$4 sm:$0xff]   ;;  %v6262_v5 = vld [vmem:[%s6446_s2 + $0xa0] ss:$16 sps:$4 sm:$0xff]  }
 0x391   : > { %v2402_v16 = vmul.f32 %v4822_v15, %v5697_v4  ;;  %v6249_v4 = vld [vmem:[%s6446_s2 + $0xa4] ss:$16 sps:$4 sm:$0xff]   ;;  %6700 = vst [vmem:[#allocation45_spill] sm:$0xff] %v6254_v23  ;;  %6701 = vst [vmem:[#allocation46_spill] sm:$0xff] %v6262_v5  ;;  %v6267_v15 = vld [vmem:[%s6446_s2 + $0xa8] ss:$16 sps:$4 sm:$0xff]  }
 0x392   : > { %6699 = vst [vmem:[#allocation44_spill] sm:$0xff] %v6249_v4  ;;  %6702 = vst [vmem:[#allocation48_spill] sm:$0xff] %v6267_v15 }
 0x393   : > { %v6230_v28 = vadd.f32 %v2403_v21, %v2402_v16  ;;  %2885 = vmatpush1.bf16.msra.mxu0 %v6210_v12  ;;  %2926 = vmatpush1.bf16.msra.mxu1 %v6215_v35  ;;  %v6274_v21 = vld [vmem:[%s6446_s2 + $0xc4] ss:$16 sps:$4 sm:$0xff]   ;;  %v6286_v16 = vld [vmem:[%s6446_s2 + $0xc0] ss:$16 sps:$4 sm:$0xff]  }
 0x394   : > { %2886 = vmatprep.subr.bf16.mxu0 %v6222_v38  ;;  %2927 = vmatprep.subr.bf16.mxu1 %v6227_v9  ;;  %6703 = vst [vmem:[#allocation50_spill] sm:$0xff] %v6274_v21 }
 0x395   : > { %4825 = vtanh.f32 %v6230_v28 }
 0x397   : > { %2887 = vmatpush1.bf16.msra.mxu0 %v6237_v32  ;;  %2928 = vmatpush1.bf16.msra.mxu1 %v6242_v6 }
 0x398   : > { %2888 = vmatprep.subr.bf16.mxu0 %v6249_v4  ;;  %2929 = vmatprep.subr.bf16.mxu1 %v6254_v23  ;;  %v6291_v23 = vld [vmem:[%s6446_s2 + $0xc8] ss:$16 sps:$4 sm:$0xff]   ;;  %v4824_v4 = vpop.eup %4823 }
 0x39b   : > { %2889 = vmatpush1.bf16.msra.mxu0 %v6262_v5  ;;  %2930 = vmatpush1.bf16.msra.mxu1 %v6267_v15  ;;  %v6298_v5 = vld [vmem:[%s6446_s2 + $0xe4] ss:$16 sps:$4 sm:$0xff]   ;;  %v6303_v15 = vld [vmem:[%s6446_s2 + $0xec] ss:$16 sps:$4 sm:$0xff]  }
 0x39c   : > { %2890 = vmatprep.subr.bf16.mxu0 %v6274_v21  ;;  %2931 = vmatprep.subr.bf16.mxu1 %v6279_v2  ;;  %v6310_v2 = vld [vmem:[%s6446_s2 + $0xe0] ss:$16 sps:$4 sm:$0xff]   ;;  %v6315_v21 = vld [vmem:[%s6446_s2 + $0xe8] ss:$16 sps:$4 sm:$0xff]  }
 0x39f   : > { %v4826_v6 = vpop.eup %4825  ;;  %2891 = vmatpush1.bf16.msra.mxu0 %v6286_v16  ;;  %2932 = vmatpush1.bf16.msra.mxu1 %v6291_v23 }
 0x3a0   : > { %2892 = vmatprep.subr.bf16.mxu0 %v6298_v5  ;;  %2933 = vmatprep.subr.bf16.mxu1 %v6303_v15  ;;  %v2406_v32 = vmul.f32 %v4826_v6, %v4824_v4 }
 0x3a2   : > { %v2409_v9 = vpack.c.bf16 %v2406_v32, %v2406_v32 }
 0x3a3   : > { %2893 = vmatpush1.bf16.msra.mxu0 %v6310_v2  ;;  %2934 = vmatpush1.bf16.msra.mxu1 %v6315_v21 }
 0x3a4   : > { %3217 = vmatprep.subr.bf16.mxu0 %v5719_v25  ;;  %3258 = vmatprep.subr.bf16.mxu1 %v5724_v26  ;;  %v6705_v25 = vld [vmem:[#allocation8_spill] sm:$0xff] }
 0x3a5   : > { %v6706_v26 = vld [vmem:[#allocation12_spill] sm:$0xff] }
 0x3a6   : > { %2911 = vmatmul.mubr.bf16.vlgmr.msra.gmra.mrb[32].mxu0 %v2409_v9  ;;  %2952 = vmatmul.mubr.bf16.vlgmr.msra.gmra.mrb[32].mxu1 %v2409_v9 }
 0x3a7   : > { %3218 = vmatpush1.bf16.msra.mxu0 %v5731_v29  ;;  %3259 = vmatpush1.bf16.msra.mxu1 %v5736_v30  ;;  %v6707_v29 = vld [vmem:[#allocation9_spill] sm:$0xff] }
 0x3a8   : > { %3219 = vmatprep.subr.bf16.mxu0 %v5745_v33  ;;  %3260 = vmatprep.subr.bf16.mxu1 %v5750_v34  ;;  %v6708_v30 = vld [vmem:[#allocation13_spill] sm:$0xff]  ;;  %v6709_v33 = vld [vmem:[#allocation11_spill] sm:$0xff]  ;;  %v6710_v34 = vld [vmem:[#allocation14_spill] sm:$0xff] }
 0x3a9   : > { %3249 = vmatprep.mubr.bf16.mxu0 %v6583_v60  ;;  %3290 = vmatprep.mubr.bf16.mxu1 %v6583_v60 }
 0x3ab   : > { %3220 = vmatpush1.bf16.msra.mxu0 %v5759_v36  ;;  %3261 = vmatpush1.bf16.msra.mxu1 %v5764_v37  ;;  %v6711_v36 = vld [vmem:[#allocation15_spill] sm:$0xff]  ;;  %v6712_v37 = vld [vmem:[#allocation17_spill] sm:$0xff] }
 0x3ac   : > { %3221 = vmatprep.subr.bf16.mxu0 %v5771_v39  ;;  %3262 = vmatprep.subr.bf16.mxu1 %v5776_v41  ;;  %v6713_v39 = vld [vmem:[#allocation16_spill] sm:$0xff]  ;;  %v6714_v41 = vld [vmem:[#allocation18_spill] sm:$0xff] }
 0x3af   : > { %3222 = vmatpush1.bf16.msra.mxu0 %v5785_v42  ;;  %3263 = vmatpush1.bf16.msra.mxu1 %v5790_v43  ;;  %v6715_v42 = vld [vmem:[#allocation19_spill] sm:$0xff]  ;;  %v6716_v43 = vld [vmem:[#allocation21_spill] sm:$0xff] }
 0x3b0   : > { %3223 = vmatprep.subr.bf16.mxu0 %v5797_v44  ;;  %3264 = vmatprep.subr.bf16.mxu1 %v5802_v45  ;;  %v6717_v44 = vld [vmem:[#allocation20_spill] sm:$0xff]  ;;  %v6718_v45 = vld [vmem:[#allocation22_spill] sm:$0xff] }
 0x3b3   : > { %3224 = vmatpush1.bf16.msra.mxu0 %v5809_v47  ;;  %3265 = vmatpush1.bf16.msra.mxu1 %v5814_v49  ;;  %v6719_v47 = vld [vmem:[#allocation23_spill] sm:$0xff]  ;;  %v6720_v49 = vld [vmem:[#allocation25_spill] sm:$0xff] }
 0x3b4   : > { %3225 = vmatprep.subr.bf16.mxu0 %v5821_v63  ;;  %3266 = vmatprep.subr.bf16.mxu1 %v5826_v61  ;;  %v6721_v63 = vld [vmem:[#allocation24_spill] sm:$0xff]  ;;  %v6722_v61 = vld [vmem:[#allocation26_spill] sm:$0xff] }
 0x3b7   : > { %3226 = vmatpush1.bf16.msra.mxu0 %v5833_v1  ;;  %3267 = vmatpush1.bf16.msra.mxu1 %v5838_v62  ;;  %v6723_v1 = vld [vmem:[#allocation27_spill] sm:$0xff]  ;;  %v6724_v62 = vld [vmem:[#allocation28_spill] sm:$0xff] }
 0x3b8   : > { %3227 = vmatprep.subr.bf16.mxu0 %v5845_v3  ;;  %3268 = vmatprep.subr.bf16.mxu1 %v5850_v59  ;;  %v6725_v3 = vld [vmem:[#allocation29_spill] sm:$0xff]  ;;  %v6726_v59 = vld [vmem:[#allocation30_spill] sm:$0xff] }
 0x3bb   : > { %3228 = vmatpush1.bf16.msra.mxu0 %v5857_v55  ;;  %3269 = vmatpush1.bf16.msra.mxu1 %v5862_v54  ;;  %v6727_v55 = vld [vmem:[#allocation31_spill] sm:$0xff]  ;;  %v6728_v54 = vld [vmem:[#allocation32_spill] sm:$0xff] }
 0x3bc   : > { %3229 = vmatprep.subr.bf16.mxu0 %v5869_v56  ;;  %3270 = vmatprep.subr.bf16.mxu1 %v5874_v52  ;;  %v6729_v56 = vld [vmem:[#allocation33_spill] sm:$0xff]  ;;  %v6730_v52 = vld [vmem:[#allocation34_spill] sm:$0xff] }
 0x3bf   : > { %3230 = vmatpush1.bf16.msra.mxu0 %v5881_v57  ;;  %3271 = vmatpush1.bf16.msra.mxu1 %v5886_v50  ;;  %v6731_v57 = vld [vmem:[#allocation35_spill] sm:$0xff]  ;;  %v6732_v50 = vld [vmem:[#allocation36_spill] sm:$0xff] }
 0x3c0   : > { %3231 = vmatprep.subr.bf16.mxu0 %v5893_v0  ;;  %3272 = vmatprep.subr.bf16.mxu1 %v5898_v53  ;;  %v6733_v0 = vld [vmem:[#allocation37_spill] sm:$0xff]  ;;  %v6734_v53 = vld [vmem:[#allocation38_spill] sm:$0xff] }
 0x3c3   : > { %3232 = vmatpush1.bf16.msra.mxu0 %v5905_v48  ;;  %3273 = vmatpush1.bf16.msra.mxu1 %v5910_v51  ;;  %v6735_v48 = vld [vmem:[#allocation39_spill] sm:$0xff]  ;;  %v6736_v51 = vld [vmem:[#allocation40_spill] sm:$0xff] }
 0x3c4   : > { %3557 = vmatprep.subr.bf16.mxu0 %v5923_v46  ;;  %3598 = vmatprep.subr.bf16.mxu1 %v5928_v31 }
 0x3c6   : > { %3250 = vmatmul.mubr.bf16.vlgmr.msra.gmra.mrb[36].mxu0 %v2409_v9  ;;  %3291 = vmatmul.mubr.bf16.vlgmr.msra.gmra.mrb[36].mxu1 %v2409_v9 }
 0x3c7   : > { %3558 = vmatpush1.bf16.msra.mxu0 %v6705_v25  ;;  %3599 = vmatpush1.bf16.msra.mxu1 %v6706_v26 }
 0x3c8   : > { %3559 = vmatprep.subr.bf16.mxu0 %v6707_v29  ;;  %3600 = vmatprep.subr.bf16.mxu1 %v6708_v30  ;;  %v2960_v29 = vld [vmem:[#allocation4] sm:$0xf]  ;;  %v6737_v30 = vld [vmem:[#allocation7_spill] sm:$0xff] }
 0x3c9   : > { %3589 = vmatprep.mubr.bf16.mxu0 %v6583_v60  ;;  %3630 = vmatprep.mubr.bf16.mxu1 %v6583_v60 }
 0x3cb   : > { %3560 = vmatpush1.bf16.msra.mxu0 %v6709_v33  ;;  %3601 = vmatpush1.bf16.msra.mxu1 %v6710_v34  ;;  %v2965_v33 = vrot.slane %v2960_v29, %v6737_v30 }
 0x3cc   : > { %3561 = vmatprep.subr.bf16.mxu0 %v6711_v36  ;;  %3602 = vmatprep.subr.bf16.mxu1 %v6712_v37  ;;  %v6738_v37 = vld [vmem:[#allocation10_spill] sm:$0xff] }
 0x3cf   : > { %3562 = vmatpush1.bf16.msra.mxu0 %v6713_v39  ;;  %3603 = vmatpush1.bf16.msra.mxu1 %v6714_v41  ;;  %v2969_v39 = vrot.slane %v2960_v29, %v6738_v37 }
 0x3d0   : > { %3563 = vmatprep.subr.bf16.mxu0 %v6715_v42  ;;  %3604 = vmatprep.subr.bf16.mxu1 %v6716_v43 }
 0x3d3   : > { %3564 = vmatpush1.bf16.msra.mxu0 %v6717_v44  ;;  %3605 = vmatpush1.bf16.msra.mxu1 %v6718_v45 }
 0x3d4   : > { %3565 = vmatprep.subr.bf16.mxu0 %v6719_v47  ;;  %3606 = vmatprep.subr.bf16.mxu1 %v6720_v49 }
 0x3d7   : > { %3566 = vmatpush1.bf16.msra.mxu0 %v6721_v63  ;;  %3607 = vmatpush1.bf16.msra.mxu1 %v6722_v61 }
 0x3d8   : > { %3567 = vmatprep.subr.bf16.mxu0 %v6723_v1  ;;  %3608 = vmatprep.subr.bf16.mxu1 %v6724_v62 }
 0x3db   : > { %3568 = vmatpush1.bf16.msra.mxu0 %v6725_v3  ;;  %3609 = vmatpush1.bf16.msra.mxu1 %v6726_v59 }
 0x3dc   : > { %3569 = vmatprep.subr.bf16.mxu0 %v6727_v55  ;;  %3610 = vmatprep.subr.bf16.mxu1 %v6728_v54  ;;  %v2977_v54 = vrot.slane %v2960_v29, %v5670_v7 }
 0x3df   : > { %3570 = vmatpush1.bf16.msra.mxu0 %v6729_v56  ;;  %3611 = vmatpush1.bf16.msra.mxu1 %v6730_v52  ;;  %v2973_v52 = vrot.slane %v2960_v29, %v5673_v58 }
 0x3e0   : > { %3571 = vmatprep.subr.bf16.mxu0 %v6731_v57  ;;  %3612 = vmatprep.subr.bf16.mxu1 %v6732_v50 }
 0x3e3   : > { %3572 = vmatpush1.bf16.msra.mxu0 %v6733_v0  ;;  %3613 = vmatpush1.bf16.msra.mxu1 %v6734_v53 }
 0x3e4   : > { %3799 = vmatprep.subr.bf16.mxu0 %v6735_v48  ;;  %3840 = vmatprep.subr.bf16.mxu1 %v6736_v51 }
 0x459   : > { %v2670_v46 = vpop.f32.mrb[28].mxu0  ;;  %v2711_v31 = vpop.f32.mrb[28].mxu1 }
 0x45a   : > { %v2672_v9 = vpop.f32.mrb[29].mxu0  ;;  %v2713_v32 = vpop.f32.mrb[29].mxu1 }
 0x45b   : > { %v2674_v6 = vpop.f32.mrb[30].mxu0  ;;  %v2715_v4 = vpop.f32.mrb[30].mxu1 }
 0x45c   : > { %v2675_v25 = vpop.f32.mrb[31].mxu0  ;;  %v2716_v26 = vpop.f32.mrb[31].mxu1 }
 0x479   : > { %v2912_v34 = vpop.f32.mrb[32].mxu0  ;;  %v2953_v36 = vpop.f32.mrb[32].mxu1 }
 0x47a   : > { %v2913_v41 = vadd.f32 %v2912_v34, %v2670_v46  ;;  %v2954_v42 = vadd.f32 %v2953_v36, %v2711_v31  ;;  %v2914_v43 = vpop.f32.mrb[33].mxu0  ;;  %v2955_v44 = vpop.f32.mrb[33].mxu1  ;;  %v4330_v46 = vld [vmem:[%s4998_s14 + $0x30] sm:$0xff] }
 0x47b   : > { %v2915_v45 = vadd.f32 %v2914_v43, %v2672_v9  ;;  %v2956_v47 = vadd.f32 %v2955_v44, %v2713_v32  ;;  %v2916_v49 = vpop.f32.mrb[34].mxu0  ;;  %v2957_v63 = vpop.f32.mrb[34].mxu1  ;;  %v3019_v32 = vunpack.c.l.bf16 %v4330_v46  ;;  %v3020_v4 = vunpack.c.h.bf16 %v4330_v46 }
 0x47c   : > { %v2982_v61 = vadd.f32 %v2965_v33, %v2913_v41  ;;  %v2917_v1 = vpop.f32.mrb[35].mxu0  ;;  %v2958_v62 = vpop.f32.mrb[35].mxu1  ;;  %v2984_v50 = vadd.f32 %v2973_v52, %v2954_v42  ;;  %v4331_v41 = vld [vmem:[%s4998_s14 + $0x38] sm:$0xff] }
 0x47d   : > { %v2983_v3 = vadd.f32 %v2969_v39, %v2915_v45  ;;  %v2985_v56 = vadd.f32 %v2977_v54, %v2956_v47 }
 0x47e   : > { %v4326_v59 = vmul.f32 -1.442695, %v2982_v61 }
 0x47f   : > { %v4327_v55 = vmul.f32 -1.442695, %v2983_v3  ;;  %v4328_v57 = vmul.f32 -1.442695, %v2985_v56  ;;  %v3022_v3 = vunpack.c.h.bf16 %v4331_v41 }
 0x480   : > { %4827 = vpow2.f32 %v4326_v59  ;;  %v3021_v59 = vunpack.c.l.bf16 %v4331_v41 }
 0x481   : > { %4829 = vpow2.f32 %v4327_v55 }
 0x482   : > { %4831 = vpow2.f32 %v4328_v57 }
 0x483   : > { %4833 = vtanh.f32 %v2984_v50 }
 0x48a   : > { %v4828_v0 = vpop.eup %4827 }
 0x48b   : > { %v4830_v53 = vpop.eup %4829  ;;  %v2990_v48 = vadd.f32 1.0, %v4828_v0 }
 0x48c   : > { %v2996_v51 = vadd.f32 1.0, %v4830_v53  ;;  %v4832_v31 = vpop.eup %4831 }
 0x48d   : > { %4835 = vrcp.f32 %v2990_v48  ;;  %v4834_v9 = vpop.eup %4833  ;;  %v3003_v29 = vadd.f32 1.0, %v4832_v31 }
 0x48e   : > { %4837 = vrcp.f32 %v2996_v51 }
 0x48f   : > { %4839 = vrcp.f32 %v3003_v29 }
 0x497   : > { %v4836_v6 = vpop.eup %4835 }
 0x498   : > { %v4838_v25 = vpop.eup %4837  ;;  %v3007_v26 = vmul.f32 %v4836_v6, %v4834_v9 }
 0x499   : > { %v3006_v33 = vmul.f32 %v4838_v25, %v6131_v18  ;;  %v3251_v34 = vpop.f32.mrb[36].mxu0  ;;  %v3292_v36 = vpop.f32.mrb[36].mxu1 }
 0x49a   : > { %v3299_v39 = vadd.f32 %v3251_v34, %v3019_v32  ;;  %v3253_v42 = vpop.f32.mrb[37].mxu0  ;;  %v3294_v43 = vpop.f32.mrb[37].mxu1  ;;  %v3301_v56 = vadd.f32 %v3292_v36, %v3021_v59 }
 0x49b   : > { %v6398_v44 = vadd.f32 %v3007_v26, %v3006_v33  ;;  %v3300_v45 = vadd.f32 %v3253_v42, %v3020_v4  ;;  %v3255_v47 = vpop.f32.mrb[38].mxu0  ;;  %v3296_v49 = vpop.f32.mrb[38].mxu1  ;;  %v3302_v18 = vadd.f32 %v3294_v43, %v3022_v3 }
 0x49c   : > { %v4364_v63 = vmul.f32 -1.442695, %v3299_v39  ;;  %v3256_v61 = vpop.f32.mrb[39].mxu0  ;;  %v3297_v1 = vpop.f32.mrb[39].mxu1 }
 0x49d   : > { %4841 = vtanh.f32 %v6398_v44  ;;  %v4365_v62 = vmul.f32 -1.442695, %v3300_v45  ;;  %v4366_v55 = vmul.f32 -1.442695, %v3302_v18  ;;  %v4840_v54 = vpop.eup %4839 }
 0x49e   : > { %4843 = vpow2.f32 %v4364_v63 }
 0x49f   : > { %4845 = vpow2.f32 %v4365_v62 }
 0x4a0   : > { %4847 = vpow2.f32 %v4366_v55 }
 0x4a1   : > { %4849 = vtanh.f32 %v3301_v56 }
 0x4a7   : > { %v4842_v52 = vpop.eup %4841 }
 0x4a8   : > { %v4844_v57 = vpop.eup %4843  ;;  %v3010_v50 = vmul.f32 %v4842_v52, %v4840_v54 }
 0x4a9   : > { %v4846_v0 = vpop.eup %4845  ;;  %v3307_v53 = vadd.f32 1.0, %v4844_v57 }
 0x4aa   : > { %v3013_v48 = vpack.c.bf16 %v3010_v50, %v3010_v50  ;;  %v3313_v51 = vadd.f32 1.0, %v4846_v0  ;;  %v4848_v46 = vpop.eup %4847 }
 0x4ab   : > { %4851 = vrcp.f32 %v3307_v53 }
 0x4ac   : > { %4329 = vst [vmem:[%s5003_s17 + $0x8] sm:$0xf] %v3013_v48  ;;  %4853 = vrcp.f32 %v3313_v51  ;;  %3590 = vmatmul.mubr.bf16.vlgmr.msra.gmra.mrb[40].mxu0 %v3013_v48  ;;  %3631 = vmatmul.mubr.bf16.vlgmr.msra.gmra.mrb[40].mxu1 %v3013_v48 }
 0x4ad   : > { %3800 = vmatpush1.bf16.msra.mxu0 %v6137_v40  ;;  %3841 = vmatpush1.bf16.msra.mxu1 %v6142_v11  ;;  %v4850_v40 = vpop.eup %4849 }
 0x4ae   : > { %3801 = vmatprep.subr.bf16.mxu0 %v6147_v27  ;;  %3842 = vmatprep.subr.bf16.mxu1 %v6152_v19  ;;  %v3320_v19 = vadd.f32 1.0, %v4848_v46 }
 0x4af   : > { %3831 = vmatprep.mubr.bf16.mxu0 %v6583_v60  ;;  %3872 = vmatprep.mubr.bf16.mxu1 %v6583_v60 }
 0x4b0   : > { %4855 = vrcp.f32 %v3320_v19 }
 0x4b1   : > { %3802 = vmatpush1.bf16.msra.mxu0 %v6160_v22  ;;  %3843 = vmatpush1.bf16.msra.mxu1 %v6165_v17  ;;  %v6739_v17 = vld [vmem:[#allocation41_spill] sm:$0xff] }
 0x4b2   : > { %3803 = vmatprep.subr.bf16.mxu0 %v6172_v13  ;;  %3844 = vmatprep.subr.bf16.mxu1 %v6177_v14  ;;  %v6740_v13 = vld [vmem:[#allocation42_spill] sm:$0xff]  ;;  %v6741_v14 = vld [vmem:[#allocation43_spill] sm:$0xff] }
 0x4b5   : > { %v4852_v31 = vpop.eup %4851  ;;  %3804 = vmatpush1.bf16.msra.mxu0 %v6186_v24  ;;  %3845 = vmatpush1.bf16.msra.mxu1 %v6191_v20  ;;  %v6742_v24 = vld [vmem:[#allocation44_spill] sm:$0xff]  ;;  %v6743_v20 = vld [vmem:[#allocation45_spill] sm:$0xff] }
 0x4b6   : > { %v4854_v11 = vpop.eup %4853  ;;  %v3324_v27 = vmul.f32 %v4852_v31, %v4850_v40  ;;  %3805 = vmatprep.subr.bf16.mxu0 %v6198_v10  ;;  %3846 = vmatprep.subr.bf16.mxu1 %v6203_v8  ;;  %v6744_v10 = vld [vmem:[#allocation46_spill] sm:$0xff]  ;;  %v6745_v8 = vld [vmem:[#allocation48_spill] sm:$0xff] }
 0x4b7   : > { %v3323_v60 = vmul.f32 %v4854_v11, %v6230_v28 }
 0x4b9   : > { %v3325_v22 = vadd.f32 %v3324_v27, %v3323_v60  ;;  %3806 = vmatpush1.bf16.msra.mxu0 %v6210_v12  ;;  %3847 = vmatpush1.bf16.msra.mxu1 %v6215_v35  ;;  %v6746_v12 = vld [vmem:[#allocation50_spill] sm:$0xff]  ;;  %v6747_v35 = vld [vmem:[#allocation47_spill] sm:$0xff] }
 0x4ba   : > { %3807 = vmatprep.subr.bf16.mxu0 %v6222_v38  ;;  %3848 = vmatprep.subr.bf16.mxu1 %v6739_v17  ;;  %v4856_v38 = vpop.eup %4855 }
 0x4bb   : > { %4857 = vtanh.f32 %v3325_v22  ;;  %3329 = vst [vmem:[#allocation3] sm:$0xff] %v3325_v22 }
 0x4bd   : > { %3808 = vmatpush1.bf16.msra.mxu0 %v6740_v13  ;;  %3849 = vmatpush1.bf16.msra.mxu1 %v6741_v14 }
 0x4be   : > { %3809 = vmatprep.subr.bf16.mxu0 %v6742_v24  ;;  %3850 = vmatprep.subr.bf16.mxu1 %v6743_v20 }
 0x4c1   : > { %3810 = vmatpush1.bf16.msra.mxu0 %v6744_v10  ;;  %3851 = vmatpush1.bf16.msra.mxu1 %v6745_v8 }
 0x4c2   : > { %3811 = vmatprep.subr.bf16.mxu0 %v6746_v12  ;;  %3852 = vmatprep.subr.bf16.mxu1 %v6747_v35 }
 0x4c5   : > { %v4858_v28 = vpop.eup %4857  ;;  %3812 = vmatpush1.bf16.msra.mxu0 %v6286_v16  ;;  %3853 = vmatpush1.bf16.msra.mxu1 %v6291_v23 }
 0x4c6   : > { %3813 = vmatprep.subr.bf16.mxu0 %v6298_v5  ;;  %3854 = vmatprep.subr.bf16.mxu1 %v6303_v15  ;;  %v3327_v9 = vmul.f32 %v4858_v28, %v4856_v38  ;;  %v3881_v5 = vld [vmem:[#allocation4] sm:$0xf] }
 0x4c7   : > { %v3886_v15 = vrot.slane %v3881_v5, %v6737_v30  ;;  %v3890_v39 = vrot.slane %v3881_v5, %v6738_v37  ;;  %v3898_v30 = vrot.slane %v3881_v5, %v5670_v7  ;;  %v3894_v37 = vrot.slane %v3881_v5, %v5673_v58 }
 0x4c8   : > { %3328 = vst [vmem:[#allocation2] sm:$0xff] %v3327_v9  ;;  %v3330_v32 = vpack.c.bf16 %v3327_v9, %v3327_v9 }
 0x4c9   : > { %3814 = vmatpush1.bf16.msra.mxu0 %v6310_v2  ;;  %3855 = vmatpush1.bf16.msra.mxu1 %v6315_v21 }
 0x4cc   : > { %3832 = vmatmul.mubr.bf16.vlgmr.msra.gmra.mrb[44].mxu0 %v3330_v32  ;;  %3873 = vmatmul.mubr.bf16.vlgmr.msra.gmra.mrb[44].mxu1 %v3330_v32 }
 0x57f   : > { %v3591_v6 = vpop.f32.mrb[40].mxu0  ;;  %v3632_v4 = vpop.f32.mrb[40].mxu1 }
 0x580   : > { %v3593_v25 = vpop.f32.mrb[41].mxu0  ;;  %v3634_v26 = vpop.f32.mrb[41].mxu1 }
 0x581   : > { %v3595_v16 = vpop.f32.mrb[42].mxu0  ;;  %v3636_v29 = vpop.f32.mrb[42].mxu1 }
 0x582   : > { %v3596_v23 = vpop.f32.mrb[43].mxu0  ;;  %v3637_v33 = vpop.f32.mrb[43].mxu1 }
 0x59f   : > { %v3833_v34 = vpop.f32.mrb[44].mxu0  ;;  %v3874_v36 = vpop.f32.mrb[44].mxu1 }
 0x5a0   : > { %v3834_v2 = vadd.f32 %v3833_v34, %v3591_v6  ;;  %v3875_v41 = vadd.f32 %v3874_v36, %v3632_v4  ;;  %v3835_v21 = vpop.f32.mrb[45].mxu0  ;;  %v3876_v42 = vpop.f32.mrb[45].mxu1 }
 0x5a1   : > { %v3836_v43 = vadd.f32 %v3835_v21, %v3593_v25  ;;  %v3877_v45 = vadd.f32 %v3876_v42, %v3634_v26  ;;  %v3837_v47 = vpop.f32.mrb[46].mxu0  ;;  %v3878_v49 = vpop.f32.mrb[46].mxu1 }
 0x5a2   : > { %v3903_v63 = vadd.f32 %v3886_v15, %v3834_v2  ;;  %v3838_v61 = vpop.f32.mrb[47].mxu0  ;;  %v3879_v1 = vpop.f32.mrb[47].mxu1  ;;  %v3905_v54 = vadd.f32 %v3894_v37, %v3875_v41 }
 0x5a3   : > { %v3904_v62 = vadd.f32 %v3890_v39, %v3836_v43  ;;  %v3906_v59 = vadd.f32 %v3898_v30, %v3877_v45 }
 0x5a4   : > { %v4431_v3 = vmul.f32 -1.442695, %v3903_v63 }
 0x5a5   : > { %v4432_v18 = vmul.f32 -1.442695, %v3904_v62  ;;  %v4433_v55 = vmul.f32 -1.442695, %v3906_v59 }
 0x5a6   : > { %4859 = vpow2.f32 %v4431_v3 }
 0x5a7   : > { %4861 = vpow2.f32 %v4432_v18 }
 0x5a8   : > { %4863 = vpow2.f32 %v4433_v55 }
 0x5a9   : > { %4865 = vtanh.f32 %v3905_v54 }
 0x5b0   : > { %v4860_v56 = vpop.eup %4859 }
 0x5b1   : > { %v4862_v52 = vpop.eup %4861  ;;  %v3911_v57 = vadd.f32 1.0, %v4860_v56 }
 0x5b2   : > { %v3917_v50 = vadd.f32 1.0, %v4862_v52  ;;  %v4864_v0 = vpop.eup %4863 }
 0x5b3   : > { %4867 = vrcp.f32 %v3911_v57  ;;  %v4866_v53 = vpop.eup %4865  ;;  %v3924_v46 = vadd.f32 1.0, %v4864_v0 }
 0x5b4   : > { %4869 = vrcp.f32 %v3917_v50 }
 0x5b5   : > { %4871 = vrcp.f32 %v3924_v46 }
 0x5bd   : > { %v4868_v48 = vpop.eup %4867 }
 0x5be   : > { %v4870_v7 = vpop.eup %4869  ;;  %v3928_v51 = vmul.f32 %v4868_v48, %v4866_v53 }
 0x5bf   : > { %v3927_v40 = vmul.f32 %v4870_v7, %v6398_v44  ;;  %v4872_v31 = vpop.eup %4871 }
 0x5c1   : > { %v3929_v58 = vadd.f32 %v3928_v51, %v3927_v40 }
 0x5c3   : > { %4873 = vtanh.f32 %v3929_v58  ;;  %3933 = vst [vmem:[#allocation3 + $0x8] sm:$0xff] %v3929_v58 }
 0x5cd   : > { %v4874_v11 = vpop.eup %4873 }
 0x5ce   : > { %v3931_v27 = vmul.f32 %v4874_v11, %v4872_v31 }
 0x5d0   : > { %3932 = vst [vmem:[#allocation2 + $0x8] sm:$0xff] %v3931_v27  ;;  %v3934_v19 = vpack.c.bf16 %v3931_v27, %v3931_v27 }
 0x5d2   : > { %4434 = vst [vmem:[%s5003_s17 + $0xc] sm:$0xf] %v3934_v19 }
 0x5d3 PF: > { %s16_s18 = sadd.s32 1, %s4913_s18  }
 0x5d4   : > { %p13_p4 = scmp.ge.s32.totalorder %s16_s18, 5  }
 0x5d6   :  { %15 = sbr.rel (!%p13_p4) target bundleno = 1 (0x1), region = 87 }
 0x5dd   :  { %3959 = vsyncpa [#allocation5], 1 }
 0x5de   :  { %3961 = vsyncpa [#allocation5 + $0x1], 1 }

</bundles_post_ra>
